<compile_context>
chip_gen: v7x
topology: tpu7x:2x2x1
jax: 0.10.0
libtpu: 0.0.40
codegen_flags: <defaults>
</compile_context>

<pallas_src>
import functools

import jax
import jax.numpy as jnp
from jax.experimental import pallas as pl
from jax.experimental.pallas import tpu as pltpu

LEAKY_SLOPE = 0.2
BN_EPS = 1e-5

_TM_CONV1 = 4096      # conv1 M-tile (K=16 -> big tiles to keep DMAs >=128 KiB)
_TM_BN = 2048         # fallback conv / affine / conv4 M-tile


def _vmem_limit_bytes():
    try:
        cap = int(pltpu.get_tpu_info().vmem_capacity_bytes)
    except Exception:
        cap = 64 * 1024 * 1024
    return max(32 * 1024 * 1024, min(int(cap * 0.75), 100 * 1024 * 1024))


_VMEM_LIMIT = _vmem_limit_bytes()
_FUSED_BUDGET = int(_VMEM_LIMIT * 0.6)   # headroom for compiler temporaries


# ------------------------------ small helpers -------------------------------
def _round_up(x, m):
    return ((x + m - 1) // m) * m


def _pad_and_tile(m, tm):
    """Return (padded_m, tile_m): one full block if m <= tm, else tm-tiled.
    Small-M padding is a multiple of 16 (bf16 sublane packing)."""
    if m <= tm:
        mp = _round_up(m, 16)
        return mp, mp
    return _round_up(m, tm), tm


def _pad_rows(x, m_pad):
    m = x.shape[0]
    return x if m_pad == m else jnp.pad(x, ((0, m_pad - m), (0, 0)))


def _pad_cout(w, cout_pad):
    return jnp.pad(w, ((0, 0), (0, cout_pad - w.shape[1])))


def _mosaic_params(sem=None):
    return pltpu.CompilerParams(dimension_semantics=sem,
                                vmem_limit_bytes=_VMEM_LIMIT)


# ------------------------------ Pallas kernels -------------------------------
def _matmul_bias_act_kernel(x_ref, w_ref, b_ref, o_ref, *, act):
    """One M-tile: (tm,K)@(K,Cout) on the MXU (bf16 in, f32 acc) + bias + act."""
    y = jnp.dot(x_ref[...], w_ref[...], preferred_element_type=jnp.float32)
    y = y + b_ref[...]
    if act == "leaky":
        y = jnp.where(y >= 0, y, LEAKY_SLOPE * y)
    elif act == "sigmoid":
        # exp and approx reciprocal both ride the EUP slot (VPU stays free).
        y = pl.reciprocal(1.0 + jnp.exp(-y), approx=True)
    o_ref[...] = y.astype(o_ref.dtype)


def _conv_tap_bn_leaky_kernel(x_ref, w_ref, b_ref, g_ref, bt_ref, o_ref, *, m, nw):
    """Fused k4/s2/p1 conv + training BatchNorm + LeakyReLU, single block.

    x_ref : ((OH+1)*N*OW, 8*Cin) bf16, rows ordered (h, n, w) -- the two conv
            taps are the contiguous row ranges [0, m) and [nw, nw + m).
    w_ref : (2, 8*Cin, Cout) bf16, b/g/bt: (1, Cout) f32, o_ref: (m, Cout) bf16.
    """
    x0 = x_ref[0:m, :]
    x1 = x_ref[nw:nw + m, :]
    y = jnp.dot(x0, w_ref[0], preferred_element_type=jnp.float32)
    y = y + jnp.dot(x1, w_ref[1], preferred_element_type=jnp.float32)
    y = y + b_ref[...]
    inv_m = 1.0 / m
    mean = jnp.sum(y, axis=0, keepdims=True) * inv_m
    var = jnp.maximum(jnp.sum(y * y, axis=0, keepdims=True) * inv_m - mean * mean, 0.0)
    scale = g_ref[...] * jax.lax.rsqrt(var + BN_EPS)
    shift = bt_ref[...] - mean * scale
    z = y * scale + shift
    o_ref[...] = jnp.where(z >= 0, z, LEAKY_SLOPE * z).astype(o_ref.dtype)


def _matmul_bias_pstats_kernel(x_ref, w_ref, b_ref, o_ref, st_ref, *, m_true, tm):
    """Fallback BN pass 1: matmul + bias (bf16 out) + PER-TILE partial
    sum / sumsq written to this tile's own stats block ('parallel'-safe)."""
    i = pl.program_id(0)
    y = jnp.dot(x_ref[...], w_ref[...], preferred_element_type=jnp.float32)
    y = y + b_ref[...]
    o_ref[...] = y.astype(o_ref.dtype)

    row = i * tm + jax.lax.broadcasted_iota(jnp.int32, (tm, 1), 0)
    ym = jnp.where(row < m_true, y, 0.0)          # mask padded rows
    ps = jnp.sum(ym, axis=0, keepdims=True)       # (1, Cout)
    pq = jnp.sum(ym * ym, axis=0, keepdims=True)  # (1, Cout)
    ridx = jax.lax.broadcasted_iota(jnp.int32, (8, 1), 0)
    st_ref[...] = jnp.where(ridx == 0, ps, jnp.where(ridx == 1, pq, 0.0))


def _affine_leaky_kernel(y_ref, s_ref, t_ref, o_ref):
    """Fallback BN pass 2: folded BatchNorm affine + LeakyReLU(0.2)."""
    y = y_ref[...].astype(jnp.float32) * s_ref[...] + t_ref[...]
    o_ref[...] = jnp.where(y >= 0, y, LEAKY_SLOPE * y).astype(o_ref.dtype)


# --------------------------- pallas_call wrappers ----------------------------
def conv_act(patches, w_mat, bias, *, act, out_dtype, tm):
    """im2col-matmul + bias + activation, M-tiled, weights VMEM-resident."""
    m, k = patches.shape
    cout = w_mat.shape[1]
    m_pad, tmm = _pad_and_tile(m, tm)
    x = _pad_rows(patches.astype(jnp.bfloat16), m_pad)
    out = pl.pallas_call(
        functools.partial(_matmul_bias_act_kernel, act=act),
        out_shape=jax.ShapeDtypeStruct((m_pad, cout), out_dtype),
        grid=(m_pad // tmm,),
        in_specs=[
            pl.BlockSpec((tmm, k), lambda i: (i, 0)),
            pl.BlockSpec((k, cout), lambda i: (0, 0)),   # weight stays in VMEM
            pl.BlockSpec((1, cout), lambda i: (0, 0)),
        ],
        out_specs=pl.BlockSpec((tmm, cout), lambda i: (i, 0)),
        compiler_params=_mosaic_params(("parallel",)),
    )(x, w_mat.astype(jnp.bfloat16), bias.reshape(1, cout).astype(jnp.float32))
    return out[:m]


def _fused_bytes_est(n, oh, ow, cin, cout):
    """Conservative VMEM estimate for the fused conv+BN kernel."""
    m = n * oh * ow
    c8 = 8 * cin
    xflat = (m + n * ow) * c8 * 2
    w = 2 * c8 * cout * 2
    out = m * cout * 2
    temps = 3 * m * cout * 4 + 2 * m * c8 * 2
    return xflat + w + out + temps


def _build_tap_rows(x_nhwc, oh, ow):
    """Pad(1) + space-to-depth(2) + W-tap concat, rows ordered (h, n, w).

    Result: ((oh+1)*n*ow, 8*C) bf16 -- the two conv taps become contiguous row
    ranges, so the kernel needs only plain 2-D slices (no in-kernel reshape).
    Traffic ~2x the raw activation (vs 4x write + 4x read for im2col patches).
    """
    n, _, _, c = x_nhwc.shape
    xp = jnp.pad(x_nhwc, ((0, 0), (1, 1), (1, 1), (0, 0)))
    xs = xp.reshape(n, oh + 1, 2, ow + 1, 2, c)
    xs = jnp.transpose(xs, (1, 0, 3, 2, 4, 5))          # (h, n, w', di, dj, c)
    xs = xs.reshape(oh + 1, n, ow + 1, 4 * c)
    xcat = jnp.concatenate([xs[:, :, 0:ow, :], xs[:, :, 1:ow + 1, :]], axis=-1)
    return xcat.reshape((oh + 1) * n * ow, 8 * c).astype(jnp.bfloat16)


def _conv_bn_leaky_im2col(patches, w_mat, bias, gamma, beta):
    """Fallback (huge batch): tiled conv + parallel partial stats + tiled affine."""
    m, k = patches.shape
    cout = w_mat.shape[1]
    m_pad, tm = _pad_and_tile(m, _TM_BN)
    x = _pad_rows(patches.astype(jnp.bfloat16), m_pad)
    nt = m_pad // tm

    y, stats = pl.pallas_call(
        functools.partial(_matmul_bias_pstats_kernel, m_true=m, tm=tm),
        out_shape=(jax.ShapeDtypeStruct((m_pad, cout), jnp.bfloat16),
                   jax.ShapeDtypeStruct((nt * 8, cout), jnp.float32)),
        grid=(nt,),
        in_specs=[
            pl.BlockSpec((tm, k), lambda i: (i, 0)),
            pl.BlockSpec((k, cout), lambda i: (0, 0)),
            pl.BlockSpec((1, cout), lambda i: (0, 0)),
        ],
        out_specs=(pl.BlockSpec((tm, cout), lambda i: (i, 0)),
                   pl.BlockSpec((8, cout), lambda i: (i, 0))),
        compiler_params=_mosaic_params(("parallel",)),
    )(x, w_mat.astype(jnp.bfloat16), bias.reshape(1, cout).astype(jnp.float32))

    st = stats.reshape(nt, 8, cout)
    cnt = float(m)
    mean = jnp.sum(st[:, 0, :], axis=0) / cnt
    var = jnp.maximum(jnp.sum(st[:, 1, :], axis=0) / cnt - mean * mean, 0.0)
    scale = gamma * jax.lax.rsqrt(var + BN_EPS)
    shift = beta - mean * scale

    out = pl.pallas_call(
        _affine_leaky_kernel,
        out_shape=jax.ShapeDtypeStruct((m_pad, cout), jnp.bfloat16),
        grid=(nt,),
        in_specs=[
            pl.BlockSpec((tm, cout), lambda i: (i, 0)),
            pl.BlockSpec((1, cout), lambda i: (0, 0)),
            pl.BlockSpec((1, cout), lambda i: (0, 0)),
        ],
        out_specs=pl.BlockSpec((tm, cout), lambda i: (i, 0)),
        compiler_params=_mosaic_params(("parallel",)),
    )(y, scale.reshape(1, cout), shift.reshape(1, cout))
    return out[:m]


def conv_bn_leaky(x_nhwc, w_taps, w_mat, bias, gamma, beta, *, force_fallback=False):
    """Conv(k4,s2,p1) + training-mode BatchNorm2d + LeakyReLU(0.2)."""
    n, h, w, c = x_nhwc.shape
    oh, ow = h // 2, w // 2
    cout = w_taps.shape[-1]
    m = n * oh * ow

    if (not force_fallback) and _fused_bytes_est(n, oh, ow, c, cout) <= _FUSED_BUDGET:
        xflat = _build_tap_rows(x_nhwc, oh, ow)
        out = pl.pallas_call(
            functools.partial(_conv_tap_bn_leaky_kernel, m=m, nw=n * ow),
            out_shape=jax.ShapeDtypeStruct((m, cout), jnp.bfloat16),
            compiler_params=_mosaic_params(None),
        )(xflat, w_taps.astype(jnp.bfloat16),
          bias.reshape(1, cout).astype(jnp.float32),
          gamma.reshape(1, cout).astype(jnp.float32),
          beta.reshape(1, cout).astype(jnp.float32))
        # rows are ordered (oh, n, ow) -> back to NHWC (transpose fuses into the
        # next layer's tap-slab / im2col construction).
        return out.reshape(oh, n, ow, cout).transpose(1, 0, 2, 3)

    patches, _, _ = im2col(x_nhwc, 4, 4, 2, 1)
    y2d = _conv_bn_leaky_im2col(patches, w_mat, bias, gamma, beta)
    return y2d.reshape(n, oh, ow, cout)


# -------------------------------- glue ops -----------------------------------
def im2col(x_nhwc, kh, kw, stride, pad):
    """Extract conv patches. Returns ((M, KH*KW*Cin), OH, OW)."""
    x = jnp.pad(x_nhwc, ((0, 0), (pad, pad), (pad, pad), (0, 0)))
    n, h, w, c = x.shape
    oh = (h - kh) // stride + 1
    ow = (w - kw) // stride + 1
    slabs = []
    for i in range(kh):
        for j in range(kw):
            slabs.append(x[:, i:i + stride * oh:stride, j:j + stride * ow:stride, :])
    p = jnp.stack(slabs, axis=3)  # (N, OH, OW, KH*KW, C)
    return p.reshape(n * oh * ow, kh * kw * c), oh, ow


def torch_weight_to_mat(w_oihw):
    """(Cout, Cin, KH, KW) -> (KH*KW*Cin, Cout), matching im2col feature order."""
    cout, cin, kh, kw = w_oihw.shape
    return jnp.transpose(w_oihw, (2, 3, 1, 0)).reshape(kh * kw * cin, cout)


def torch_weight_to_taps(w_oihw):
    """(Cout, Cin, 4, 4) -> (2, 8*Cin, Cout) matching _build_tap_rows layout:
    within a tap bi, feature index = bj*4C + (di*2+dj)*C + c, ki=2bi+di, kj=2bj+dj."""
    cout, cin, kh, kw = w_oihw.shape
    w = jnp.transpose(w_oihw, (2, 3, 1, 0))          # (ki, kj, c, co)
    w = w.reshape(2, 2, 2, 2, cin, cout)             # (bi, di, bj, dj, c, co)
    w = jnp.transpose(w, (0, 2, 1, 3, 4, 5))         # (bi, bj, di, dj, c, co)
    return w.reshape(2, 8 * cin, cout)


# ---------------------------- parameter creation -----------------------------
def init_params(key):
    """Mimics utils.initialize_weights: Conv ~ N(0, 0.02), bias 0;
    BN weight ~ N(1, 0.02), BN bias 0 (raw PyTorch-layout params)."""
    ks = jax.random.split(key, 6)
    p = {}
    p["w1"] = 0.02 * jax.random.normal(ks[0], (64, 1, 4, 4), jnp.float32)
    p["b1"] = jnp.zeros((64,), jnp.float32)
    p["w2"] = 0.02 * jax.random.normal(ks[1], (128, 64, 4, 4), jnp.float32)
    p["b2"] = jnp.zeros((128,), jnp.float32)
    p["w3"] = 0.02 * jax.random.normal(ks[2], (256, 128, 4, 4), jnp.float32)
    p["b3"] = jnp.zeros((256,), jnp.float32)
    p["w4"] = 0.02 * jax.random.normal(ks[3], (1, 256, 4, 4), jnp.float32)
    p["b4"] = jnp.zeros((1,), jnp.float32)
    p["bn2_g"] = 1.0 + 0.02 * jax.random.normal(ks[4], (128,), jnp.float32)
    p["bn2_b"] = jnp.zeros((128,), jnp.float32)
    p["bn3_g"] = 1.0 + 0.02 * jax.random.normal(ks[5], (256,), jnp.float32)
    p["bn3_b"] = jnp.zeros((256,), jnp.float32)
    return p


def prepare_params(raw):
    """Convert raw params to kernel layouts (tap weights, lane-padded matmuls)."""
    p = {}
    p["w1m"] = _pad_cout(torch_weight_to_mat(raw["w1"]), 128)   # Cout 64 -> 128 lanes
    p["b1p"] = jnp.pad(raw["b1"], (0, 64))
    p["w2t"] = torch_weight_to_taps(raw["w2"])
    p["w2m"] = torch_weight_to_mat(raw["w2"])
    p["b2"] = raw["b2"]
    p["bn2_g"], p["bn2_b"] = raw["bn2_g"], raw["bn2_b"]
    p["w3t"] = torch_weight_to_taps(raw["w3"])
    p["w3m"] = torch_weight_to_mat(raw["w3"])
    p["b3"] = raw["b3"]
    p["bn3_g"], p["bn3_b"] = raw["bn3_g"], raw["bn3_b"]
    p["w4m"] = _pad_cout(torch_weight_to_mat(raw["w4"]), 128)   # Cout 1 -> 128 lanes
    p["b4p"] = jnp.pad(raw["b4"], (0, 127))
    return p


# -------------------------------- forward pass --------------------------------
@functools.partial(jax.jit, static_argnames=("force_fallback",))
def discriminator_forward(img_nchw, params, force_fallback=False):
    """img_nchw: (N, 1, 32, 32) f32 -> (N, 1) f32 (== .squeeze(1).squeeze(2))."""
    n = img_nchw.shape[0]
    x = jnp.transpose(img_nchw, (0, 2, 3, 1)).astype(jnp.bfloat16)   # NHWC, bf16

    # Conv(1->64, k4, s2, p1) + LeakyReLU          (Cout padded to 128 lanes)
    pch, oh, ow = im2col(x, 4, 4, 2, 1)
    y = conv_act(pch, params["w1m"], params["b1p"], act="leaky",
                 out_dtype=jnp.bfloat16, tm=_TM_CONV1)
    x = y[:, :64].reshape(n, oh, ow, 64)

    # Conv(64->128, k4, s2, p1) + BN + LeakyReLU   (fused tap kernel)
    x = conv_bn_leaky(x, params["w2t"], params["w2m"], params["b2"],
                      params["bn2_g"], params["bn2_b"], force_fallback=force_fallback)

    # Conv(128->256, k4, s2, p1) + BN + LeakyReLU  (fused tap kernel)
    x = conv_bn_leaky(x, params["w3t"], params["w3m"], params["b3"],
                      params["bn3_g"], params["bn3_b"], force_fallback=force_fallback)

    # Conv(256->1, k4, s1, p0) + Sigmoid           (plain flatten matmul)
    pch = x.reshape(n, -1)                                           # (N, 4*4*256)
    y = conv_act(pch, params["w4m"], params["b4p"], act="sigmoid",
                 out_dtype=jnp.float32, tm=_TM_BN)
    return y[:, :1].reshape(n, 1)


# ------------------------------ pure-JAX reference ----------------------------
@jax.jit
def reference_forward(img, raw):
    def conv(x, w, b, stride, pad):
        y = jax.lax.conv_general_dilated(
            x, w, window_strides=(stride, stride),
            padding=[(pad, pad), (pad, pad)],
            dimension_numbers=("NCHW", "OIHW", "NCHW"))
        return y + b.reshape(1, -1, 1, 1)

    def bn(x, g, b):
        mean = jnp.mean(x, axis=(0, 2, 3), keepdims=True)
        var = jnp.mean((x - mean) ** 2, axis=(0, 2, 3), keepdims=True)
        return (x - mean) * jax.lax.rsqrt(var + BN_EPS) * g.reshape(1, -1, 1, 1) \
            + b.reshape(1, -1, 1, 1)

    lrelu = lambda v: jnp.where(v >= 0, v, LEAKY_SLOPE * v)
    x = lrelu(conv(img, raw["w1"], raw["b1"], 2, 1))
    x = lrelu(bn(conv(x, raw["w2"], raw["b2"], 2, 1), raw["bn2_g"], raw["bn2_b"]))
    x = lrelu(bn(conv(x, raw["w3"], raw["b3"], 2, 1), raw["bn3_g"], raw["bn3_b"]))
    x = jax.nn.sigmoid(conv(x, raw["w4"], raw["b4"], 1, 0))
    return x.reshape(x.shape[0], 1)


if __name__ == "__main__":
    key = jax.random.PRNGKey(0)
    k_img2, k_img64, k_par = jax.random.split(key, 3)
    raw = init_params(k_par)
    prep = prepare_params(raw)

    # Small batch (fused path) and a larger batch (exercises conv1 M-tiling).
    for batch, kimg in ((2, k_img2), (64, k_img64)):
        img = jax.random.normal(kimg, (batch, 1, 32, 32), jnp.float32)
        out = jax.block_until_ready(discriminator_forward(img, prep))
        ref = jax.block_until_ready(reference_forward(img, raw))
        assert out.shape == (batch, 1), out.shape
        assert bool(jnp.all(jnp.isfinite(out)))
        assert bool(jnp.all((out > -1e-3) & (out < 1.0 + 1e-3)))
        err = float(jnp.max(jnp.abs(out - ref)))
        assert err < 0.1, f"batch={batch}: max|kernel - ref| = {err}"

    # Exercise the tiled fallback (im2col + parallel partial-stats + affine).
    img = jax.random.normal(k_img64, (64, 1, 32, 32), jnp.float32)
    out_fb = jax.block_until_ready(
        discriminator_forward(img, prep, force_fallback=True))
    ref = jax.block_until_ready(reference_forward(img, raw))
    err = float(jnp.max(jnp.abs(out_fb - ref)))
    assert err < 0.1, f"fallback: max|kernel - ref| = {err}"

    print("KERNEL_OK")
</pallas_src>

<mosaic_0001>
module attributes {stable_mosaic.version = 11 : i64} {
  func.func @_matmul_bias_act_kernel(%arg0: i32, %arg1: memref<512x16xbf16, #tpu.memory_space<vmem>>, %arg2: memref<16x128xbf16, #tpu.memory_space<vmem>>, %arg3: memref<1x128xf32, #tpu.memory_space<vmem>>, %arg4: memref<512x128xbf16, #tpu.memory_space<vmem>>) attributes {dimension_semantics = [#tpu.dimension_semantics<parallel>], iteration_bounds = array<i64: 1>, scalar_prefetch = 0 : i64, scratch_operands = 0 : i64, tpu.core_type = #tpu.core_type<tc>, window_params = [{transform_indices = @transform_0, window_bounds = array<i64: 512, 16>}, {pipeline_mode = #tpu.pipeline_mode<synchronous>, transform_indices = @transform_1, window_bounds = array<i64: 16, 128>}, {pipeline_mode = #tpu.pipeline_mode<synchronous>, transform_indices = @transform_2, window_bounds = array<i64: 1, 128>}, {transform_indices = @transform_3, window_bounds = array<i64: 512, 128>}]} {
    %c0 = arith.constant 0 : index
    %c0_0 = arith.constant 0 : index
    %0 = vector.load %arg1[%c0, %c0_0] : memref<512x16xbf16, #tpu.memory_space<vmem>>, vector<512x16xbf16>
    %c0_1 = arith.constant 0 : index
    %c0_2 = arith.constant 0 : index
    %1 = vector.load %arg2[%c0_1, %c0_2] : memref<16x128xbf16, #tpu.memory_space<vmem>>, vector<16x128xbf16>
    %cst = arith.constant dense<0.000000e+00> : vector<512x128xf32>
    %2 = tpu.matmul %0, %1, %cst {dimension_numbers = #tpu.dot_dimension_numbers<[1], [0], [0], [1], [0, 0, 1, 1], [], []>} : vector<512x16xbf16>, vector<16x128xbf16>, vector<512x128xf32> -> vector<512x128xf32>
    %c0_3 = arith.constant 0 : index
    %c0_4 = arith.constant 0 : index
    %3 = vector.load %arg3[%c0_3, %c0_4] : memref<1x128xf32, #tpu.memory_space<vmem>>, vector<1x128xf32>
    %4 = vector.broadcast %3 : vector<1x128xf32> to vector<512x128xf32>
    %5 = arith.addf %2, %4 : vector<512x128xf32>
    %cst_5 = arith.constant 0.000000e+00 : f32
    %6 = vector.broadcast %cst_5 : f32 to vector<512x128xf32>
    %7 = arith.cmpf oge, %5, %6 : vector<512x128xf32>
    %cst_6 = arith.constant 2.000000e-01 : f32
    %8 = vector.broadcast %cst_6 : f32 to vector<512x128xf32>
    %9 = arith.mulf %8, %5 : vector<512x128xf32>
    %10 = arith.select %7, %5, %9 : vector<512x128xi1>, vector<512x128xf32>
    %11 = arith.truncf %10 : vector<512x128xf32> to vector<512x128xbf16>
    %c0_7 = arith.constant 0 : index
    %c0_8 = arith.constant 0 : index
    %12 = vector.load %arg4[%c0_7, %c0_8] : memref<512x128xbf16, #tpu.memory_space<vmem>>, vector<512x128xbf16>
    tpu.vector_store %arg4[%c0_7, %c0_8], %11 {strides = array<i32>} : memref<512x128xbf16, #tpu.memory_space<vmem>>, vector<512x128xbf16>,
    return
  }
  func.func @transform_0(%arg0: i32) -> (i32, i32) {
    %c0_i32 = arith.constant 0 : i32
    %c0_i32_0 = arith.constant 0 : i32
    return %arg0, %c0_i32 : i32, i32
  }
  func.func @transform_1(%arg0: i32) -> (i32, i32) {
    %c0_i32 = arith.constant 0 : i32
    %c0_i32_0 = arith.constant 0 : i32
    %c0_i32_1 = arith.constant 0 : i32
    return %c0_i32, %c0_i32_0 : i32, i32
  }
  func.func @transform_2(%arg0: i32) -> (i32, i32) {
    %c0_i32 = arith.constant 0 : i32
    %c0_i32_0 = arith.constant 0 : i32
    %c0_i32_1 = arith.constant 0 : i32
    return %c0_i32, %c0_i32_0 : i32, i32
  }
  func.func @transform_3(%arg0: i32) -> (i32, i32) {
    %c0_i32 = arith.constant 0 : i32
    %c0_i32_0 = arith.constant 0 : i32
    return %arg0, %c0_i32 : i32, i32
  }
}

module attributes {stable_mosaic.version = 11 : i64} {
  func.func @_conv_tap_bn_leaky_kernel(%arg0: memref<144x512xbf16, #tpu.memory_space<vmem>>, %arg1: memref<2x512x128xbf16, #tpu.memory_space<vmem>>, %arg2: memref<1x128xf32, #tpu.memory_space<vmem>>, %arg3: memref<1x128xf32, #tpu.memory_space<vmem>>, %arg4: memref<1x128xf32, #tpu.memory_space<vmem>>, %arg5: memref<128x128xbf16, #tpu.memory_space<vmem>>) attributes {dimension_semantics = [], scalar_prefetch = 0 : i64, scratch_operands = 0 : i64, tpu.core_type = #tpu.core_type<tc>} {
    %c0 = arith.constant 0 : index
    %c0_0 = arith.constant 0 : index
    %0 = vector.load %arg0[%c0, %c0_0] : memref<144x512xbf16, #tpu.memory_space<vmem>>, vector<128x512xbf16>
    %c16 = arith.constant 16 : index
    %c0_1 = arith.constant 0 : index
    %1 = vector.load %arg0[%c16, %c0_1] : memref<144x512xbf16, #tpu.memory_space<vmem>>, vector<128x512xbf16>
    %c0_2 = arith.constant 0 : index
    %c0_3 = arith.constant 0 : index
    %c0_4 = arith.constant 0 : index
    %2 = vector.load %arg1[%c0_2, %c0_3, %c0_4] : memref<2x512x128xbf16, #tpu.memory_space<vmem>>, vector<1x512x128xbf16>
    %3 = vector.shape_cast %2 : vector<1x512x128xbf16> to vector<512x128xbf16>
    %cst = arith.constant dense<0.000000e+00> : vector<128x128xf32>
    %4 = tpu.matmul %0, %3, %cst {dimension_numbers = #tpu.dot_dimension_numbers<[1], [0], [0], [1], [0, 0, 1, 1], [], []>} : vector<128x512xbf16>, vector<512x128xbf16>, vector<128x128xf32> -> vector<128x128xf32>
    %c1 = arith.constant 1 : index
    %c0_5 = arith.constant 0 : index
    %c0_6 = arith.constant 0 : index
    %5 = vector.load %arg1[%c1, %c0_5, %c0_6] : memref<2x512x128xbf16, #tpu.memory_space<vmem>>, vector<1x512x128xbf16>
    %6 = vector.shape_cast %5 : vector<1x512x128xbf16> to vector<512x128xbf16>
    %cst_7 = arith.constant dense<0.000000e+00> : vector<128x128xf32>
    %7 = tpu.matmul %1, %6, %cst_7 {dimension_numbers = #tpu.dot_dimension_numbers<[1], [0], [0], [1], [0, 0, 1, 1], [], []>} : vector<128x512xbf16>, vector<512x128xbf16>, vector<128x128xf32> -> vector<128x128xf32>
    %8 = arith.addf %4, %7 : vector<128x128xf32>
    %c0_8 = arith.constant 0 : index
    %c0_9 = arith.constant 0 : index
    %9 = vector.load %arg2[%c0_8, %c0_9] : memref<1x128xf32, #tpu.memory_space<vmem>>, vector<1x128xf32>
    %10 = vector.broadcast %9 : vector<1x128xf32> to vector<128x128xf32>
    %11 = arith.addf %8, %10 : vector<128x128xf32>
    %cst_10 = arith.constant dense<0.000000e+00> : vector<128xf32>
    %12 = vector.multi_reduction <add>, %11, %cst_10 [0] : vector<128x128xf32> to vector<128xf32>
    %13 = vector.shape_cast %12 : vector<128xf32> to vector<1x128xf32>
    %cst_11 = arith.constant 7.812500e-03 : f32
    %14 = vector.broadcast %cst_11 : f32 to vector<1x128xf32>
    %15 = arith.mulf %13, %14 : vector<1x128xf32>
    %16 = arith.mulf %11, %11 : vector<128x128xf32>
    %cst_12 = arith.constant dense<0.000000e+00> : vector<128xf32>
    %17 = vector.multi_reduction <add>, %16, %cst_12 [0] : vector<128x128xf32> to vector<128xf32>
    %18 = vector.shape_cast %17 : vector<128xf32> to vector<1x128xf32>
    %cst_13 = arith.constant 7.812500e-03 : f32
    %19 = vector.broadcast %cst_13 : f32 to vector<1x128xf32>
    %20 = arith.mulf %18, %19 : vector<1x128xf32>
    %21 = arith.mulf %15, %15 : vector<1x128xf32>
    %22 = arith.subf %20, %21 : vector<1x128xf32>
    %cst_14 = arith.constant 0.000000e+00 : f32
    %23 = vector.broadcast %cst_14 : f32 to vector<1x128xf32>
    %24 = arith.maximumf %22, %23 : vector<1x128xf32>
    %c0_15 = arith.constant 0 : index
    %c0_16 = arith.constant 0 : index
    %25 = vector.load %arg3[%c0_15, %c0_16] : memref<1x128xf32, #tpu.memory_space<vmem>>, vector<1x128xf32>
    %cst_17 = arith.constant 9.99999974E-6 : f32
    %26 = vector.broadcast %cst_17 : f32 to vector<1x128xf32>
    %27 = arith.addf %24, %26 : vector<1x128xf32>
    %28 = math.rsqrt %27 : vector<1x128xf32>
    %29 = arith.mulf %25, %28 : vector<1x128xf32>
    %c0_18 = arith.constant 0 : index
    %c0_19 = arith.constant 0 : index
    %30 = vector.load %arg4[%c0_18, %c0_19] : memref<1x128xf32, #tpu.memory_space<vmem>>, vector<1x128xf32>
    %31 = arith.mulf %15, %29 : vector<1x128xf32>
    %32 = arith.subf %30, %31 : vector<1x128xf32>
    %33 = vector.broadcast %29 : vector<1x128xf32> to vector<128x128xf32>
    %34 = arith.mulf %11, %33 : vector<128x128xf32>
    %35 = vector.broadcast %32 : vector<1x128xf32> to vector<128x128xf32>
    %36 = arith.addf %34, %35 : vector<128x128xf32>
    %cst_20 = arith.constant 0.000000e+00 : f32
    %37 = vector.broadcast %cst_20 : f32 to vector<128x128xf32>
    %38 = arith.cmpf oge, %36, %37 : vector<128x128xf32>
    %cst_21 = arith.constant 2.000000e-01 : f32
    %39 = vector.broadcast %cst_21 : f32 to vector<128x128xf32>
    %40 = arith.mulf %39, %36 : vector<128x128xf32>
    %41 = arith.select %38, %36, %40 : vector<128x128xi1>, vector<128x128xf32>
    %42 = arith.truncf %41 : vector<128x128xf32> to vector<128x128xbf16>
    %c0_22 = arith.constant 0 : index
    %c0_23 = arith.constant 0 : index
    %43 = vector.load %arg5[%c0_22, %c0_23] : memref<128x128xbf16, #tpu.memory_space<vmem>>, vector<128x128xbf16>
    tpu.vector_store %arg5[%c0_22, %c0_23], %42 {strides = array<i32>} : memref<128x128xbf16, #tpu.memory_space<vmem>>, vector<128x128xbf16>,
    return
  }
}

module attributes {stable_mosaic.version = 11 : i64} {
  func.func @_conv_tap_bn_leaky_kernel(%arg0: memref<40x1024xbf16, #tpu.memory_space<vmem>>, %arg1: memref<2x1024x256xbf16, #tpu.memory_space<vmem>>, %arg2: memref<1x256xf32, #tpu.memory_space<vmem>>, %arg3: memref<1x256xf32, #tpu.memory_space<vmem>>, %arg4: memref<1x256xf32, #tpu.memory_space<vmem>>, %arg5: memref<32x256xbf16, #tpu.memory_space<vmem>>) attributes {dimension_semantics = [], scalar_prefetch = 0 : i64, scratch_operands = 0 : i64, tpu.core_type = #tpu.core_type<tc>} {
    %c0 = arith.constant 0 : index
    %c0_0 = arith.constant 0 : index
    %0 = vector.load %arg0[%c0, %c0_0] : memref<40x1024xbf16, #tpu.memory_space<vmem>>, vector<32x1024xbf16>
    %c8 = arith.constant 8 : index
    %c0_1 = arith.constant 0 : index
    %1 = vector.load %arg0[%c8, %c0_1] : memref<40x1024xbf16, #tpu.memory_space<vmem>>, vector<32x1024xbf16>
    %c0_2 = arith.constant 0 : index
    %c0_3 = arith.constant 0 : index
    %c0_4 = arith.constant 0 : index
    %2 = vector.load %arg1[%c0_2, %c0_3, %c0_4] : memref<2x1024x256xbf16, #tpu.memory_space<vmem>>, vector<1x1024x256xbf16>
    %3 = vector.shape_cast %2 : vector<1x1024x256xbf16> to vector<1024x256xbf16>
    %cst = arith.constant dense<0.000000e+00> : vector<32x256xf32>
    %4 = tpu.matmul %0, %3, %cst {dimension_numbers = #tpu.dot_dimension_numbers<[1], [0], [0], [1], [0, 0, 1, 1], [], []>} : vector<32x1024xbf16>, vector<1024x256xbf16>, vector<32x256xf32> -> vector<32x256xf32>
    %c1 = arith.constant 1 : index
    %c0_5 = arith.constant 0 : index
    %c0_6 = arith.constant 0 : index
    %5 = vector.load %arg1[%c1, %c0_5, %c0_6] : memref<2x1024x256xbf16, #tpu.memory_space<vmem>>, vector<1x1024x256xbf16>
    %6 = vector.shape_cast %5 : vector<1x1024x256xbf16> to vector<1024x256xbf16>
    %cst_7 = arith.constant dense<0.000000e+00> : vector<32x256xf32>
    %7 = tpu.matmul %1, %6, %cst_7 {dimension_numbers = #tpu.dot_dimension_numbers<[1], [0], [0], [1], [0, 0, 1, 1], [], []>} : vector<32x1024xbf16>, vector<1024x256xbf16>, vector<32x256xf32> -> vector<32x256xf32>
    %8 = arith.addf %4, %7 : vector<32x256xf32>
    %c0_8 = arith.constant 0 : index
    %c0_9 = arith.constant 0 : index
    %9 = vector.load %arg2[%c0_8, %c0_9] : memref<1x256xf32, #tpu.memory_space<vmem>>, vector<1x256xf32>
    %10 = vector.broadcast %9 : vector<1x256xf32> to vector<32x256xf32>
    %11 = arith.addf %8, %10 : vector<32x256xf32>
    %cst_10 = arith.constant dense<0.000000e+00> : vector<256xf32>
    %12 = vector.multi_reduction <add>, %11, %cst_10 [0] : vector<32x256xf32> to vector<256xf32>
    %13 = vector.shape_cast %12 : vector<256xf32> to vector<1x256xf32>
    %cst_11 = arith.constant 3.125000e-02 : f32
    %14 = vector.broadcast %cst_11 : f32 to vector<1x256xf32>
    %15 = arith.mulf %13, %14 : vector<1x256xf32>
    %16 = arith.mulf %11, %11 : vector<32x256xf32>
    %cst_12 = arith.constant dense<0.000000e+00> : vector<256xf32>
    %17 = vector.multi_reduction <add>, %16, %cst_12 [0] : vector<32x256xf32> to vector<256xf32>
    %18 = vector.shape_cast %17 : vector<256xf32> to vector<1x256xf32>
    %cst_13 = arith.constant 3.125000e-02 : f32
    %19 = vector.broadcast %cst_13 : f32 to vector<1x256xf32>
    %20 = arith.mulf %18, %19 : vector<1x256xf32>
    %21 = arith.mulf %15, %15 : vector<1x256xf32>
    %22 = arith.subf %20, %21 : vector<1x256xf32>
    %cst_14 = arith.constant 0.000000e+00 : f32
    %23 = vector.broadcast %cst_14 : f32 to vector<1x256xf32>
    %24 = arith.maximumf %22, %23 : vector<1x256xf32>
    %c0_15 = arith.constant 0 : index
    %c0_16 = arith.constant 0 : index
    %25 = vector.load %arg3[%c0_15, %c0_16] : memref<1x256xf32, #tpu.memory_space<vmem>>, vector<1x256xf32>
    %cst_17 = arith.constant 9.99999974E-6 : f32
    %26 = vector.broadcast %cst_17 : f32 to vector<1x256xf32>
    %27 = arith.addf %24, %26 : vector<1x256xf32>
    %28 = math.rsqrt %27 : vector<1x256xf32>
    %29 = arith.mulf %25, %28 : vector<1x256xf32>
    %c0_18 = arith.constant 0 : index
    %c0_19 = arith.constant 0 : index
    %30 = vector.load %arg4[%c0_18, %c0_19] : memref<1x256xf32, #tpu.memory_space<vmem>>, vector<1x256xf32>
    %31 = arith.mulf %15, %29 : vector<1x256xf32>
    %32 = arith.subf %30, %31 : vector<1x256xf32>
    %33 = vector.broadcast %29 : vector<1x256xf32> to vector<32x256xf32>
    %34 = arith.mulf %11, %33 : vector<32x256xf32>
    %35 = vector.broadcast %32 : vector<1x256xf32> to vector<32x256xf32>
    %36 = arith.addf %34, %35 : vector<32x256xf32>
    %cst_20 = arith.constant 0.000000e+00 : f32
    %37 = vector.broadcast %cst_20 : f32 to vector<32x256xf32>
    %38 = arith.cmpf oge, %36, %37 : vector<32x256xf32>
    %cst_21 = arith.constant 2.000000e-01 : f32
    %39 = vector.broadcast %cst_21 : f32 to vector<32x256xf32>
    %40 = arith.mulf %39, %36 : vector<32x256xf32>
    %41 = arith.select %38, %36, %40 : vector<32x256xi1>, vector<32x256xf32>
    %42 = arith.truncf %41 : vector<32x256xf32> to vector<32x256xbf16>
    %c0_22 = arith.constant 0 : index
    %c0_23 = arith.constant 0 : index
    %43 = vector.load %arg5[%c0_22, %c0_23] : memref<32x256xbf16, #tpu.memory_space<vmem>>, vector<32x256xbf16>
    tpu.vector_store %arg5[%c0_22, %c0_23], %42 {strides = array<i32>} : memref<32x256xbf16, #tpu.memory_space<vmem>>, vector<32x256xbf16>,
    return
  }
}

module attributes {stable_mosaic.version = 11 : i64} {
  func.func @_matmul_bias_act_kernel(%arg0: i32, %arg1: memref<16x4096xbf16, #tpu.memory_space<vmem>>, %arg2: memref<4096x128xbf16, #tpu.memory_space<vmem>>, %arg3: memref<1x128xf32, #tpu.memory_space<vmem>>, %arg4: memref<16x128xf32, #tpu.memory_space<vmem>>) attributes {dimension_semantics = [#tpu.dimension_semantics<parallel>], iteration_bounds = array<i64: 1>, scalar_prefetch = 0 : i64, scratch_operands = 0 : i64, tpu.core_type = #tpu.core_type<tc>, window_params = [{transform_indices = @transform_0, window_bounds = array<i64: 16, 4096>}, {pipeline_mode = #tpu.pipeline_mode<synchronous>, transform_indices = @transform_1, window_bounds = array<i64: 4096, 128>}, {pipeline_mode = #tpu.pipeline_mode<synchronous>, transform_indices = @transform_2, window_bounds = array<i64: 1, 128>}, {transform_indices = @transform_3, window_bounds = array<i64: 16, 128>}]} {
    %c0 = arith.constant 0 : index
    %c0_0 = arith.constant 0 : index
    %0 = vector.load %arg1[%c0, %c0_0] : memref<16x4096xbf16, #tpu.memory_space<vmem>>, vector<16x4096xbf16>
    %c0_1 = arith.constant 0 : index
    %c0_2 = arith.constant 0 : index
    %1 = vector.load %arg2[%c0_1, %c0_2] : memref<4096x128xbf16, #tpu.memory_space<vmem>>, vector<4096x128xbf16>
    %cst = arith.constant dense<0.000000e+00> : vector<16x128xf32>
    %2 = tpu.matmul %0, %1, %cst {dimension_numbers = #tpu.dot_dimension_numbers<[1], [0], [0], [1], [0, 0, 1, 1], [], []>} : vector<16x4096xbf16>, vector<4096x128xbf16>, vector<16x128xf32> -> vector<16x128xf32>
    %c0_3 = arith.constant 0 : index
    %c0_4 = arith.constant 0 : index
    %3 = vector.load %arg3[%c0_3, %c0_4] : memref<1x128xf32, #tpu.memory_space<vmem>>, vector<1x128xf32>
    %4 = vector.broadcast %3 : vector<1x128xf32> to vector<16x128xf32>
    %5 = arith.addf %2, %4 : vector<16x128xf32>
    %cst_5 = arith.constant 0.000000e+00 : f32
    %6 = vector.broadcast %cst_5 : f32 to vector<16x128xf32>
    %7 = arith.subf %6, %5 : vector<16x128xf32>
    %8 = math.exp %7 : vector<16x128xf32>
    %cst_6 = arith.constant 1.000000e+00 : f32
    %9 = vector.broadcast %cst_6 : f32 to vector<16x128xf32>
    %10 = arith.addf %9, %8 : vector<16x128xf32>
    %11 = tpu.reciprocal %10 {approx = true} : vector<16x128xf32> -> vector<16x128xf32>
    %c0_7 = arith.constant 0 : index
    %c0_8 = arith.constant 0 : index
    %12 = vector.load %arg4[%c0_7, %c0_8] : memref<16x128xf32, #tpu.memory_space<vmem>>, vector<16x128xf32>
    tpu.vector_store %arg4[%c0_7, %c0_8], %11 {strides = array<i32>} : memref<16x128xf32, #tpu.memory_space<vmem>>, vector<16x128xf32>,
    return
  }
  func.func @transform_0(%arg0: i32) -> (i32, i32) {
    %c0_i32 = arith.constant 0 : i32
    %c0_i32_0 = arith.constant 0 : i32
    return %arg0, %c0_i32 : i32, i32
  }
  func.func @transform_1(%arg0: i32) -> (i32, i32) {
    %c0_i32 = arith.constant 0 : i32
    %c0_i32_0 = arith.constant 0 : i32
    %c0_i32_1 = arith.constant 0 : i32
    return %c0_i32, %c0_i32_0 : i32, i32
  }
  func.func @transform_2(%arg0: i32) -> (i32, i32) {
    %c0_i32 = arith.constant 0 : i32
    %c0_i32_0 = arith.constant 0 : i32
    %c0_i32_1 = arith.constant 0 : i32
    return %c0_i32, %c0_i32_0 : i32, i32
  }
  func.func @transform_3(%arg0: i32) -> (i32, i32) {
    %c0_i32 = arith.constant 0 : i32
    %c0_i32_0 = arith.constant 0 : i32
    return %arg0, %c0_i32 : i32, i32
  }
}

</mosaic_0001>

<bundles_post_ra>
// kernel: discriminator_forward.4
= control target key start
LH: loop header
LB: loop body
LE: loop exit
PB: predicated region body
PF: predicated region fallthrough
CT: control target
= control target key end

     0   :  { %8 = vsyncpa [#allocation3], 0  ;;  %s1713_s12 = smov [#allocation2]   ;;  %s2048_s0 = inlined_call_operand.vmem [shape: bf16[512,16], index: 0, kind: input, shape index: {}]   ;;  %s2049_s1 = inlined_call_operand.vmem [shape: bf16[16,128], index: 1, kind: input, shape index: {}]   ;;  %s2050_s2 = inlined_call_operand.hbm [shape: f32[1,128], index: 2, kind: input, shape index: {}]   ;;  %s2051_s3 = inlined_call_operand.vmem [shape: bf16[512,128], index: 3, kind: output, shape index: {}]  }
   0x1   :  { %s19_s13 = sshll.u32 %s1713_s12, 4  ;;  %s1689_s16 = scalar_lea.hbm %s2050_s2, 16  ;;  %s20_s13 = int_to_ptr.vmem [resolvable:$true] %s19_s13 }
   0x2   :  { %p1690_p0 = scmp.ne.s32.totalorder %s2050_s2, %s1689_s16  ;;  %p1693_p1 = scmp.lt.u32.totalorder %s1689_s16, %s2050_s2 }
   0x4   :  { %p1695_p2 = pnand %p1693_p1, %p1690_p0 }
   0x6   :  { %1698 = shalt.err (!%p1695_p2)
}
   0x7   :  { %s1699_s21 = scalar_lea.vmem %s20_s13, 16  ;;  %s1703_s22 = scalar_lea.vmem %s20_s13, 32 }
   0x8   :  { %p1700_p3 = scmp.ne.s32.totalorder %s20_s13, %s1699_s21  ;;  %p1704_p4 = scmp.lt.s32.totalorder %s20_s13, %s20_s13 }
   0x9   :  { %p1705_p5 = scmp.lt.s32.totalorder %s1703_s22, %s1699_s21 }
   0xb   :  { %p1706_p6 = por %p1705_p5, %p1704_p4 }
   0xd   :  { %p1707_p7 = pnand %p1706_p6, %p1700_p3 }
   0xf   :  { %1710 = shalt.err (!%p1707_p7)
}
  0x10   :  { %22 = dma.hbm_to_vmem [thread:$0]  %s2050_s2, 16, %s20_s13, [#allocation3]  }
  0x11   :  { %1711 = dma.done.wait [#allocation3], 16  }
  0x12   :  { %1712 = vsyncadd [#allocation3], 4294967280  ;;  %v1656_v0 = vld [vmem:[%s2049_s1] sm:$0xff]   ;;  %vm266_vm0 = vcmask 130048   ;;  %v1659_v3 = vld [vmem:[%s2048_s0 + $0x8] sm:$0xff]  }
  0x13   :  { %v1657_v1 = vld [vmem:[%s2048_s0] sm:$0xff]   ;;  %1587 = vmatprep.subr.bf16.mxu0 %v1656_v0  ;;  %1653 = vmatprep.subr.bf16.mxu1 %v1656_v0  ;;  %v1660_v4 = vld [vmem:[%s2048_s0 + $0x88] sm:$0xff]   ;;  %v1661_v5 = vld [vmem:[%s2048_s0 + $0x10] sm:$0xff]  }
  0x14   :  { %v1658_v2 = vld [vmem:[%s2048_s0 + $0x80] sm:$0xff]   ;;  %1588 = vmatpush3.bf16.msra.mxu0 %v1656_v0  ;;  %1654 = vmatpush3.bf16.msra.mxu1 %v1656_v0  ;;  %v1662_v6 = vld [vmem:[%s2048_s0 + $0x90] sm:$0xff]   ;;  %v1663_v7 = vld [vmem:[%s2048_s0 + $0x18] sm:$0xff]  }
  0x15   :  { %1589 = vmatprep.mubr.msk.bf16.mxu0 %vm266_vm0, %v1657_v1  ;;  %1621 = vmatprep.mubr.msk.bf16.mxu1 %vm266_vm0, %v1658_v2  ;;  %v1664_v8 = vld [vmem:[%s2048_s0 + $0x98] sm:$0xff]   ;;  %v1665_v9 = vld [vmem:[%s2048_s0 + $0x20] sm:$0xff]   ;;  %v1667_v11 = vld [vmem:[%s2048_s0 + $0x28] sm:$0xff]  }
  0x16   :  { %v1666_v10 = vld [vmem:[%s2048_s0 + $0xa0] sm:$0xff]   ;;  %v1668_v12 = vld [vmem:[%s2048_s0 + $0xa8] sm:$0xff]   ;;  %v1669_v13 = vld [vmem:[%s2048_s0 + $0x30] sm:$0xff]  }
  0x17   :  { %1590 = vmatmul.mubr.msk.bf16.vlgmr.msra.gmra.mrb[0].mxu0 %vm266_vm0, %v1659_v3  ;;  %1622 = vmatmul.mubr.msk.bf16.vlgmr.msra.gmra.mrb[0].mxu1 %vm266_vm0, %v1660_v4  ;;  %v1670_v14 = vld [vmem:[%s2048_s0 + $0xb0] sm:$0xff]   ;;  %v1671_v15 = vld [vmem:[%s2048_s0 + $0x38] sm:$0xff]   ;;  %v1673_v17 = vld [vmem:[%s2048_s0 + $0x40] sm:$0xff]  }
  0x18   :  { %1593 = vmatprep.mubr.msk.bf16.mxu0 %vm266_vm0, %v1661_v5  ;;  %1625 = vmatprep.mubr.msk.bf16.mxu1 %vm266_vm0, %v1662_v6  ;;  %v1672_v16 = vld [vmem:[%s2048_s0 + $0xb8] sm:$0xff]   ;;  %v1674_v18 = vld [vmem:[%s2048_s0 + $0xc0] sm:$0xff]   ;;  %v1675_v19 = vld [vmem:[%s2048_s0 + $0x48] sm:$0xff]  }
  0x19   :  { %v1676_v20 = vld [vmem:[%s2048_s0 + $0xc8] sm:$0xff]   ;;  %v1677_v21 = vld [vmem:[%s2048_s0 + $0x50] sm:$0xff]   ;;  %v1679_v23 = vld [vmem:[%s2048_s0 + $0x58] sm:$0xff]  }
  0x1a   :  { %v1678_v22 = vld [vmem:[%s2048_s0 + $0xd0] sm:$0xff]   ;;  %v1680_v24 = vld [vmem:[%s2048_s0 + $0xd8] sm:$0xff]   ;;  %v1681_v25 = vld [vmem:[%s2048_s0 + $0x60] sm:$0xff]  }
  0x1b   :  { %v1682_v26 = vld [vmem:[%s2048_s0 + $0xe0] sm:$0xff]   ;;  %v1683_v27 = vld [vmem:[%s2048_s0 + $0x68] sm:$0xff]   ;;  %v1685_v29 = vld [vmem:[%s2048_s0 + $0x70] sm:$0xff]  }
  0x1c   :  { %v1684_v28 = vld [vmem:[%s2048_s0 + $0xe8] sm:$0xff]   ;;  %v1686_v30 = vld [vmem:[%s2048_s0 + $0xf0] sm:$0xff]   ;;  %v1687_v31 = vld [vmem:[%s2048_s0 + $0x78] sm:$0xff]  }
  0x1d   :  { %v1688_v32 = vld [vmem:[%s2048_s0 + $0xf8] sm:$0xff]   ;;  %v1877_v33 = vld [vmem:[#allocation2] ss:$0 sm:$0xff] }
  0x1f   :  { %1594 = vmatmul.mubr.msk.bf16.gmra.mrb[4].mxu0 %vm266_vm0, %v1663_v7  ;;  %1626 = vmatmul.mubr.msk.bf16.gmra.mrb[4].mxu1 %vm266_vm0, %v1664_v8 }
  0x20   :  { %1597 = vmatprep.mubr.msk.bf16.mxu0 %vm266_vm0, %v1665_v9  ;;  %1629 = vmatprep.mubr.msk.bf16.mxu1 %vm266_vm0, %v1666_v10 }
  0x27   :  { %1598 = vmatmul.mubr.msk.bf16.gmra.mrb[8].mxu0 %vm266_vm0, %v1667_v11  ;;  %1630 = vmatmul.mubr.msk.bf16.gmra.mrb[8].mxu1 %vm266_vm0, %v1668_v12 }
  0x28   :  { %1601 = vmatprep.mubr.msk.bf16.mxu0 %vm266_vm0, %v1669_v13  ;;  %1633 = vmatprep.mubr.msk.bf16.mxu1 %vm266_vm0, %v1670_v14 }
  0x2f   :  { %1602 = vmatmul.mubr.msk.bf16.gmra.mrb[12].mxu0 %vm266_vm0, %v1671_v15  ;;  %1634 = vmatmul.mubr.msk.bf16.gmra.mrb[12].mxu1 %vm266_vm0, %v1672_v16 }
  0x30   :  { %1605 = vmatprep.mubr.msk.bf16.mxu0 %vm266_vm0, %v1673_v17  ;;  %1637 = vmatprep.mubr.msk.bf16.mxu1 %vm266_vm0, %v1674_v18 }
  0x37   :  { %1606 = vmatmul.mubr.msk.bf16.gmra.mrb[16].mxu0 %vm266_vm0, %v1675_v19  ;;  %1638 = vmatmul.mubr.msk.bf16.gmra.mrb[16].mxu1 %vm266_vm0, %v1676_v20 }
  0x38   :  { %1609 = vmatprep.mubr.msk.bf16.mxu0 %vm266_vm0, %v1677_v21  ;;  %1641 = vmatprep.mubr.msk.bf16.mxu1 %vm266_vm0, %v1678_v22 }
  0x3f   :  { %1610 = vmatmul.mubr.msk.bf16.gmra.mrb[20].mxu0 %vm266_vm0, %v1679_v23  ;;  %1642 = vmatmul.mubr.msk.bf16.gmra.mrb[20].mxu1 %vm266_vm0, %v1680_v24 }
  0x40   :  { %1613 = vmatprep.mubr.msk.bf16.mxu0 %vm266_vm0, %v1681_v25  ;;  %1645 = vmatprep.mubr.msk.bf16.mxu1 %vm266_vm0, %v1682_v26 }
  0x47   :  { %1614 = vmatmul.mubr.msk.bf16.gmra.mrb[24].mxu0 %vm266_vm0, %v1683_v27  ;;  %1646 = vmatmul.mubr.msk.bf16.gmra.mrb[24].mxu1 %vm266_vm0, %v1684_v28 }
  0x48   :  { %1617 = vmatprep.mubr.msk.bf16.mxu0 %vm266_vm0, %v1685_v29  ;;  %1649 = vmatprep.mubr.msk.bf16.mxu1 %vm266_vm0, %v1686_v30 }
  0x4f   :  { %1618 = vmatmul.mubr.msk.bf16.gmra.mrb[28].mxu0 %vm266_vm0, %v1687_v31  ;;  %1650 = vmatmul.mubr.msk.bf16.gmra.mrb[28].mxu1 %vm266_vm0, %v1688_v32 }
  0xea   :  { %v1591_v34 = vpop.f32.mrb[0].mxu0  ;;  %v1623_v35 = vpop.f32.mrb[0].mxu1 }
  0xeb   :  { %v406_v36 = vadd.f32 %v1591_v34, %v1877_v33  ;;  %v534_v37 = vadd.f32 %v1623_v35, %v1877_v33  ;;  %v397_v38 = vpop.f32.mrb[1].mxu0  ;;  %v525_v39 = vpop.f32.mrb[1].mxu1 }
  0xec   :  { %v398_v40 = vadd.f32 %v1877_v33, %v397_v38  ;;  %v526_v41 = vadd.f32 %v1877_v33, %v525_v39  ;;  %v1592_v42 = vpop.f32.mrb[2].mxu0  ;;  %v1624_v43 = vpop.f32.mrb[2].mxu1 }
  0xed   :  { %vm654_vm1 = vcmp.ge.f32.partialorder %v406_v36, 0.0  ;;  %v718_v44 = vmul.f32 0.2, %v406_v36  ;;  %vm686_vm2 = vcmp.ge.f32.partialorder %v534_v37, 0.0  ;;  %v750_v45 = vmul.f32 0.2, %v534_v37 }
  0xee   :  { %vm652_vm3 = vcmp.ge.f32.partialorder %v398_v40, 0.0  ;;  %v716_v46 = vmul.f32 0.2, %v398_v40  ;;  %vm684_vm4 = vcmp.ge.f32.partialorder %v526_v41, 0.0  ;;  %v748_v47 = vmul.f32 0.2, %v526_v41 }
  0xef   :  { %v409_v48 = vadd.f32 %v1592_v42, %v1877_v33  ;;  %v537_v49 = vadd.f32 %v1624_v43, %v1877_v33  ;;  %v400_v50 = vpop.f32.mrb[3].mxu0  ;;  %v528_v51 = vpop.f32.mrb[3].mxu1  ;;  %v782_v52 = vsel %vm654_vm1, %v406_v36, %v718_v44  ;;  %v814_v53 = vsel %vm686_vm2, %v534_v37, %v750_v45 }
  0xf0   :  { %v401_v54 = vadd.f32 %v1877_v33, %v400_v50  ;;  %v529_v55 = vadd.f32 %v1877_v33, %v528_v51  ;;  %v780_v60 = vsel %vm652_vm3, %v398_v40, %v716_v46  ;;  %v812_v61 = vsel %vm684_vm4, %v526_v41, %v748_v47 }
  0xf1   :  { %vm655_vm5 = vcmp.ge.f32.partialorder %v409_v48, 0.0  ;;  %v719_v56 = vmul.f32 0.2, %v409_v48  ;;  %vm687_vm6 = vcmp.ge.f32.partialorder %v537_v49, 0.0  ;;  %v751_v57 = vmul.f32 0.2, %v537_v49 }
  0xf2   :  { %vm653_vm7 = vcmp.ge.f32.partialorder %v401_v54, 0.0  ;;  %v717_v58 = vmul.f32 0.2, %v401_v54  ;;  %vm685_vm8 = vcmp.ge.f32.partialorder %v529_v55, 0.0  ;;  %v749_v59 = vmul.f32 0.2, %v529_v55 }
  0xf3   :  { %v783_v62 = vsel %vm655_vm5, %v409_v48, %v719_v56  ;;  %v815_v63 = vsel %vm687_vm6, %v537_v49, %v751_v57  ;;  %v1595_v0 = vpop.f32.mrb[4].mxu0  ;;  %v1627_v1 = vpop.f32.mrb[4].mxu1 }
  0xf4   :  { %v1371_v2 = vpack.c.bf16 %v783_v62, %v782_v52  ;;  %v1451_v3 = vpack.c.bf16 %v815_v63, %v814_v53  ;;  %v781_v4 = vsel %vm653_vm7, %v401_v54, %v717_v58  ;;  %v813_v5 = vsel %vm685_vm8, %v529_v55, %v749_v59  ;;  %v413_v6 = vpop.f32.mrb[5].mxu0  ;;  %v541_v7 = vpop.f32.mrb[5].mxu1 }
  0xf5   :  { %v1366_v8 = vpack.c.bf16 %v781_v4, %v780_v60  ;;  %v1446_v9 = vpack.c.bf16 %v813_v5, %v812_v61  ;;  %v422_v10 = vadd.f32 %v1595_v0, %v1877_v33  ;;  %v550_v11 = vadd.f32 %v1627_v1, %v1877_v33  ;;  %v1596_v12 = vpop.f32.mrb[6].mxu0  ;;  %v1628_v13 = vpop.f32.mrb[6].mxu1 }
  0xf6   :  { %1523 = vst [vmem:[%s2051_s3 + $0x8] sm:$0xff] %v1371_v2   ;;  %1539 = vst [vmem:[%s2051_s3 + $0x88] sm:$0xff] %v1451_v3   ;;  %v414_v14 = vadd.f32 %v1877_v33, %v413_v6  ;;  %v542_v15 = vadd.f32 %v1877_v33, %v541_v7  ;;  %v425_v16 = vadd.f32 %v1596_v12, %v1877_v33  ;;  %v416_v18 = vpop.f32.mrb[7].mxu0  ;;  %v544_v19 = vpop.f32.mrb[7].mxu1 }
  0xf7   :  { %v553_v17 = vadd.f32 %v1628_v13, %v1877_v33  ;;  %1367 = vst [vmem:[%s2051_s3] sm:$0xff] %v1366_v8   ;;  %1538 = vst [vmem:[%s2051_s3 + $0x80] sm:$0xff] %v1446_v9   ;;  %vm658_vm9 = vcmp.ge.f32.partialorder %v422_v10, 0.0  ;;  %v722_v20 = vmul.f32 0.2, %v422_v10  ;;  %vm690_vm10 = vcmp.ge.f32.partialorder %v550_v11, 0.0 }
  0xf8   :  { %v754_v21 = vmul.f32 0.2, %v550_v11  ;;  %vm656_vm11 = vcmp.ge.f32.partialorder %v414_v14, 0.0  ;;  %v720_v22 = vmul.f32 0.2, %v414_v14  ;;  %vm688_vm12 = vcmp.ge.f32.partialorder %v542_v15, 0.0 }
  0xf9   :  { %v752_v23 = vmul.f32 0.2, %v542_v15  ;;  %v786_v24 = vsel %vm658_vm9, %v422_v10, %v722_v20  ;;  %vm659_vm13 = vcmp.ge.f32.partialorder %v425_v16, 0.0  ;;  %v723_v26 = vmul.f32 0.2, %v425_v16 }
  0xfa   :  { %v818_v25 = vsel %vm690_vm10, %v550_v11, %v754_v21  ;;  %v784_v27 = vsel %vm656_vm11, %v414_v14, %v720_v22  ;;  %vm691_vm14 = vcmp.ge.f32.partialorder %v553_v17, 0.0  ;;  %v755_v29 = vmul.f32 0.2, %v553_v17  ;;  %v1599_v30 = vpop.f32.mrb[8].mxu0  ;;  %v1631_v31 = vpop.f32.mrb[8].mxu1 }
  0xfb   :  { %v816_v28 = vsel %vm688_vm12, %v542_v15, %v752_v23  ;;  %v787_v32 = vsel %vm659_vm13, %v425_v16, %v723_v26  ;;  %v417_v34 = vadd.f32 %v1877_v33, %v416_v18  ;;  %v545_v35 = vadd.f32 %v1877_v33, %v544_v19  ;;  %v429_v37 = vpop.f32.mrb[9].mxu0  ;;  %v557_v38 = vpop.f32.mrb[9].mxu1 }
  0xfc   :  { %v438_v36 = vadd.f32 %v1599_v30, %v1877_v33  ;;  %v1381_v39 = vpack.c.bf16 %v787_v32, %v786_v24  ;;  %v819_v40 = vsel %vm691_vm14, %v553_v17, %v755_v29  ;;  %v566_v41 = vadd.f32 %v1631_v31, %v1877_v33  ;;  %v1600_v43 = vpop.f32.mrb[10].mxu0  ;;  %v1632_v44 = vpop.f32.mrb[10].mxu1 }
  0xfd   :  { %v430_v42 = vadd.f32 %v1877_v33, %v429_v37  ;;  %v1461_v45 = vpack.c.bf16 %v819_v40, %v818_v25  ;;  %vm657_vm15 = vcmp.ge.f32.partialorder %v417_v34, 0.0  ;;  %v721_v46 = vmul.f32 0.2, %v417_v34  ;;  %v432_v47 = vpop.f32.mrb[11].mxu0  ;;  %v560_v48 = vpop.f32.mrb[11].mxu1 }
  0xfe   :  { %vm689_vm0 = vcmp.ge.f32.partialorder %v545_v35, 0.0  ;;  %1525 = vst [vmem:[%s2051_s3 + $0x18] sm:$0xff] %v1381_v39   ;;  %v753_v49 = vmul.f32 0.2, %v545_v35  ;;  %vm662_vm1 = vcmp.ge.f32.partialorder %v438_v36, 0.0  ;;  %vm694_vm2 = vcmp.ge.f32.partialorder %v566_v41, 0.0 }
  0xff   :  { %v726_v50 = vmul.f32 0.2, %v438_v36  ;;  %1541 = vst [vmem:[%s2051_s3 + $0x98] sm:$0xff] %v1461_v45   ;;  %v785_v51 = vsel %vm657_vm15, %v417_v34, %v721_v46  ;;  %v758_v52 = vmul.f32 0.2, %v566_v41  ;;  %vm660_vm3 = vcmp.ge.f32.partialorder %v430_v42, 0.0 }
 0x100   :  { %v724_v53 = vmul.f32 0.2, %v430_v42  ;;  %v1376_v54 = vpack.c.bf16 %v785_v51, %v784_v27  ;;  %v817_v55 = vsel %vm689_vm0, %v545_v35, %v753_v49  ;;  %v558_v57 = vadd.f32 %v1877_v33, %v557_v38 }
 0x101   :  { %v790_v56 = vsel %vm662_vm1, %v438_v36, %v726_v50  ;;  %v1456_v58 = vpack.c.bf16 %v817_v55, %v816_v28  ;;  %v822_v59 = vsel %vm694_vm2, %v566_v41, %v758_v52  ;;  %v441_v61 = vadd.f32 %v1600_v43, %v1877_v33 }
 0x102   :  { %v788_v60 = vsel %vm660_vm3, %v430_v42, %v724_v53  ;;  %1524 = vst [vmem:[%s2051_s3 + $0x10] sm:$0xff] %v1376_v54   ;;  %vm692_vm4 = vcmp.ge.f32.partialorder %v558_v57, 0.0  ;;  %v756_v62 = vmul.f32 0.2, %v558_v57  ;;  %v569_v63 = vadd.f32 %v1632_v44, %v1877_v33  ;;  %v1603_v1 = vpop.f32.mrb[12].mxu0  ;;  %v1635_v2 = vpop.f32.mrb[12].mxu1 }
 0x103   :  { %v433_v0 = vadd.f32 %v1877_v33, %v432_v47  ;;  %1540 = vst [vmem:[%s2051_s3 + $0x90] sm:$0xff] %v1456_v58   ;;  %vm663_vm5 = vcmp.ge.f32.partialorder %v441_v61, 0.0  ;;  %v727_v3 = vmul.f32 0.2, %v441_v61  ;;  %v561_v4 = vadd.f32 %v1877_v33, %v560_v48  ;;  %v445_v6 = vpop.f32.mrb[13].mxu0  ;;  %v573_v7 = vpop.f32.mrb[13].mxu1 }
 0x104   :  { %v454_v5 = vadd.f32 %v1603_v1, %v1877_v33  ;;  %v820_v8 = vsel %vm692_vm4, %v558_v57, %v756_v62  ;;  %vm695_vm6 = vcmp.ge.f32.partialorder %v569_v63, 0.0  ;;  %v759_v9 = vmul.f32 0.2, %v569_v63  ;;  %v1604_v10 = vpop.f32.mrb[14].mxu0  ;;  %v1636_v11 = vpop.f32.mrb[14].mxu1 }
 0x105   :  { %vm661_vm7 = vcmp.ge.f32.partialorder %v433_v0, 0.0  ;;  %v791_v12 = vsel %vm663_vm5, %v441_v61, %v727_v3  ;;  %v725_v13 = vmul.f32 0.2, %v433_v0  ;;  %vm693_vm8 = vcmp.ge.f32.partialorder %v561_v4, 0.0  ;;  %v448_v15 = vpop.f32.mrb[15].mxu0  ;;  %v576_v19 = vpop.f32.mrb[15].mxu1 }
 0x106   :  { %v757_v14 = vmul.f32 0.2, %v561_v4  ;;  %v1391_v16 = vpack.c.bf16 %v791_v12, %v790_v56  ;;  %v823_v17 = vsel %vm695_vm6, %v569_v63, %v759_v9  ;;  %vm666_vm9 = vcmp.ge.f32.partialorder %v454_v5, 0.0 }
 0x107   :  { %v730_v18 = vmul.f32 0.2, %v454_v5  ;;  %v1471_v20 = vpack.c.bf16 %v823_v17, %v822_v59  ;;  %v789_v21 = vsel %vm661_vm7, %v433_v0, %v725_v13  ;;  %v582_v23 = vadd.f32 %v1635_v2, %v1877_v33 }
 0x108   :  { %v821_v22 = vsel %vm693_vm8, %v561_v4, %v757_v14  ;;  %1527 = vst [vmem:[%s2051_s3 + $0x28] sm:$0xff] %v1391_v16   ;;  %v1386_v24 = vpack.c.bf16 %v789_v21, %v788_v60  ;;  %v446_v27 = vadd.f32 %v1877_v33, %v445_v6  ;;  %v574_v29 = vadd.f32 %v1877_v33, %v573_v7 }
 0x109   :  { %v1466_v25 = vpack.c.bf16 %v821_v22, %v820_v8  ;;  %v794_v26 = vsel %vm666_vm9, %v454_v5, %v730_v18  ;;  %1543 = vst [vmem:[%s2051_s3 + $0xa8] sm:$0xff] %v1471_v20   ;;  %vm698_vm10 = vcmp.ge.f32.partialorder %v582_v23, 0.0  ;;  %v762_v28 = vmul.f32 0.2, %v582_v23 }
 0x10a   :  { %v457_v30 = vadd.f32 %v1604_v10, %v1877_v33  ;;  %1526 = vst [vmem:[%s2051_s3 + $0x20] sm:$0xff] %v1386_v24   ;;  %vm664_vm11 = vcmp.ge.f32.partialorder %v446_v27, 0.0  ;;  %v728_v31 = vmul.f32 0.2, %v446_v27  ;;  %v585_v32 = vadd.f32 %v1636_v11, %v1877_v33  ;;  %v1607_v35 = vpop.f32.mrb[16].mxu0  ;;  %v1639_v36 = vpop.f32.mrb[16].mxu1 }
 0x10b   :  { %1542 = vst [vmem:[%s2051_s3 + $0xa0] sm:$0xff] %v1466_v25   ;;  %v449_v34 = vadd.f32 %v1877_v33, %v448_v15  ;;  %v826_v37 = vsel %vm698_vm10, %v582_v23, %v762_v28  ;;  %vm696_vm12 = vcmp.ge.f32.partialorder %v574_v29, 0.0  ;;  %v760_v38 = vmul.f32 0.2, %v574_v29  ;;  %v461_v39 = vpop.f32.mrb[17].mxu0  ;;  %v589_v40 = vpop.f32.mrb[17].mxu1 }
 0x10c   :  { %vm667_vm13 = vcmp.ge.f32.partialorder %v457_v30, 0.0  ;;  %v792_v41 = vsel %vm664_vm11, %v446_v27, %v728_v31  ;;  %v731_v42 = vmul.f32 0.2, %v457_v30  ;;  %vm699_vm14 = vcmp.ge.f32.partialorder %v585_v32, 0.0  ;;  %v1608_v44 = vpop.f32.mrb[18].mxu0  ;;  %v1640_v48 = vpop.f32.mrb[18].mxu1 }
 0x10d   :  { %v763_v43 = vmul.f32 0.2, %v585_v32  ;;  %v824_v45 = vsel %vm696_vm12, %v574_v29, %v760_v38  ;;  %vm665_vm15 = vcmp.ge.f32.partialorder %v449_v34, 0.0  ;;  %v729_v46 = vmul.f32 0.2, %v449_v34  ;;  %v464_v49 = vpop.f32.mrb[19].mxu0 }
 0x10e   :  { %v577_v47 = vadd.f32 %v1877_v33, %v576_v19  ;;  %v795_v50 = vsel %vm667_vm13, %v457_v30, %v731_v42  ;;  %v470_v52 = vadd.f32 %v1607_v35, %v1877_v33  ;;  %v598_v53 = vadd.f32 %v1639_v36, %v1877_v33  ;;  %v592_v54 = vpop.f32.mrb[19].mxu1 }
 0x10f   :  { %v827_v51 = vsel %vm699_vm14, %v585_v32, %v763_v43  ;;  %v1401_v55 = vpack.c.bf16 %v795_v50, %v794_v26  ;;  %v793_v57 = vsel %vm665_vm15, %v449_v34, %v729_v46  ;;  %v462_v62 = vadd.f32 %v1877_v33, %v461_v39 }
 0x110   :  { %v1481_v56 = vpack.c.bf16 %v827_v51, %v826_v37  ;;  %vm697_vm0 = vcmp.ge.f32.partialorder %v577_v47, 0.0  ;;  %v1396_v58 = vpack.c.bf16 %v793_v57, %v792_v41  ;;  %v761_v59 = vmul.f32 0.2, %v577_v47 }
 0x111   :  { %vm670_vm1 = vcmp.ge.f32.partialorder %v470_v52, 0.0  ;;  %v734_v60 = vmul.f32 0.2, %v470_v52  ;;  %1529 = vst [vmem:[%s2051_s3 + $0x38] sm:$0xff] %v1401_v55   ;;  %vm702_vm2 = vcmp.ge.f32.partialorder %v598_v53, 0.0  ;;  %v590_v63 = vadd.f32 %v1877_v33, %v589_v40 }
 0x112   :  { %1545 = vst [vmem:[%s2051_s3 + $0xb8] sm:$0xff] %v1481_v56   ;;  %v766_v61 = vmul.f32 0.2, %v598_v53  ;;  %1528 = vst [vmem:[%s2051_s3 + $0x30] sm:$0xff] %v1396_v58   ;;  %v825_v0 = vsel %vm697_vm0, %v577_v47, %v761_v59  ;;  %v473_v2 = vadd.f32 %v1608_v44, %v1877_v33  ;;  %v601_v3 = vadd.f32 %v1640_v48, %v1877_v33  ;;  %v1611_v4 = vpop.f32.mrb[20].mxu0  ;;  %v1643_v5 = vpop.f32.mrb[20].mxu1 }
 0x113   :  { %v798_v1 = vsel %vm670_vm1, %v470_v52, %v734_v60  ;;  %v1476_v6 = vpack.c.bf16 %v825_v0, %v824_v45  ;;  %vm668_vm3 = vcmp.ge.f32.partialorder %v462_v62, 0.0  ;;  %v732_v8 = vmul.f32 0.2, %v462_v62  ;;  %v477_v9 = vpop.f32.mrb[21].mxu0  ;;  %v605_v10 = vpop.f32.mrb[21].mxu1 }
 0x114   :  { %v830_v7 = vsel %vm702_vm2, %v598_v53, %v766_v61  ;;  %vm700_vm4 = vcmp.ge.f32.partialorder %v590_v63, 0.0  ;;  %v764_v11 = vmul.f32 0.2, %v590_v63  ;;  %vm671_vm5 = vcmp.ge.f32.partialorder %v473_v2, 0.0  ;;  %v1612_v16 = vpop.f32.mrb[22].mxu0  ;;  %v1644_v17 = vpop.f32.mrb[22].mxu1 }
 0x115   :  { %v735_v12 = vmul.f32 0.2, %v473_v2  ;;  %1544 = vst [vmem:[%s2051_s3 + $0xb0] sm:$0xff] %v1476_v6   ;;  %v796_v13 = vsel %vm668_vm3, %v462_v62, %v732_v8  ;;  %vm703_vm6 = vcmp.ge.f32.partialorder %v601_v3, 0.0  ;;  %v767_v14 = vmul.f32 0.2, %v601_v3 }
 0x116   :  { %v465_v15 = vadd.f32 %v1877_v33, %v464_v49  ;;  %v828_v18 = vsel %vm700_vm4, %v590_v63, %v764_v11  ;;  %v593_v20 = vadd.f32 %v1877_v33, %v592_v54  ;;  %v486_v21 = vadd.f32 %v1611_v4, %v1877_v33  ;;  %v480_v22 = vpop.f32.mrb[23].mxu0  ;;  %v608_v23 = vpop.f32.mrb[23].mxu1 }
 0x117   :  { %v799_v19 = vsel %vm671_vm5, %v473_v2, %v735_v12  ;;  %v831_v25 = vsel %vm703_vm6, %v601_v3, %v767_v14  ;;  %v614_v31 = vadd.f32 %v1643_v5, %v1877_v33  ;;  %v478_v32 = vadd.f32 %v1877_v33, %v477_v9 }
 0x118   :  { %v1411_v24 = vpack.c.bf16 %v799_v19, %v798_v1  ;;  %vm669_vm7 = vcmp.ge.f32.partialorder %v465_v15, 0.0  ;;  %v733_v26 = vmul.f32 0.2, %v465_v15  ;;  %v1491_v27 = vpack.c.bf16 %v831_v25, %v830_v7 }
 0x119   :  { %vm701_vm8 = vcmp.ge.f32.partialorder %v593_v20, 0.0  ;;  %v765_v28 = vmul.f32 0.2, %v593_v20  ;;  %vm674_vm9 = vcmp.ge.f32.partialorder %v486_v21, 0.0  ;;  %v738_v30 = vmul.f32 0.2, %v486_v21 }
 0x11a   :  { %1531 = vst [vmem:[%s2051_s3 + $0x48] sm:$0xff] %v1411_v24   ;;  %v797_v29 = vsel %vm669_vm7, %v465_v15, %v733_v26  ;;  %1547 = vst [vmem:[%s2051_s3 + $0xc8] sm:$0xff] %v1491_v27   ;;  %v606_v36 = vadd.f32 %v1877_v33, %v605_v10  ;;  %v489_v37 = vadd.f32 %v1612_v16, %v1877_v33  ;;  %v1615_v38 = vpop.f32.mrb[24].mxu0  ;;  %v1647_v39 = vpop.f32.mrb[24].mxu1  ;;  %vm706_vm10 = vcmp.ge.f32.partialorder %v614_v31, 0.0 }
 0x11b   :  { %v1406_v34 = vpack.c.bf16 %v797_v29, %v796_v13  ;;  %v829_v35 = vsel %vm701_vm8, %v593_v20, %v765_v28  ;;  %v770_v41 = vmul.f32 0.2, %v614_v31  ;;  %v493_v42 = vpop.f32.mrb[25].mxu0  ;;  %v621_v43 = vpop.f32.mrb[25].mxu1  ;;  %v802_v44 = vsel %vm674_vm9, %v486_v21, %v738_v30 }
 0x11c   :  { %v1486_v40 = vpack.c.bf16 %v829_v35, %v828_v18  ;;  %vm672_vm11 = vcmp.ge.f32.partialorder %v478_v32, 0.0  ;;  %v736_v45 = vmul.f32 0.2, %v478_v32  ;;  %v768_v46 = vmul.f32 0.2, %v606_v36  ;;  %v1616_v49 = vpop.f32.mrb[26].mxu0 }
 0x11d   :  { %1530 = vst [vmem:[%s2051_s3 + $0x40] sm:$0xff] %v1406_v34   ;;  %vm704_vm12 = vcmp.ge.f32.partialorder %v606_v36, 0.0  ;;  %vm675_vm13 = vcmp.ge.f32.partialorder %v489_v37, 0.0  ;;  %v739_v47 = vmul.f32 0.2, %v489_v37  ;;  %v617_v48 = vadd.f32 %v1644_v17, %v1877_v33  ;;  %v1648_v50 = vpop.f32.mrb[26].mxu1 }
 0x11e   :  { %1546 = vst [vmem:[%s2051_s3 + $0xc0] sm:$0xff] %v1486_v40   ;;  %v834_v51 = vsel %vm706_vm10, %v614_v31, %v770_v41  ;;  %v800_v52 = vsel %vm672_vm11, %v478_v32, %v736_v45  ;;  %v481_v53 = vadd.f32 %v1877_v33, %v480_v22  ;;  %v609_v54 = vadd.f32 %v1877_v33, %v608_v23  ;;  %v496_v55 = vpop.f32.mrb[27].mxu0  ;;  %v624_v56 = vpop.f32.mrb[27].mxu1 }
 0x11f   :  { %v803_v57 = vsel %vm675_vm13, %v489_v37, %v739_v47  ;;  %vm707_vm14 = vcmp.ge.f32.partialorder %v617_v48, 0.0  ;;  %v771_v58 = vmul.f32 0.2, %v617_v48  ;;  %v502_v59 = vadd.f32 %v1615_v38, %v1877_v33 }
 0x120   :  { %v1421_v60 = vpack.c.bf16 %v803_v57, %v802_v44  ;;  %vm673_vm15 = vcmp.ge.f32.partialorder %v481_v53, 0.0  ;;  %v737_v61 = vmul.f32 0.2, %v481_v53  ;;  %vm705_vm0 = vcmp.ge.f32.partialorder %v609_v54, 0.0 }
 0x121   :  { %v835_v62 = vsel %vm707_vm14, %v617_v48, %v771_v58  ;;  %v769_v63 = vmul.f32 0.2, %v609_v54  ;;  %vm678_vm1 = vcmp.ge.f32.partialorder %v502_v59, 0.0  ;;  %v742_v0 = vmul.f32 0.2, %v502_v59 }
 0x122   :  { %1533 = vst [vmem:[%s2051_s3 + $0x58] sm:$0xff] %v1421_v60   ;;  %v1501_v1 = vpack.c.bf16 %v835_v62, %v834_v51  ;;  %v801_v2 = vsel %vm673_vm15, %v481_v53, %v737_v61  ;;  %v630_v3 = vadd.f32 %v1647_v39, %v1877_v33  ;;  %v494_v4 = vadd.f32 %v1877_v33, %v493_v42  ;;  %v1619_v5 = vpop.f32.mrb[28].mxu0  ;;  %v1651_v6 = vpop.f32.mrb[28].mxu1 }
 0x123   :  { %v832_v7 = vsel %vm704_vm12, %v606_v36, %v768_v46  ;;  %v1416_v8 = vpack.c.bf16 %v801_v2, %v800_v52  ;;  %v833_v9 = vsel %vm705_vm0, %v609_v54, %v769_v63  ;;  %v622_v10 = vadd.f32 %v1877_v33, %v621_v43  ;;  %v509_v11 = vpop.f32.mrb[29].mxu0  ;;  %v637_v12 = vpop.f32.mrb[29].mxu1 }
 0x124   :  { %1549 = vst [vmem:[%s2051_s3 + $0xd8] sm:$0xff] %v1501_v1   ;;  %v1496_v13 = vpack.c.bf16 %v833_v9, %v832_v7  ;;  %vm710_vm2 = vcmp.ge.f32.partialorder %v630_v3, 0.0  ;;  %v774_v14 = vmul.f32 0.2, %v630_v3  ;;  %vm676_vm3 = vcmp.ge.f32.partialorder %v494_v4, 0.0  ;;  %v1620_v15 = vpop.f32.mrb[30].mxu0 }
 0x125   :  { %v1652_v16 = vpop.f32.mrb[30].mxu1  ;;  %1532 = vst [vmem:[%s2051_s3 + $0x50] sm:$0xff] %v1416_v8   ;;  %v806_v17 = vsel %vm678_vm1, %v502_v59, %v742_v0  ;;  %v740_v18 = vmul.f32 0.2, %v494_v4  ;;  %vm708_vm4 = vcmp.ge.f32.partialorder %v622_v10, 0.0  ;;  %v505_v19 = vadd.f32 %v1616_v49, %v1877_v33  ;;  %v512_v20 = vpop.f32.mrb[31].mxu0 }
 0x126   :  { %1548 = vst [vmem:[%s2051_s3 + $0xd0] sm:$0xff] %v1496_v13   ;;  %v772_v21 = vmul.f32 0.2, %v622_v10  ;;  %v633_v22 = vadd.f32 %v1648_v50, %v1877_v33  ;;  %v497_v23 = vadd.f32 %v1877_v33, %v496_v55  ;;  %v625_v24 = vadd.f32 %v1877_v33, %v624_v56  ;;  %v640_v25 = vpop.f32.mrb[31].mxu1 }
 0x127   :  { %v838_v26 = vsel %vm710_vm2, %v630_v3, %v774_v14  ;;  %v804_v27 = vsel %vm676_vm3, %v494_v4, %v740_v18  ;;  %vm679_vm5 = vcmp.ge.f32.partialorder %v505_v19, 0.0  ;;  %v743_v28 = vmul.f32 0.2, %v505_v19 }
 0x128   :  { %vm711_vm6 = vcmp.ge.f32.partialorder %v633_v22, 0.0  ;;  %v775_v29 = vmul.f32 0.2, %v633_v22  ;;  %vm677_vm7 = vcmp.ge.f32.partialorder %v497_v23, 0.0  ;;  %v741_v30 = vmul.f32 0.2, %v497_v23 }
 0x129   :  { %v807_v31 = vsel %vm679_vm5, %v505_v19, %v743_v28  ;;  %vm709_vm8 = vcmp.ge.f32.partialorder %v625_v24, 0.0  ;;  %v773_v32 = vmul.f32 0.2, %v625_v24  ;;  %v518_v34 = vadd.f32 %v1619_v5, %v1877_v33 }
 0x12a   :  { %v1431_v35 = vpack.c.bf16 %v807_v31, %v806_v17  ;;  %v839_v36 = vsel %vm711_vm6, %v633_v22, %v775_v29  ;;  %v805_v37 = vsel %vm677_vm7, %v497_v23, %v741_v30  ;;  %v646_v38 = vadd.f32 %v1651_v6, %v1877_v33 }
 0x12b   :  { %v836_v39 = vsel %vm708_vm4, %v622_v10, %v772_v21  ;;  %v1511_v40 = vpack.c.bf16 %v839_v36, %v838_v26  ;;  %v1426_v41 = vpack.c.bf16 %v805_v37, %v804_v27  ;;  %v837_v42 = vsel %vm709_vm8, %v625_v24, %v773_v32 }
 0x12c   :  { %1535 = vst [vmem:[%s2051_s3 + $0x68] sm:$0xff] %v1431_v35   ;;  %v1506_v43 = vpack.c.bf16 %v837_v42, %v836_v39  ;;  %vm682_vm9 = vcmp.ge.f32.partialorder %v518_v34, 0.0  ;;  %v746_v44 = vmul.f32 0.2, %v518_v34  ;;  %v778_v45 = vmul.f32 0.2, %v646_v38 }
 0x12d   :  { %1551 = vst [vmem:[%s2051_s3 + $0xe8] sm:$0xff] %v1511_v40   ;;  %1534 = vst [vmem:[%s2051_s3 + $0x60] sm:$0xff] %v1426_v41   ;;  %v510_v46 = vadd.f32 %v1877_v33, %v509_v11  ;;  %v638_v47 = vadd.f32 %v1877_v33, %v637_v12  ;;  %v521_v48 = vadd.f32 %v1620_v15, %v1877_v33  ;;  %vm714_vm10 = vcmp.ge.f32.partialorder %v646_v38, 0.0 }
 0x12e   :  { %v649_v49 = vadd.f32 %v1652_v16, %v1877_v33  ;;  %1550 = vst [vmem:[%s2051_s3 + $0xe0] sm:$0xff] %v1506_v43   ;;  %v513_v50 = vadd.f32 %v1877_v33, %v512_v20  ;;  %v641_v51 = vadd.f32 %v1877_v33, %v640_v25  ;;  %v810_v52 = vsel %vm682_vm9, %v518_v34, %v746_v44 }
 0x12f   :  { %vm680_vm11 = vcmp.ge.f32.partialorder %v510_v46, 0.0  ;;  %v744_v53 = vmul.f32 0.2, %v510_v46  ;;  %v776_v54 = vmul.f32 0.2, %v638_v47  ;;  %vm683_vm12 = vcmp.ge.f32.partialorder %v521_v48, 0.0 }
 0x130   :  { %v747_v55 = vmul.f32 0.2, %v521_v48  ;;  %vm715_vm13 = vcmp.ge.f32.partialorder %v649_v49, 0.0  ;;  %v779_v56 = vmul.f32 0.2, %v649_v49  ;;  %v842_v57 = vsel %vm714_vm10, %v646_v38, %v778_v45 }
 0x131   :  { %vm712_vm14 = vcmp.ge.f32.partialorder %v638_v47, 0.0  ;;  %vm681_vm15 = vcmp.ge.f32.partialorder %v513_v50, 0.0  ;;  %v745_v58 = vmul.f32 0.2, %v513_v50  ;;  %vm713_vm0 = vcmp.ge.f32.partialorder %v641_v51, 0.0 }
 0x132   :  { %v811_v59 = vsel %vm683_vm12, %v521_v48, %v747_v55  ;;  %v843_v60 = vsel %vm715_vm13, %v649_v49, %v779_v56  ;;  %v777_v61 = vmul.f32 0.2, %v641_v51  ;;  %v808_v62 = vsel %vm680_vm11, %v510_v46, %v744_v53 }
 0x133   :  { %v1441_v63 = vpack.c.bf16 %v811_v59, %v810_v52  ;;  %v1521_v0 = vpack.c.bf16 %v843_v60, %v842_v57  ;;  %v809_v33 = vsel %vm681_vm15, %v513_v50, %v745_v58  ;;  %v840_v1 = vsel %vm712_vm14, %v638_v47, %v776_v54 }
 0x134   :  { %v1436_v2 = vpack.c.bf16 %v809_v33, %v808_v62  ;;  %v841_v3 = vsel %vm713_vm0, %v641_v51, %v777_v61 }
 0x135   :  { %1537 = vst [vmem:[%s2051_s3 + $0x78] sm:$0xff] %v1441_v63   ;;  %1553 = vst [vmem:[%s2051_s3 + $0xf8] sm:$0xff] %v1521_v0   ;;  %v1516_v4 = vpack.c.bf16 %v841_v3, %v840_v1 }
 0x136   :  { %1536 = vst [vmem:[%s2051_s3 + $0x70] sm:$0xff] %v1436_v2  }
 0x137   :  { %1552 = vst [vmem:[%s2051_s3 + $0xf0] sm:$0xff] %v1516_v4  }
 0x138   :  { %1168 = vsyncpa [#allocation3], 1 }

// kernel: discriminator_forward.5
= control target key start
LH: loop header
LB: loop body
LE: loop exit
PB: predicated region body
PF: predicated region fallthrough
CT: control target
= control target key end

     0   :  { %s2856_s1 = inlined_call_operand.vmem [shape: bf16[2,512,128], index: 1, kind: input, shape index: {}]   ;;  %s2857_s0 = inlined_call_operand.vmem [shape: bf16[144,512], index: 0, kind: input, shape index: {}]   ;;  %s2858_s2 = inlined_call_operand.vmem [shape: f32[1,128], index: 2, kind: input, shape index: {}]   ;;  %s2859_s3 = inlined_call_operand.vmem [shape: f32[1,128], index: 3, kind: input, shape index: {}]   ;;  %s2860_s4 = inlined_call_operand.vmem [shape: f32[1,128], index: 4, kind: input, shape index: {}]   ;;  %s2861_s5 = inlined_call_operand.vmem [shape: bf16[128,128], index: 5, kind: output, shape index: {}]  }
   0x1   :  { %v2103_v0 = vld [vmem:[%s2856_s1 + $0x140] sm:$0xff]   ;;  %v2107_v4 = vld [vmem:[%s2856_s1 + $0x148] sm:$0xff]   ;;  %v2111_v8 = vld [vmem:[%s2856_s1 + $0x150] sm:$0xff]  }
   0x2   :  { %v2104_v1 = vld [vmem:[%s2856_s1 + $0x1c0] sm:$0xff]   ;;  %1847 = vmatprep.subr.bf16.mxu0 %v2103_v0  ;;  %v2108_v5 = vld [vmem:[%s2856_s1 + $0x1c8] sm:$0xff]   ;;  %v2112_v9 = vld [vmem:[%s2856_s1 + $0x1d0] sm:$0xff]  }
   0x3   :  { %v2105_v2 = vld [vmem:[%s2856_s1 + $0x100] sm:$0xff]   ;;  %1911 = vmatprep.subr.bf16.mxu1 %v2104_v1  ;;  %v2109_v6 = vld [vmem:[%s2856_s1 + $0x108] sm:$0xff]   ;;  %v2113_v10 = vld [vmem:[%s2856_s1 + $0x110] sm:$0xff]  }
   0x4   :  { %v2106_v3 = vld [vmem:[%s2856_s1 + $0x180] sm:$0xff]   ;;  %1848 = vmatpush3.bf16.msra.mxu0 %v2105_v2  ;;  %v2110_v7 = vld [vmem:[%s2856_s1 + $0x188] sm:$0xff]   ;;  %v2114_v11 = vld [vmem:[%s2856_s1 + $0x190] sm:$0xff]  }
   0x5   :  { %1912 = vmatpush3.bf16.msra.mxu1 %v2106_v3  ;;  %1849 = vmatprep.subr.bf16.mxu0 %v2107_v4  ;;  %v2115_v12 = vld [vmem:[%s2856_s1 + $0x158] sm:$0xff]   ;;  %v2119_v16 = vld [vmem:[%s2856_s1 + $0x160] sm:$0xff]   ;;  %v2123_v20 = vld [vmem:[%s2856_s1 + $0x168] sm:$0xff]  }
   0x6   :  { %1913 = vmatprep.subr.bf16.mxu1 %v2108_v5  ;;  %v2116_v13 = vld [vmem:[%s2856_s1 + $0x1d8] sm:$0xff]   ;;  %v2120_v17 = vld [vmem:[%s2856_s1 + $0x1e0] sm:$0xff]   ;;  %v2124_v21 = vld [vmem:[%s2856_s1 + $0x1e8] sm:$0xff]  }
   0x7   :  { %v2117_v14 = vld [vmem:[%s2856_s1 + $0x118] sm:$0xff]   ;;  %v2121_v18 = vld [vmem:[%s2856_s1 + $0x120] sm:$0xff]   ;;  %v2125_v22 = vld [vmem:[%s2856_s1 + $0x128] sm:$0xff]  }
   0x8   :  { %1850 = vmatpush3.bf16.msra.mxu0 %v2109_v6  ;;  %v2118_v15 = vld [vmem:[%s2856_s1 + $0x198] sm:$0xff]   ;;  %v2122_v19 = vld [vmem:[%s2856_s1 + $0x1a0] sm:$0xff]   ;;  %v2126_v23 = vld [vmem:[%s2856_s1 + $0x1a8] sm:$0xff]  }
   0x9   :  { %1914 = vmatpush3.bf16.msra.mxu1 %v2110_v7  ;;  %1851 = vmatprep.subr.bf16.mxu0 %v2111_v8  ;;  %v2127_v24 = vld [vmem:[%s2856_s1 + $0x170] sm:$0xff]   ;;  %v2131_v28 = vld [vmem:[%s2856_s1 + $0x178] sm:$0xff]   ;;  %v2141_v36 = vld [vmem:[%s2856_s1 + $0x40] sm:$0xff]  }
   0xa   :  { %1915 = vmatprep.subr.bf16.mxu1 %v2112_v9  ;;  %v2128_v25 = vld [vmem:[%s2856_s1 + $0x1f0] sm:$0xff]   ;;  %v2132_v29 = vld [vmem:[%s2856_s1 + $0x1f8] sm:$0xff]   ;;  %v2142_v37 = vld [vmem:[%s2856_s1] sm:$0xff]  }
   0xb   :  { %v2129_v26 = vld [vmem:[%s2856_s1 + $0x130] sm:$0xff]   ;;  %v2133_v30 = vld [vmem:[%s2856_s1 + $0x138] sm:$0xff]   ;;  %v2143_v38 = vld [vmem:[%s2856_s1 + $0xc0] sm:$0xff]  }
   0xc   :  { %1852 = vmatpush3.bf16.msra.mxu0 %v2113_v10  ;;  %v2130_v27 = vld [vmem:[%s2856_s1 + $0x1b0] sm:$0xff]   ;;  %v2134_v31 = vld [vmem:[%s2856_s1 + $0x1b8] sm:$0xff]   ;;  %v2144_v39 = vld [vmem:[%s2856_s1 + $0x80] sm:$0xff]  }
   0xd   :  { %1916 = vmatpush3.bf16.msra.mxu1 %v2114_v11  ;;  %1853 = vmatprep.subr.bf16.mxu0 %v2115_v12  ;;  %v2352_v32 = vld [vmem:[%s2857_s0 + $0x20] ss:$16 sps:$4 sm:$0xff]   ;;  %v2357_v33 = vld [vmem:[%s2857_s0 + $0x24] ss:$16 sps:$4 sm:$0xff]   ;;  %v2362_v34 = vld [vmem:[%s2857_s0 + $0x28] ss:$16 sps:$4 sm:$0xff]  }
   0xe   :  { %1917 = vmatprep.subr.bf16.mxu1 %v2116_v13  ;;  %v2367_v35 = vld [vmem:[%s2857_s0 + $0x2c] ss:$16 sps:$4 sm:$0xff]   ;;  %598 = vmatprep.mubr.bf16.mxu0 %v2357_v33  ;;  %v2388_v40 = vld [vmem:[%s2857_s0 + $0x44] ss:$16 sps:$4 sm:$0xff]   ;;  %v2398_v42 = vld [vmem:[%s2857_s0 + $0x40] ss:$16 sps:$4 sm:$0xff]  }
   0xf   :  { %695 = vmatprep.mubr.bf16.mxu1 %v2367_v35  ;;  %v2393_v41 = vld [vmem:[%s2857_s0 + $0x4c] ss:$16 sps:$4 sm:$0xff]   ;;  %v2404_v43 = vld [vmem:[%s2857_s0 + $0x48] ss:$16 sps:$4 sm:$0xff]   ;;  %v2424_v48 = vld [vmem:[%s2857_s0 + $0x64] ss:$16 sps:$4 sm:$0xff]  }
  0x10   :  { %1854 = vmatpush3.bf16.msra.mxu0 %v2117_v14  ;;  %v2151_v44 = vld [vmem:[%s2856_s1 + $0x48] sm:$0xff]   ;;  %v2434_v50 = vld [vmem:[%s2857_s0 + $0x60] ss:$16 sps:$4 sm:$0xff]   ;;  %v2459_v56 = vld [vmem:[%s2857_s0 + $0x84] ss:$16 sps:$4 sm:$0xff]  }
  0x11   :  { %1918 = vmatpush3.bf16.msra.mxu1 %v2118_v15  ;;  %1855 = vmatprep.subr.bf16.mxu0 %v2119_v16  ;;  %v2152_v45 = vld [vmem:[%s2856_s1 + $0x8] sm:$0xff]   ;;  %v2161_v52 = vld [vmem:[%s2856_s1 + $0x50] sm:$0xff]   ;;  %v2171_v60 = vld [vmem:[%s2856_s1 + $0x58] sm:$0xff]  }
  0x12   :  { %1919 = vmatprep.subr.bf16.mxu1 %v2120_v17  ;;  %v2153_v46 = vld [vmem:[%s2856_s1 + $0xc8] sm:$0xff]   ;;  %v2162_v53 = vld [vmem:[%s2856_s1 + $0x10] sm:$0xff]   ;;  %v2172_v61 = vld [vmem:[%s2856_s1 + $0x18] sm:$0xff]  }
  0x13   :  { %v2154_v47 = vld [vmem:[%s2856_s1 + $0x88] sm:$0xff]   ;;  %v2163_v54 = vld [vmem:[%s2856_s1 + $0xd0] sm:$0xff]   ;;  %v2173_v62 = vld [vmem:[%s2856_s1 + $0xd8] sm:$0xff]  }
  0x14   :  { %1856 = vmatpush3.bf16.msra.mxu0 %v2121_v18  ;;  %v2429_v49 = vld [vmem:[%s2857_s0 + $0x6c] ss:$16 sps:$4 sm:$0xff]   ;;  %v2439_v51 = vld [vmem:[%s2857_s0 + $0x68] ss:$16 sps:$4 sm:$0xff]   ;;  %v2164_v55 = vld [vmem:[%s2856_s1 + $0x90] sm:$0xff]  }
  0x15   :  { %1920 = vmatpush3.bf16.msra.mxu1 %v2122_v19  ;;  %1857 = vmatprep.subr.bf16.mxu0 %v2123_v20  ;;  %v2465_v57 = vld [vmem:[%s2857_s0 + $0x8c] ss:$16 sps:$4 sm:$0xff]   ;;  %v2471_v58 = vld [vmem:[%s2857_s0 + $0x80] ss:$16 sps:$4 sm:$0xff]   ;;  %v2477_v59 = vld [vmem:[%s2857_s0 + $0x88] ss:$16 sps:$4 sm:$0xff]  }
  0x16   :  { %1921 = vmatprep.subr.bf16.mxu1 %v2124_v21  ;;  %v2174_v63 = vld [vmem:[%s2856_s1 + $0x98] sm:$0xff]   ;;  %v2494_v0 = vld [vmem:[%s2857_s0 + $0xa4] ss:$16 sps:$4 sm:$0xff]   ;;  %v2508_v2 = vld [vmem:[%s2857_s0 + $0xa0] ss:$16 sps:$4 sm:$0xff]  }
  0x17   :  { %v2500_v1 = vld [vmem:[%s2857_s0 + $0xac] ss:$16 sps:$4 sm:$0xff]   ;;  %v2181_v3 = vld [vmem:[%s2856_s1 + $0x60] sm:$0xff]   ;;  %v2516_v4 = vld [vmem:[%s2857_s0 + $0xa8] ss:$16 sps:$4 sm:$0xff]  }
  0x18   :  { %1858 = vmatpush3.bf16.msra.mxu0 %v2125_v22  ;;  %v2182_v5 = vld [vmem:[%s2856_s1 + $0x20] sm:$0xff]   ;;  %v2535_v9 = vld [vmem:[%s2857_s0 + $0xcc] ss:$16 sps:$4 sm:$0xff]   ;;  %v2561_v15 = vld [vmem:[%s2857_s0 + $0xc8] ss:$16 sps:$4 sm:$0xff]  }
  0x19   :  { %1922 = vmatpush3.bf16.msra.mxu1 %v2126_v23  ;;  %1859 = vmatprep.subr.bf16.mxu0 %v2127_v24  ;;  %v2183_v6 = vld [vmem:[%s2856_s1 + $0xe0] sm:$0xff]   ;;  %v2191_v10 = vld [vmem:[%s2856_s1 + $0x68] sm:$0xff]   ;;  %v2201_v18 = vld [vmem:[%s2856_s1 + $0x70] sm:$0xff]  }
  0x1a   :  { %1923 = vmatprep.subr.bf16.mxu1 %v2128_v25  ;;  %v2184_v7 = vld [vmem:[%s2856_s1 + $0xa0] sm:$0xff]   ;;  %v2192_v11 = vld [vmem:[%s2856_s1 + $0x28] sm:$0xff]   ;;  %v2202_v19 = vld [vmem:[%s2856_s1 + $0x30] sm:$0xff]  }
  0x1b   :  { %v2530_v8 = vld [vmem:[%s2857_s0 + $0xc4] ss:$16 sps:$4 sm:$0xff]   ;;  %v2550_v12 = vld [vmem:[%s2857_s0 + $0xc0] ss:$16 sps:$4 sm:$0xff]   ;;  %v2193_v13 = vld [vmem:[%s2856_s1 + $0xe8] sm:$0xff]  }
  0x1c   :  { %1860 = vmatpush3.bf16.msra.mxu0 %v2129_v26  ;;  %v2194_v14 = vld [vmem:[%s2856_s1 + $0xa8] sm:$0xff]   ;;  %v2566_v16 = vld [vmem:[%s2857_s0 + $0xe4] ss:$16 sps:$4 sm:$0xff]   ;;  %v2199_v22 = vld [vmem:[%s2857_s0 + $0xe0] ss:$16 sps:$4 sm:$0xff]  }
  0x1d   :  { %1924 = vmatpush3.bf16.msra.mxu1 %v2130_v27  ;;  %1861 = vmatprep.subr.bf16.mxu0 %v2131_v28  ;;  %v2571_v17 = vld [vmem:[%s2857_s0 + $0xec] ss:$16 sps:$4 sm:$0xff]   ;;  %v2203_v20 = vld [vmem:[%s2856_s1 + $0xf0] sm:$0xff]   ;;  %v2200_v23 = vld [vmem:[%s2857_s0 + $0xe8] ss:$16 sps:$4 sm:$0xff]  }
  0x1e   :  { %1925 = vmatprep.subr.bf16.mxu1 %v2132_v29  ;;  %v2204_v21 = vld [vmem:[%s2856_s1 + $0xb0] sm:$0xff]   ;;  %v2207_v25 = vld [vmem:[%s2857_s0 + $0x10c] ss:$16 sps:$4 sm:$0xff]  }
  0x1f   :  { %v2205_v24 = vld [vmem:[%s2857_s0 + $0x104] ss:$16 sps:$4 sm:$0xff]   ;;  %v2211_v26 = vld [vmem:[%s2856_s1 + $0x78] sm:$0xff]  }
  0x20   :  { %1862 = vmatpush3.bf16.msra.mxu0 %v2133_v30  ;;  %v2212_v27 = vld [vmem:[%s2856_s1 + $0x38] sm:$0xff]   ;;  %v2209_v30 = vld [vmem:[%s2857_s0 + $0x100] ss:$16 sps:$4 sm:$0xff]  }
  0x21   :  { %1926 = vmatpush3.bf16.msra.mxu1 %v2134_v31  ;;  %1975 = vmatprep.subr.bf16.mxu0 %v2141_v36  ;;  %v2213_v28 = vld [vmem:[%s2856_s1 + $0xf8] sm:$0xff]   ;;  %v2217_v36 = vld [vmem:[%s2857_s0 + $0x4] ss:$16 sps:$4 sm:$0xff]  }
  0x22   :  { %2039 = vmatprep.subr.bf16.mxu1 %v2143_v38  ;;  %v2214_v29 = vld [vmem:[%s2856_s1 + $0xb8] sm:$0xff]   ;;  %v2215_v38 = vld [vmem:[%s2857_s0] ss:$16 sps:$4 sm:$0xff]  }
  0x23   :  { %599 = vmatmul.mubr.bf16.vlgmr.msra.gmra.mrb[0].mxu0 %v2352_v32  ;;  %v2210_v31 = vld [vmem:[%s2857_s0 + $0x108] ss:$16 sps:$4 sm:$0xff]  }
  0x24   :  { %696 = vmatmul.mubr.bf16.vlgmr.msra.gmra.mrb[0].mxu1 %v2362_v34  ;;  %1976 = vmatpush3.bf16.msra.mxu0 %v2142_v37  ;;  %v2220_v37 = vld [vmem:[%s2857_s0 + $0xc] ss:$16 sps:$4 sm:$0xff]  }
  0x25   :  { %2040 = vmatpush3.bf16.msra.mxu1 %v2144_v39  ;;  %606 = vmatprep.mubr.bf16.mxu0 %v2388_v40  ;;  %v2218_v39 = vld [vmem:[%s2857_s0 + $0x8] ss:$16 sps:$4 sm:$0xff]  }
  0x26   :  { %703 = vmatprep.mubr.bf16.mxu1 %v2393_v41  ;;  %1977 = vmatprep.subr.bf16.mxu0 %v2151_v44 }
  0x27   :  { %2041 = vmatprep.subr.bf16.mxu1 %v2153_v46 }
  0x28   :  { %1978 = vmatpush3.bf16.msra.mxu0 %v2152_v45 }
  0x29   :  { %2042 = vmatpush3.bf16.msra.mxu1 %v2154_v47  ;;  %1979 = vmatprep.subr.bf16.mxu0 %v2161_v52 }
  0x2a   :  { %2043 = vmatprep.subr.bf16.mxu1 %v2163_v54 }
  0x2b   :  { %607 = vmatmul.mubr.bf16.gmra.mrb[4].mxu0 %v2398_v42 }
  0x2c   :  { %704 = vmatmul.mubr.bf16.gmra.mrb[4].mxu1 %v2404_v43  ;;  %614 = vmatprep.mubr.bf16.mxu0 %v2424_v48 }
  0x2d   :  { %711 = vmatprep.mubr.bf16.mxu1 %v2429_v49  ;;  %1980 = vmatpush3.bf16.msra.mxu0 %v2162_v53 }
  0x2e   :  { %2044 = vmatpush3.bf16.msra.mxu1 %v2164_v55  ;;  %1981 = vmatprep.subr.bf16.mxu0 %v2171_v60 }
  0x2f   :  { %2045 = vmatprep.subr.bf16.mxu1 %v2173_v62 }
  0x31   :  { %1982 = vmatpush3.bf16.msra.mxu0 %v2172_v61 }
  0x32   :  { %2046 = vmatpush3.bf16.msra.mxu1 %v2174_v63  ;;  %1983 = vmatprep.subr.bf16.mxu0 %v2181_v3 }
  0x33   :  { %615 = vmatmul.mubr.bf16.gmra.mrb[8].mxu0 %v2434_v50  ;;  %2047 = vmatprep.subr.bf16.mxu1 %v2183_v6 }
  0x34   :  { %712 = vmatmul.mubr.bf16.gmra.mrb[8].mxu1 %v2439_v51  ;;  %622 = vmatprep.mubr.bf16.mxu0 %v2459_v56 }
  0x35   :  { %719 = vmatprep.mubr.bf16.mxu1 %v2465_v57  ;;  %1984 = vmatpush3.bf16.msra.mxu0 %v2182_v5 }
  0x36   :  { %2048 = vmatpush3.bf16.msra.mxu1 %v2184_v7  ;;  %1985 = vmatprep.subr.bf16.mxu0 %v2191_v10 }
  0x37   :  { %2049 = vmatprep.subr.bf16.mxu1 %v2193_v13 }
  0x39   :  { %1986 = vmatpush3.bf16.msra.mxu0 %v2192_v11 }
  0x3a   :  { %2050 = vmatpush3.bf16.msra.mxu1 %v2194_v14  ;;  %1987 = vmatprep.subr.bf16.mxu0 %v2201_v18 }
  0x3b   :  { %623 = vmatmul.mubr.bf16.gmra.mrb[12].mxu0 %v2471_v58  ;;  %2051 = vmatprep.subr.bf16.mxu1 %v2203_v20 }
  0x3c   :  { %720 = vmatmul.mubr.bf16.gmra.mrb[12].mxu1 %v2477_v59  ;;  %630 = vmatprep.mubr.bf16.mxu0 %v2494_v0 }
  0x3d   :  { %727 = vmatprep.mubr.bf16.mxu1 %v2500_v1  ;;  %1988 = vmatpush3.bf16.msra.mxu0 %v2202_v19 }
  0x3e   :  { %2052 = vmatpush3.bf16.msra.mxu1 %v2204_v21  ;;  %1989 = vmatprep.subr.bf16.mxu0 %v2211_v26 }
  0x3f   :  { %2053 = vmatprep.subr.bf16.mxu1 %v2213_v28 }
  0x41   :  { %1990 = vmatpush3.bf16.msra.mxu0 %v2212_v27 }
  0x42   :  { %2054 = vmatpush3.bf16.msra.mxu1 %v2214_v29 }
  0x43   :  { %631 = vmatmul.mubr.bf16.gmra.mrb[16].mxu0 %v2508_v2 }
  0x44   :  { %728 = vmatmul.mubr.bf16.gmra.mrb[16].mxu1 %v2516_v4  ;;  %638 = vmatprep.mubr.bf16.mxu0 %v2530_v8 }
  0x45   :  { %735 = vmatprep.mubr.bf16.mxu1 %v2535_v9 }
  0x4b   :  { %639 = vmatmul.mubr.bf16.gmra.mrb[20].mxu0 %v2550_v12 }
  0x4c   :  { %736 = vmatmul.mubr.bf16.gmra.mrb[20].mxu1 %v2561_v15  ;;  %646 = vmatprep.mubr.bf16.mxu0 %v2566_v16 }
  0x4d   :  { %743 = vmatprep.mubr.bf16.mxu1 %v2571_v17 }
  0x53   :  { %647 = vmatmul.mubr.bf16.gmra.mrb[24].mxu0 %v2199_v22 }
  0x54   :  { %744 = vmatmul.mubr.bf16.gmra.mrb[24].mxu1 %v2200_v23  ;;  %654 = vmatprep.mubr.bf16.mxu0 %v2205_v24 }
  0x55   :  { %751 = vmatprep.mubr.bf16.mxu1 %v2207_v25 }
  0x5b   :  { %655 = vmatmul.mubr.bf16.gmra.mrb[28].mxu0 %v2209_v30 }
  0x5c   :  { %752 = vmatmul.mubr.bf16.gmra.mrb[28].mxu1 %v2210_v31  ;;  %1144 = vmatprep.mubr.bf16.mxu0 %v2217_v36 }
  0x5d   :  { %1241 = vmatprep.mubr.bf16.mxu1 %v2220_v37 }
  0x63   :  { %1145 = vmatmul.mubr.bf16.vlgmr.msra.gmra.mrb[32].mxu0 %v2215_v38 }
  0x64   :  { %1242 = vmatmul.mubr.bf16.vlgmr.msra.gmra.mrb[32].mxu1 %v2218_v39  ;;  %1152 = vmatprep.mubr.bf16.mxu0 %v2357_v33 }
  0x65   :  { %1249 = vmatprep.mubr.bf16.mxu1 %v2367_v35 }
  0x6b   :  { %1153 = vmatmul.mubr.bf16.gmra.mrb[36].mxu0 %v2352_v32 }
  0x6c   :  { %1250 = vmatmul.mubr.bf16.gmra.mrb[36].mxu1 %v2362_v34  ;;  %1160 = vmatprep.mubr.bf16.mxu0 %v2388_v40 }
  0x6d   :  { %1257 = vmatprep.mubr.bf16.mxu1 %v2393_v41 }
  0x73   :  { %1161 = vmatmul.mubr.bf16.gmra.mrb[40].mxu0 %v2398_v42 }
  0x74   :  { %1258 = vmatmul.mubr.bf16.gmra.mrb[40].mxu1 %v2404_v43  ;;  %1168 = vmatprep.mubr.bf16.mxu0 %v2424_v48 }
  0x75   :  { %1265 = vmatprep.mubr.bf16.mxu1 %v2429_v49 }
  0x7b   :  { %1169 = vmatmul.mubr.bf16.gmra.mrb[44].mxu0 %v2434_v50 }
  0x7c   :  { %1266 = vmatmul.mubr.bf16.gmra.mrb[44].mxu1 %v2439_v51  ;;  %1176 = vmatprep.mubr.bf16.mxu0 %v2459_v56 }
  0x7d   :  { %1273 = vmatprep.mubr.bf16.mxu1 %v2465_v57 }
  0x83   :  { %1177 = vmatmul.mubr.bf16.gmra.mrb[48].mxu0 %v2471_v58 }
  0x84   :  { %1274 = vmatmul.mubr.bf16.gmra.mrb[48].mxu1 %v2477_v59  ;;  %1184 = vmatprep.mubr.bf16.mxu0 %v2494_v0 }
  0x85   :  { %1281 = vmatprep.mubr.bf16.mxu1 %v2500_v1 }
  0x8b   :  { %1185 = vmatmul.mubr.bf16.gmra.mrb[52].mxu0 %v2508_v2 }
  0x8c   :  { %1282 = vmatmul.mubr.bf16.gmra.mrb[52].mxu1 %v2516_v4  ;;  %1192 = vmatprep.mubr.bf16.mxu0 %v2530_v8 }
  0x8d   :  { %1289 = vmatprep.mubr.bf16.mxu1 %v2535_v9 }
  0x93   :  { %1193 = vmatmul.mubr.bf16.gmra.mrb[56].mxu0 %v2550_v12 }
  0x94   :  { %1290 = vmatmul.mubr.bf16.gmra.mrb[56].mxu1 %v2561_v15  ;;  %1200 = vmatprep.mubr.bf16.mxu0 %v2566_v16 }
  0x95   :  { %1297 = vmatprep.mubr.bf16.mxu1 %v2571_v17 }
  0x9b   :  { %1201 = vmatmul.mubr.bf16.gmra.mrb[60].mxu0 %v2199_v22 }
  0x9c   :  { %1298 = vmatmul.mubr.bf16.gmra.mrb[60].mxu1 %v2200_v23 }
  0xf6   :  { %v1863_v32 = vpop.f32.mrb[0].mxu0 }
  0xf7   :  { %v1927_v33 = vpop.f32.mrb[0].mxu1  ;;  %v1864_v34 = vpop.f32.mrb[1].mxu0 }
  0xf8   :  { %v1865_v35 = vadd.f32 %v1864_v34, %v1863_v32  ;;  %v1928_v40 = vpop.f32.mrb[1].mxu1  ;;  %v1866_v41 = vpop.f32.mrb[2].mxu0 }
  0xf9   :  { %v1929_v42 = vadd.f32 %v1928_v40, %v1927_v33  ;;  %v1930_v43 = vpop.f32.mrb[2].mxu1  ;;  %v1867_v44 = vpop.f32.mrb[3].mxu0 }
  0xfa   :  { %v1868_v45 = vadd.f32 %v1867_v44, %v1866_v41  ;;  %v1931_v46 = vpop.f32.mrb[3].mxu1 }
  0xfb   :  { %v2657_v47 = vadd.f32 %v1929_v42, %v1865_v35  ;;  %v1932_v48 = vadd.f32 %v1931_v46, %v1930_v43 }
  0xfd   :  { %v2659_v49 = vadd.f32 %v1932_v48, %v1868_v45 }
  0xfe   :  { %v1869_v50 = vpop.f32.mrb[4].mxu0 }
  0xff   :  { %v1933_v51 = vpop.f32.mrb[4].mxu1  ;;  %v1870_v52 = vpop.f32.mrb[5].mxu0 }
 0x100   :  { %v1871_v53 = vadd.f32 %v1870_v52, %v1869_v50  ;;  %v1934_v54 = vpop.f32.mrb[5].mxu1  ;;  %v1872_v55 = vpop.f32.mrb[6].mxu0 }
 0x101   :  { %v1935_v56 = vadd.f32 %v1934_v54, %v1933_v51  ;;  %v1936_v57 = vpop.f32.mrb[6].mxu1  ;;  %v1873_v58 = vpop.f32.mrb[7].mxu0 }
 0x102   :  { %v1874_v59 = vadd.f32 %v1873_v58, %v1872_v55  ;;  %v1937_v60 = vpop.f32.mrb[7].mxu1 }
 0x103   :  { %v2661_v61 = vadd.f32 %v1935_v56, %v1871_v53  ;;  %v1938_v62 = vadd.f32 %v1937_v60, %v1936_v57 }
 0x105   :  { %v2663_v63 = vadd.f32 %v1938_v62, %v1874_v59 }
 0x106   :  { %v1875_v0 = vpop.f32.mrb[8].mxu0 }
 0x107   :  { %v1939_v1 = vpop.f32.mrb[8].mxu1  ;;  %v1876_v2 = vpop.f32.mrb[9].mxu0 }
 0x108   :  { %v1877_v3 = vadd.f32 %v1876_v2, %v1875_v0  ;;  %v1940_v4 = vpop.f32.mrb[9].mxu1  ;;  %v1878_v5 = vpop.f32.mrb[10].mxu0 }
 0x109   :  { %v1941_v6 = vadd.f32 %v1940_v4, %v1939_v1  ;;  %v1942_v7 = vpop.f32.mrb[10].mxu1  ;;  %v1879_v8 = vpop.f32.mrb[11].mxu0 }
 0x10a   :  { %v1880_v9 = vadd.f32 %v1879_v8, %v1878_v5  ;;  %v1943_v10 = vpop.f32.mrb[11].mxu1 }
 0x10b   :  { %v2665_v11 = vadd.f32 %v1941_v6, %v1877_v3  ;;  %v1944_v12 = vadd.f32 %v1943_v10, %v1942_v7 }
 0x10d   :  { %v2667_v13 = vadd.f32 %v1944_v12, %v1880_v9 }
 0x10e   :  { %v1881_v14 = vpop.f32.mrb[12].mxu0 }
 0x10f   :  { %v1945_v15 = vpop.f32.mrb[12].mxu1  ;;  %v1882_v16 = vpop.f32.mrb[13].mxu0 }
 0x110   :  { %v1883_v17 = vadd.f32 %v1882_v16, %v1881_v14  ;;  %v1946_v18 = vpop.f32.mrb[13].mxu1  ;;  %v1884_v19 = vpop.f32.mrb[14].mxu0 }
 0x111   :  { %v1947_v20 = vadd.f32 %v1946_v18, %v1945_v15  ;;  %v1948_v21 = vpop.f32.mrb[14].mxu1  ;;  %v1885_v22 = vpop.f32.mrb[15].mxu0 }
 0x112   :  { %v1886_v23 = vadd.f32 %v1885_v22, %v1884_v19  ;;  %v1949_v24 = vpop.f32.mrb[15].mxu1 }
 0x113   :  { %v2669_v25 = vadd.f32 %v1947_v20, %v1883_v17  ;;  %v1950_v26 = vadd.f32 %v1949_v24, %v1948_v21 }
 0x115   :  { %v2671_v27 = vadd.f32 %v1950_v26, %v1886_v23 }
 0x116   :  { %v1887_v28 = vpop.f32.mrb[16].mxu0 }
 0x117   :  { %v1951_v29 = vpop.f32.mrb[16].mxu1  ;;  %v1888_v30 = vpop.f32.mrb[17].mxu0 }
 0x118   :  { %v1889_v31 = vadd.f32 %v1888_v30, %v1887_v28  ;;  %v1952_v36 = vpop.f32.mrb[17].mxu1  ;;  %v1890_v37 = vpop.f32.mrb[18].mxu0 }
 0x119   :  { %v1953_v38 = vadd.f32 %v1952_v36, %v1951_v29  ;;  %v1954_v39 = vpop.f32.mrb[18].mxu1  ;;  %v1891_v32 = vpop.f32.mrb[19].mxu0 }
 0x11a   :  { %v1892_v33 = vadd.f32 %v1891_v32, %v1890_v37  ;;  %v1955_v34 = vpop.f32.mrb[19].mxu1 }
 0x11b   :  { %v2673_v35 = vadd.f32 %v1953_v38, %v1889_v31  ;;  %v1956_v40 = vadd.f32 %v1955_v34, %v1954_v39 }
 0x11d   :  { %v2675_v41 = vadd.f32 %v1956_v40, %v1892_v33 }
 0x11e   :  { %v1893_v42 = vpop.f32.mrb[20].mxu0 }
 0x11f   :  { %v1957_v43 = vpop.f32.mrb[20].mxu1  ;;  %v1894_v44 = vpop.f32.mrb[21].mxu0 }
 0x120   :  { %v1895_v45 = vadd.f32 %v1894_v44, %v1893_v42  ;;  %v1958_v46 = vpop.f32.mrb[21].mxu1  ;;  %v1896_v48 = vpop.f32.mrb[22].mxu0 }
 0x121   :  { %v1959_v50 = vadd.f32 %v1958_v46, %v1957_v43  ;;  %v1960_v51 = vpop.f32.mrb[22].mxu1  ;;  %v1897_v52 = vpop.f32.mrb[23].mxu0 }
 0x122   :  { %v1898_v53 = vadd.f32 %v1897_v52, %v1896_v48  ;;  %v1961_v54 = vpop.f32.mrb[23].mxu1 }
 0x123   :  { %v2677_v55 = vadd.f32 %v1959_v50, %v1895_v45  ;;  %v1962_v56 = vadd.f32 %v1961_v54, %v1960_v51  ;;  %v2694_v51 = vld [vmem:[%s2858_s2] ss:$0 sm:$0xff] }
 0x125   :  { %v2679_v57 = vadd.f32 %v1962_v56, %v1898_v53 }
 0x126   :  { %v1899_v58 = vpop.f32.mrb[24].mxu0 }
 0x127   :  { %v1963_v59 = vpop.f32.mrb[24].mxu1  ;;  %v1900_v60 = vpop.f32.mrb[25].mxu0 }
 0x128   :  { %v1901_v62 = vadd.f32 %v1900_v60, %v1899_v58  ;;  %v1964_v0 = vpop.f32.mrb[25].mxu1  ;;  %v1902_v1 = vpop.f32.mrb[26].mxu0 }
 0x129   :  { %v1965_v2 = vadd.f32 %v1964_v0, %v1963_v59  ;;  %v1966_v3 = vpop.f32.mrb[26].mxu1  ;;  %v1903_v4 = vpop.f32.mrb[27].mxu0 }
 0x12a   :  { %v1904_v5 = vadd.f32 %v1903_v4, %v1902_v1  ;;  %v1967_v6 = vpop.f32.mrb[27].mxu1 }
 0x12b   :  { %v2681_v7 = vadd.f32 %v1965_v2, %v1901_v62  ;;  %v1968_v8 = vadd.f32 %v1967_v6, %v1966_v3 }
 0x12d   :  { %v2683_v9 = vadd.f32 %v1968_v8, %v1904_v5 }
 0x12e   :  { %v1905_v10 = vpop.f32.mrb[28].mxu0 }
 0x12f   :  { %v1969_v12 = vpop.f32.mrb[28].mxu1  ;;  %v1906_v14 = vpop.f32.mrb[29].mxu0 }
 0x130   :  { %v1907_v15 = vadd.f32 %v1906_v14, %v1905_v10  ;;  %v1970_v16 = vpop.f32.mrb[29].mxu1  ;;  %v1908_v17 = vpop.f32.mrb[30].mxu0 }
 0x131   :  { %v1971_v18 = vadd.f32 %v1970_v16, %v1969_v12  ;;  %v1972_v19 = vpop.f32.mrb[30].mxu1  ;;  %v1909_v20 = vpop.f32.mrb[31].mxu0 }
 0x132   :  { %v1910_v21 = vadd.f32 %v1909_v20, %v1908_v17  ;;  %v1973_v22 = vpop.f32.mrb[31].mxu1 }
 0x133   :  { %v2685_v23 = vadd.f32 %v1971_v18, %v1907_v15  ;;  %v1974_v24 = vadd.f32 %v1973_v22, %v1972_v19 }
 0x135   :  { %v2687_v26 = vadd.f32 %v1974_v24, %v1910_v21 }
 0x136   :  { %v1991_v28 = vpop.f32.mrb[32].mxu0 }
 0x137   :  { %v2055_v29 = vpop.f32.mrb[32].mxu1  ;;  %v1992_v30 = vpop.f32.mrb[33].mxu0 }
 0x138   :  { %v1993_v31 = vadd.f32 %v1992_v30, %v1991_v28  ;;  %v2056_v36 = vpop.f32.mrb[33].mxu1  ;;  %v1994_v37 = vpop.f32.mrb[34].mxu0 }
 0x139   :  { %v2057_v38 = vadd.f32 %v2056_v36, %v2055_v29  ;;  %v2058_v39 = vpop.f32.mrb[34].mxu1  ;;  %v1995_v32 = vpop.f32.mrb[35].mxu0 }
 0x13a   :  { %v1147_v33 = vadd.f32 %v1993_v31, %v2657_v47  ;;  %v1996_v34 = vadd.f32 %v1995_v32, %v1994_v37  ;;  %v2059_v40 = vpop.f32.mrb[35].mxu1 }
 0x13b   :  { %v2060_v42 = vadd.f32 %v2059_v40, %v2058_v39 }
 0x13c   :  { %v1244_v43 = vadd.f32 %v2057_v38, %v1147_v33  ;;  %v1150_v44 = vadd.f32 %v1996_v34, %v2659_v49 }
 0x13e   :  { %v1247_v45 = vadd.f32 %v2060_v42, %v1150_v44  ;;  %v1997_v46 = vpop.f32.mrb[36].mxu0  ;;  %v2701_v0 = vadd.f32 %v2694_v51, %v1244_v43 }
 0x13f   :  { %v2061_v48 = vpop.f32.mrb[36].mxu1  ;;  %v1998_v50 = vpop.f32.mrb[37].mxu0 }
 0x140   :  { %v1999_v52 = vadd.f32 %v1998_v50, %v1997_v46  ;;  %v2062_v53 = vpop.f32.mrb[37].mxu1  ;;  %v2000_v54 = vpop.f32.mrb[38].mxu0  ;;  %v2697_v59 = vadd.f32 %v2694_v51, %v1247_v45 }
 0x141   :  { %v2063_v56 = vadd.f32 %v2062_v53, %v2061_v48  ;;  %v2064_v47 = vpop.f32.mrb[38].mxu1  ;;  %v2001_v58 = vpop.f32.mrb[39].mxu0 }
 0x142   :  { %v1155_v49 = vadd.f32 %v1999_v52, %v2661_v61  ;;  %v2002_v60 = vadd.f32 %v2001_v58, %v2000_v54  ;;  %v2065_v62 = vpop.f32.mrb[39].mxu1  ;;  %v1352_v4 = vmul.f32 %v2697_v59, %v2697_v59  ;;  %v1351_v61 = vmul.f32 %v2701_v0, %v2701_v0 }
 0x143   :  { %v2066_v1 = vadd.f32 %v2065_v62, %v2064_v47  ;;  %v1329_v14 = vadd.f32 %v2697_v59, %v2701_v0 }
 0x144   :  { %v1252_v2 = vadd.f32 %v2063_v56, %v1155_v49  ;;  %v1158_v3 = vadd.f32 %v2002_v60, %v2663_v63  ;;  %v1367_v22 = vadd.f32 %v1352_v4, %v1351_v61 }
 0x146   :  { %v2707_v5 = vadd.f32 %v2694_v51, %v1252_v2  ;;  %v1255_v6 = vadd.f32 %v2066_v1, %v1158_v3  ;;  %v2003_v8 = vpop.f32.mrb[40].mxu0 }
 0x147   :  { %v2067_v10 = vpop.f32.mrb[40].mxu1  ;;  %v2004_v12 = vpop.f32.mrb[41].mxu0 }
 0x148   :  { %v1353_v15 = vmul.f32 %v2707_v5, %v2707_v5  ;;  %v2716_v63 = vadd.f32 %v2694_v51, %v1255_v6  ;;  %v2005_v16 = vadd.f32 %v2004_v12, %v2003_v8  ;;  %v2068_v17 = vpop.f32.mrb[41].mxu1  ;;  %v2006_v18 = vpop.f32.mrb[42].mxu0  ;;  %v1330_v24 = vadd.f32 %v1329_v14, %v2707_v5 }
 0x149   :  { %v2069_v19 = vadd.f32 %v2068_v17, %v2067_v10  ;;  %v2070_v20 = vpop.f32.mrb[42].mxu1  ;;  %v2007_v21 = vpop.f32.mrb[43].mxu0 }
 0x14a   :  { %v1163_v28 = vadd.f32 %v2005_v16, %v2665_v11  ;;  %v2071_v29 = vpop.f32.mrb[43].mxu1  ;;  %v2008_v30 = vadd.f32 %v2007_v21, %v2006_v18  ;;  %v1368_v36 = vadd.f32 %v1367_v22, %v1353_v15  ;;  %v1354_v37 = vmul.f32 %v2716_v63, %v2716_v63 }
 0x14b   :  { %v2072_v31 = vadd.f32 %v2071_v29, %v2070_v20  ;;  %v1331_v32 = vadd.f32 %v1330_v24, %v2716_v63 }
 0x14c   :  { %v1260_v38 = vadd.f32 %v2069_v19, %v1163_v28  ;;  %v1166_v39 = vadd.f32 %v2008_v30, %v2667_v13  ;;  %v1369_v11 = vadd.f32 %v1368_v36, %v1354_v37 }
 0x14e   :  { %v2725_v33 = vadd.f32 %v2694_v51, %v1260_v38  ;;  %v2009_v34 = vpop.f32.mrb[44].mxu0  ;;  %v1263_v40 = vadd.f32 %v2072_v31, %v1166_v39 }
 0x14f   :  { %v2073_v42 = vpop.f32.mrb[44].mxu1  ;;  %v2010_v43 = vpop.f32.mrb[45].mxu0 }
 0x150   :  { %v1332_v44 = vadd.f32 %v1331_v32, %v2725_v33  ;;  %v1355_v45 = vmul.f32 %v2725_v33, %v2725_v33  ;;  %v2011_v46 = vadd.f32 %v2010_v43, %v2009_v34  ;;  %v2074_v48 = vpop.f32.mrb[45].mxu1  ;;  %v2012_v50 = vpop.f32.mrb[46].mxu0  ;;  %v2731_v13 = vadd.f32 %v2694_v51, %v1263_v40 }
 0x151   :  { %v2075_v52 = vadd.f32 %v2074_v48, %v2073_v42  ;;  %v2076_v53 = vpop.f32.mrb[46].mxu1  ;;  %v2013_v54 = vpop.f32.mrb[47].mxu0 }
 0x152   :  { %v1370_v56 = vadd.f32 %v1369_v11, %v1355_v45  ;;  %v1171_v47 = vadd.f32 %v2011_v46, %v2669_v25  ;;  %v2014_v58 = vadd.f32 %v2013_v54, %v2012_v50  ;;  %v2077_v49 = vpop.f32.mrb[47].mxu1  ;;  %v1333_v60 = vadd.f32 %v1332_v44, %v2731_v13 }
 0x153   :  { %v1356_v62 = vmul.f32 %v2731_v13, %v2731_v13  ;;  %v2078_v1 = vadd.f32 %v2077_v49, %v2076_v53 }
 0x154   :  { %v1268_v2 = vadd.f32 %v2075_v52, %v1171_v47  ;;  %v1174_v3 = vadd.f32 %v2014_v58, %v2671_v27 }
 0x155   :  { %v1371_v4 = vadd.f32 %v1370_v56, %v1356_v62 }
 0x156   :  { %v2739_v6 = vadd.f32 %v2694_v51, %v1268_v2  ;;  %v1271_v8 = vadd.f32 %v2078_v1, %v1174_v3  ;;  %v2015_v61 = vpop.f32.mrb[48].mxu0 }
 0x157   :  { %v2079_v10 = vpop.f32.mrb[48].mxu1  ;;  %v2016_v12 = vpop.f32.mrb[49].mxu0 }
 0x158   :  { %v1334_v25 = vadd.f32 %v1333_v60, %v2739_v6  ;;  %v1357_v14 = vmul.f32 %v2739_v6, %v2739_v6  ;;  %v2745_v15 = vadd.f32 %v2694_v51, %v1271_v8  ;;  %v2017_v16 = vadd.f32 %v2016_v12, %v2015_v61  ;;  %v2080_v17 = vpop.f32.mrb[49].mxu1  ;;  %v2018_v18 = vpop.f32.mrb[50].mxu0 }
 0x159   :  { %v2081_v27 = vadd.f32 %v2080_v17, %v2079_v10  ;;  %v2082_v19 = vpop.f32.mrb[50].mxu1  ;;  %v2019_v20 = vpop.f32.mrb[51].mxu0 }
 0x15a   :  { %v1372_v21 = vadd.f32 %v1371_v4, %v1357_v14  ;;  %v1335_v22 = vadd.f32 %v1334_v25, %v2745_v15  ;;  %v1358_v24 = vmul.f32 %v2745_v15, %v2745_v15  ;;  %v1179_v28 = vadd.f32 %v2017_v16, %v2673_v35  ;;  %v2083_v29 = vpop.f32.mrb[51].mxu1 }
 0x15b   :  { %v2020_v30 = vadd.f32 %v2019_v20, %v2018_v18  ;;  %v2084_v31 = vadd.f32 %v2083_v29, %v2082_v19 }
 0x15c   :  { %v1373_v36 = vadd.f32 %v1372_v21, %v1358_v24  ;;  %v1276_v37 = vadd.f32 %v2081_v27, %v1179_v28 }
 0x15d   :  { %v1182_v38 = vadd.f32 %v2020_v30, %v2675_v41 }
 0x15e   :  { %v2753_v39 = vadd.f32 %v2694_v51, %v1276_v37  ;;  %v2021_v32 = vpop.f32.mrb[52].mxu0 }
 0x15f   :  { %v1279_v34 = vadd.f32 %v2084_v31, %v1182_v38  ;;  %v2085_v40 = vpop.f32.mrb[52].mxu1  ;;  %v2022_v42 = vpop.f32.mrb[53].mxu0 }
 0x160   :  { %v1336_v43 = vadd.f32 %v1335_v22, %v2753_v39  ;;  %v1359_v11 = vmul.f32 %v2753_v39, %v2753_v39  ;;  %v2023_v35 = vadd.f32 %v2022_v42, %v2021_v32  ;;  %v2086_v44 = vpop.f32.mrb[53].mxu1  ;;  %v2024_v45 = vpop.f32.mrb[54].mxu0 }
 0x161   :  { %v2759_v46 = vadd.f32 %v2694_v51, %v1279_v34  ;;  %v2087_v48 = vadd.f32 %v2086_v44, %v2085_v40  ;;  %v2088_v41 = vpop.f32.mrb[54].mxu1  ;;  %v2025_v50 = vpop.f32.mrb[55].mxu0 }
 0x162   :  { %v1374_v52 = vadd.f32 %v1373_v36, %v1359_v11  ;;  %v1187_v53 = vadd.f32 %v2023_v35, %v2677_v55  ;;  %v2026_v54 = vadd.f32 %v2025_v50, %v2024_v45  ;;  %v2089_v56 = vpop.f32.mrb[55].mxu1 }
 0x163   :  { %v1337_v47 = vadd.f32 %v1336_v43, %v2759_v46  ;;  %v1360_v58 = vmul.f32 %v2759_v46, %v2759_v46  ;;  %v2090_v49 = vadd.f32 %v2089_v56, %v2088_v41 }
 0x164   :  { %v1284_v60 = vadd.f32 %v2087_v48, %v1187_v53  ;;  %v1190_v62 = vadd.f32 %v2026_v54, %v2679_v57 }
 0x165   :  { %v1375_v1 = vadd.f32 %v1374_v52, %v1360_v58 }
 0x166   :  { %v2767_v2 = vadd.f32 %v2694_v51, %v1284_v60  ;;  %v1287_v3 = vadd.f32 %v2090_v49, %v1190_v62  ;;  %v2027_v4 = vpop.f32.mrb[56].mxu0 }
 0x167   :  { %v2091_v8 = vpop.f32.mrb[56].mxu1  ;;  %v2028_v61 = vpop.f32.mrb[57].mxu0 }
 0x168   :  { %v1338_v55 = vadd.f32 %v1337_v47, %v2767_v2  ;;  %v1361_v10 = vmul.f32 %v2767_v2, %v2767_v2  ;;  %v2773_v12 = vadd.f32 %v2694_v51, %v1287_v3  ;;  %v2029_v25 = vadd.f32 %v2028_v61, %v2027_v4  ;;  %v2092_v14 = vpop.f32.mrb[57].mxu1  ;;  %v2030_v16 = vpop.f32.mrb[58].mxu0 }
 0x169   :  { %v2093_v57 = vadd.f32 %v2092_v14, %v2091_v8  ;;  %v2094_v17 = vpop.f32.mrb[58].mxu1  ;;  %v2031_v18 = vpop.f32.mrb[59].mxu0 }
 0x16a   :  { %v1376_v27 = vadd.f32 %v1375_v1, %v1361_v10  ;;  %v1339_v19 = vadd.f32 %v1338_v55, %v2773_v12  ;;  %v1362_v20 = vmul.f32 %v2773_v12, %v2773_v12  ;;  %v1195_v21 = vadd.f32 %v2029_v25, %v2681_v7  ;;  %v2095_v22 = vpop.f32.mrb[59].mxu1 }
 0x16b   :  { %v2032_v24 = vadd.f32 %v2031_v18, %v2030_v16  ;;  %v2096_v28 = vadd.f32 %v2095_v22, %v2094_v17 }
 0x16c   :  { %v1377_v29 = vadd.f32 %v1376_v27, %v1362_v20  ;;  %v1292_v30 = vadd.f32 %v2093_v57, %v1195_v21 }
 0x16d   :  { %v1198_v31 = vadd.f32 %v2032_v24, %v2683_v9 }
 0x16e   :  { %v2781_v36 = vadd.f32 %v2694_v51, %v1292_v30  ;;  %v2033_v37 = vpop.f32.mrb[60].mxu0 }
 0x16f   :  { %v1295_v38 = vadd.f32 %v2096_v28, %v1198_v31  ;;  %v2097_v32 = vpop.f32.mrb[60].mxu1  ;;  %v2034_v34 = vpop.f32.mrb[61].mxu0  ;;  %v1400_v31 = vlaneseq }
 0x170   :  { %v1340_v40 = vadd.f32 %v1339_v19, %v2781_v36  ;;  %v1363_v42 = vmul.f32 %v2781_v36, %v2781_v36  ;;  %v2035_v7 = vadd.f32 %v2034_v34, %v2033_v37  ;;  %v2098_v43 = vpop.f32.mrb[61].mxu1  ;;  %v2036_v11 = vpop.f32.mrb[62].mxu0 }
 0x171   :  { %v2787_v35 = vadd.f32 %v2694_v51, %v1295_v38  ;;  %v2099_v44 = vadd.f32 %v2098_v43, %v2097_v32  ;;  %v2100_v9 = vpop.f32.mrb[62].mxu1  ;;  %v2037_v45 = vpop.f32.mrb[63].mxu0  ;;  %v1401_v37 = vshrl.u32 %v1400_v31, 7  ;;  %v1392_v38 = vld [vmem:[%s2859_s3] sm:$0x1] }
 0x172   :  { %v1378_v48 = vadd.f32 %v1377_v29, %v1363_v42  ;;  %v1203_v41 = vadd.f32 %v2035_v7, %v2685_v23  ;;  %v2038_v50 = vadd.f32 %v2037_v45, %v2036_v11  ;;  %v2101_v52 = vpop.f32.mrb[63].mxu1  ;;  %v1396_v42 = vld [vmem:[%s2860_s4] sm:$0x1] }
 0x173   :  { %v1341_v53 = vadd.f32 %v1340_v40, %v2787_v35  ;;  %v1364_v54 = vmul.f32 %v2787_v35, %v2787_v35  ;;  %v2102_v56 = vadd.f32 %v2101_v52, %v2100_v9  ;;  %v1402_v32 = vsub.s32 0, %v1401_v37 }
 0x174   :  { %v1300_v47 = vadd.f32 %v2099_v44, %v1203_v41  ;;  %v1206_v58 = vadd.f32 %v2038_v50, %v2687_v26 }
 0x175   :  { %v1379_v49 = vadd.f32 %v1378_v48, %v1364_v54 }
 0x176   :  { %v1327_v60 = vadd.f32 %v2694_v51, %v1300_v47  ;;  %v1303_v62 = vadd.f32 %v2102_v56, %v1206_v58 }
 0x178   :  { %v1342_v1 = vadd.f32 %v1341_v53, %v1327_v60  ;;  %v1365_v3 = vmul.f32 %v1327_v60, %v1327_v60  ;;  %v1328_v4 = vadd.f32 %v2694_v51, %v1303_v62 }
 0x17a   :  { %v1380_v23 = vadd.f32 %v1379_v49, %v1365_v3  ;;  %v1343_v8 = vadd.f32 %v1342_v1, %v1328_v4  ;;  %v1366_v61 = vmul.f32 %v1328_v4, %v1328_v4 }
 0x17c   :  { %v1344_v55 = vrot.slane %v1343_v8, 4  ;;  %v1381_v10 = vadd.f32 %v1380_v23, %v1366_v61 }
 0x17e   :  { %v1345_v25 = vadd.f32 %v1344_v55, %v1343_v8  ;;  %v1382_v14 = vrot.slane %v1381_v10, 4 }
 0x180   :  { %v1346_v16 = vrot.slane %v1345_v25, 2  ;;  %v1383_v57 = vadd.f32 %v1382_v14, %v1381_v10 }
 0x182   :  { %v1347_v17 = vadd.f32 %v1346_v16, %v1345_v25  ;;  %v1384_v18 = vrot.slane %v1383_v57, 2 }
 0x184   :  { %v1348_v26 = vrot.slane %v1347_v17, 1  ;;  %v1385_v27 = vadd.f32 %v1384_v18, %v1383_v57 }
 0x186   :  { %v1349_v19 = vadd.f32 %v1348_v26, %v1347_v17  ;;  %v1386_v20 = vrot.slane %v1385_v27, 1 }
 0x188   :  { %v1350_v21 = vmul.f32 0.0078125, %v1349_v19  ;;  %v1387_v22 = vadd.f32 %v1386_v20, %v1385_v27 }
 0x18a   :  { %v1388_v24 = vmul.f32 0.0078125, %v1387_v22  ;;  %v1389_v28 = vmul.f32 %v1350_v21, %v1350_v21 }
 0x18c   :  { %v1390_v51 = vsub.f32 %v1388_v24, %v1389_v28 }
 0x18e   :  { %v1391_v29 = vmax.f32 %v1390_v51, 0.0 }
 0x190   :  { %v1393_v30 = vadd.f32 1e-05, %v1391_v29 }
 0x192   :  { %2221 = vrsqrt.f32 %v1393_v30 }
 0x19c   :  { %v2222_v34 = vpop.eup %2221 }
 0x19d   :  { %v1395_v40 = vmul.f32 %v2222_v34, %v1392_v38 }
 0x19f   :  { %v1397_v7 = vmul.f32 %v1395_v40, %v1350_v21  ;;  %v1403_v43 = vrot.slane %v1395_v40, %v1402_v32 }
 0x1a1   :  { %v1398_v11 = vsub.f32 %v1396_v42, %v1397_v7  ;;  %v1405_v44 = vmul.f32 %v1403_v43, %v2701_v0  ;;  %v1406_v9 = vmul.f32 %v1403_v43, %v2697_v59  ;;  %v1409_v45 = vmul.f32 %v1403_v43, %v2725_v33 }
 0x1a2   :  { %v1410_v48 = vmul.f32 %v1403_v43, %v2731_v13  ;;  %v1411_v41 = vmul.f32 %v1403_v43, %v2739_v6  ;;  %v1412_v50 = vmul.f32 %v1403_v43, %v2745_v15  ;;  %v1413_v52 = vmul.f32 %v1403_v43, %v2753_v39 }
 0x1a3   :  { %v1414_v53 = vmul.f32 %v1403_v43, %v2759_v46  ;;  %v1415_v54 = vmul.f32 %v1403_v43, %v2767_v2  ;;  %v1416_v56 = vmul.f32 %v1403_v43, %v2773_v12  ;;  %v1417_v0 = vmul.f32 %v1403_v43, %v2781_v36 }
 0x1a4   :  { %v1418_v59 = vmul.f32 %v1403_v43, %v2787_v35  ;;  %v1419_v47 = vmul.f32 %v1403_v43, %v1327_v60  ;;  %v1407_v33 = vmul.f32 %v1403_v43, %v2707_v5  ;;  %v1408_v13 = vmul.f32 %v1403_v43, %v2716_v63 }
 0x1a5   :  { %v1420_v6 = vmul.f32 %v1403_v43, %v1328_v4  ;;  %v1425_v58 = vrot.slane %v1398_v11, %v1402_v32 }
 0x1a7   :  { %v1427_v15 = vadd.f32 %v1425_v58, %v1405_v44  ;;  %v1428_v49 = vadd.f32 %v1425_v58, %v1406_v9  ;;  %v1429_v39 = vadd.f32 %v1425_v58, %v1407_v33  ;;  %v1430_v62 = vadd.f32 %v1425_v58, %v1408_v13 }
 0x1a8   :  { %v1431_v46 = vadd.f32 %v1425_v58, %v1409_v45  ;;  %v1432_v1 = vadd.f32 %v1425_v58, %v1410_v48  ;;  %v1433_v2 = vadd.f32 %v1425_v58, %v1411_v41  ;;  %v1434_v3 = vadd.f32 %v1425_v58, %v1412_v50 }
 0x1a9   :  { %v1435_v12 = vadd.f32 %v1425_v58, %v1413_v52  ;;  %v1436_v23 = vadd.f32 %v1425_v58, %v1414_v53  ;;  %v1437_v36 = vadd.f32 %v1425_v58, %v1415_v54  ;;  %v1438_v8 = vadd.f32 %v1425_v58, %v1416_v56 }
 0x1aa   :  { %v1439_v35 = vadd.f32 %v1425_v58, %v1417_v0  ;;  %v1440_v60 = vadd.f32 %v1425_v58, %v1418_v59  ;;  %v1441_v61 = vadd.f32 %v1425_v58, %v1419_v47  ;;  %v1442_v5 = vadd.f32 %v1425_v58, %v1420_v6 }
 0x1ab   :  { %vm1443_vm0 = vcmp.ge.f32.partialorder %v1427_v15, 0.0  ;;  %vm1444_vm1 = vcmp.ge.f32.partialorder %v1428_v49, 0.0  ;;  %vm1445_vm2 = vcmp.ge.f32.partialorder %v1429_v39, 0.0  ;;  %vm1446_vm3 = vcmp.ge.f32.partialorder %v1430_v62, 0.0 }
 0x1ac   :  { %vm1447_vm4 = vcmp.ge.f32.partialorder %v1431_v46, 0.0  ;;  %vm1448_vm5 = vcmp.ge.f32.partialorder %v1432_v1, 0.0  ;;  %vm1449_vm6 = vcmp.ge.f32.partialorder %v1433_v2, 0.0  ;;  %vm1450_vm7 = vcmp.ge.f32.partialorder %v1434_v3, 0.0 }
 0x1ad   :  { %vm1451_vm8 = vcmp.ge.f32.partialorder %v1435_v12, 0.0  ;;  %vm1452_vm9 = vcmp.ge.f32.partialorder %v1436_v23, 0.0  ;;  %vm1453_vm10 = vcmp.ge.f32.partialorder %v1437_v36, 0.0  ;;  %vm1454_vm11 = vcmp.ge.f32.partialorder %v1438_v8, 0.0 }
 0x1ae   :  { %vm1455_vm12 = vcmp.ge.f32.partialorder %v1439_v35, 0.0  ;;  %vm1456_vm13 = vcmp.ge.f32.partialorder %v1440_v60, 0.0  ;;  %vm1457_vm14 = vcmp.ge.f32.partialorder %v1441_v61, 0.0  ;;  %vm1458_vm15 = vcmp.ge.f32.partialorder %v1442_v5, 0.0 }
 0x1af   :  { %v1459_v63 = vmul.f32 0.2, %v1427_v15  ;;  %v1460_v4 = vmul.f32 0.2, %v1428_v49  ;;  %v1461_v55 = vmul.f32 0.2, %v1429_v39 }
 0x1b0   :  { %v1462_v10 = vmul.f32 0.2, %v1430_v62  ;;  %v1463_v25 = vmul.f32 0.2, %v1431_v46  ;;  %v1464_v14 = vmul.f32 0.2, %v1432_v1 }
 0x1b1   :  { %v1465_v16 = vmul.f32 0.2, %v1433_v2  ;;  %v1466_v57 = vmul.f32 0.2, %v1434_v3  ;;  %v1467_v17 = vmul.f32 0.2, %v1435_v12  ;;  %v1475_v18 = vsel %vm1443_vm0, %v1427_v15, %v1459_v63 }
 0x1b2   :  { %v1468_v26 = vmul.f32 0.2, %v1436_v23  ;;  %v1469_v27 = vmul.f32 0.2, %v1437_v36  ;;  %v1470_v19 = vmul.f32 0.2, %v1438_v8  ;;  %v1476_v20 = vsel %vm1444_vm1, %v1428_v49, %v1460_v4 }
 0x1b3   :  { %v1471_v21 = vmul.f32 0.2, %v1439_v35  ;;  %v1472_v22 = vmul.f32 0.2, %v1440_v60  ;;  %v1473_v24 = vmul.f32 0.2, %v1441_v61  ;;  %v1477_v28 = vsel %vm1445_vm2, %v1429_v39, %v1461_v55 }
 0x1b4   :  { %v1474_v51 = vmul.f32 0.2, %v1442_v5  ;;  %v1478_v29 = vsel %vm1446_vm3, %v1430_v62, %v1462_v10  ;;  %v1479_v30 = vsel %vm1447_vm4, %v1431_v46, %v1463_v25  ;;  %v1480_v31 = vsel %vm1448_vm5, %v1432_v1, %v1464_v14 }
 0x1b5   :  { %v1481_v37 = vsel %vm1449_vm6, %v1433_v2, %v1465_v16  ;;  %v1482_v38 = vsel %vm1450_vm7, %v1434_v3, %v1466_v57  ;;  %v1483_v32 = vsel %vm1451_vm8, %v1435_v12, %v1467_v17  ;;  %v1484_v34 = vsel %vm1452_vm9, %v1436_v23, %v1468_v26 }
 0x1b6   :  { %v1485_v40 = vsel %vm1453_vm10, %v1437_v36, %v1469_v27  ;;  %v1486_v42 = vsel %vm1454_vm11, %v1438_v8, %v1470_v19  ;;  %v1487_v7 = vsel %vm1455_vm12, %v1439_v35, %v1471_v21  ;;  %v1488_v43 = vsel %vm1456_vm13, %v1440_v60, %v1472_v22 }
 0x1b7   :  { %v1489_v11 = vsel %vm1457_vm14, %v1441_v61, %v1473_v24  ;;  %v1490_v44 = vsel %vm1458_vm15, %v1442_v5, %v1474_v51  ;;  %v1803_v9 = vpack.c.bf16 %v1476_v20, %v1475_v18  ;;  %v1808_v45 = vpack.c.bf16 %v1478_v29, %v1477_v28 }
 0x1b8   :  { %v1813_v48 = vpack.c.bf16 %v1480_v31, %v1479_v30  ;;  %v1818_v41 = vpack.c.bf16 %v1482_v38, %v1481_v37  ;;  %v1823_v50 = vpack.c.bf16 %v1484_v34, %v1483_v32  ;;  %v1828_v52 = vpack.c.bf16 %v1486_v42, %v1485_v40 }
 0x1b9   :  { %1804 = vst [vmem:[%s2861_s5] sm:$0xff] %v1803_v9   ;;  %1840 = vst [vmem:[%s2861_s5 + $0x8] sm:$0xff] %v1808_v45   ;;  %v1833_v53 = vpack.c.bf16 %v1488_v43, %v1487_v7  ;;  %v1838_v54 = vpack.c.bf16 %v1490_v44, %v1489_v11 }
 0x1ba   :  { %1841 = vst [vmem:[%s2861_s5 + $0x10] sm:$0xff] %v1813_v48   ;;  %1842 = vst [vmem:[%s2861_s5 + $0x18] sm:$0xff] %v1818_v41  }
 0x1bb   :  { %1843 = vst [vmem:[%s2861_s5 + $0x20] sm:$0xff] %v1823_v50   ;;  %1844 = vst [vmem:[%s2861_s5 + $0x28] sm:$0xff] %v1828_v52  }
 0x1bc   :  { %1845 = vst [vmem:[%s2861_s5 + $0x30] sm:$0xff] %v1833_v53   ;;  %1846 = vst [vmem:[%s2861_s5 + $0x38] sm:$0xff] %v1838_v54  }

// kernel: discriminator_forward.6
= control target key start
LH: loop header
LB: loop body
LE: loop exit
PB: predicated region body
PF: predicated region fallthrough
CT: control target
= control target key end

     0   :  { %s4261_s1 = inlined_call_operand.vmem [shape: bf16[2,1024,256], index: 1, kind: input, shape index: {}]   ;;  %s4262_s0 = inlined_call_operand.vmem [shape: bf16[40,1024], index: 0, kind: input, shape index: {}]   ;;  %s4263_s2 = inlined_call_operand.vmem [shape: f32[1,256], index: 2, kind: input, shape index: {}]   ;;  %s4264_s3 = inlined_call_operand.vmem [shape: f32[1,256], index: 3, kind: input, shape index: {}]   ;;  %s4265_s4 = inlined_call_operand.vmem [shape: f32[1,256], index: 4, kind: input, shape index: {}]   ;;  %s4266_s5 = inlined_call_operand.vmem [shape: bf16[32,256], index: 5, kind: output, shape index: {}]  }
   0x1   :  { %v2868_v0 = vld [vmem:[%s4261_s1 + $0x404] ss:$8 sps:$4 sm:$0xff]   ;;  %v2872_v2 = vld [vmem:[%s4261_s1 + $0x400] ss:$8 sps:$4 sm:$0xff]   ;;  %v2874_v4 = vld [vmem:[%s4261_s1 + $0x414] ss:$8 sps:$4 sm:$0xff]  }
   0x2   :  { %v2870_v1 = vld [vmem:[%s4261_s1 + $0x4] ss:$8 sps:$4 sm:$0xff]   ;;  %1029 = vmatprep.subr.bf16.mxu1 %v2868_v0  ;;  %v2873_v3 = vld [vmem:[%s4261_s1] ss:$8 sps:$4 sm:$0xff]   ;;  %v2876_v5 = vld [vmem:[%s4261_s1 + $0x14] ss:$8 sps:$4 sm:$0xff]  }
   0x3   :  { %1961 = vmatprep.subr.bf16.mxu0 %v2870_v1  ;;  %1030 = vmatpush1.bf16.msra.mxu1 %v2872_v2  ;;  %v2878_v6 = vld [vmem:[%s4261_s1 + $0x410] ss:$8 sps:$4 sm:$0xff]   ;;  %v2880_v8 = vld [vmem:[%s4261_s1 + $0x424] ss:$8 sps:$4 sm:$0xff]   ;;  %v2884_v10 = vld [vmem:[%s4261_s1 + $0x420] ss:$8 sps:$4 sm:$0xff]  }
   0x4   :  { %1962 = vmatpush1.bf16.msra.mxu0 %v2873_v3  ;;  %1031 = vmatprep.subr.bf16.mxu1 %v2874_v4  ;;  %v2879_v7 = vld [vmem:[%s4261_s1 + $0x10] ss:$8 sps:$4 sm:$0xff]   ;;  %v2882_v9 = vld [vmem:[%s4261_s1 + $0x24] ss:$8 sps:$4 sm:$0xff]   ;;  %v2885_v11 = vld [vmem:[%s4261_s1 + $0x20] ss:$8 sps:$4 sm:$0xff]  }
   0x5   :  { %1963 = vmatprep.subr.bf16.mxu0 %v2876_v5  ;;  %v2886_v12 = vld [vmem:[%s4261_s1 + $0x434] ss:$8 sps:$4 sm:$0xff]   ;;  %v2890_v14 = vld [vmem:[%s4261_s1 + $0x430] ss:$8 sps:$4 sm:$0xff]   ;;  %v2892_v16 = vld [vmem:[%s4261_s1 + $0x444] ss:$8 sps:$4 sm:$0xff]  }
   0x6   :  { %v2888_v13 = vld [vmem:[%s4261_s1 + $0x34] ss:$8 sps:$4 sm:$0xff]   ;;  %v2891_v15 = vld [vmem:[%s4261_s1 + $0x30] ss:$8 sps:$4 sm:$0xff]   ;;  %v2894_v17 = vld [vmem:[%s4261_s1 + $0x44] ss:$8 sps:$4 sm:$0xff]  }
   0x7   :  { %1032 = vmatpush1.bf16.msra.mxu1 %v2878_v6  ;;  %v2896_v18 = vld [vmem:[%s4261_s1 + $0x440] ss:$8 sps:$4 sm:$0xff]   ;;  %v2898_v20 = vld [vmem:[%s4261_s1 + $0x454] ss:$8 sps:$4 sm:$0xff]   ;;  %v2902_v22 = vld [vmem:[%s4261_s1 + $0x450] ss:$8 sps:$4 sm:$0xff]  }
   0x8   :  { %1964 = vmatpush1.bf16.msra.mxu0 %v2879_v7  ;;  %1033 = vmatprep.subr.bf16.mxu1 %v2880_v8  ;;  %v2897_v19 = vld [vmem:[%s4261_s1 + $0x40] ss:$8 sps:$4 sm:$0xff]   ;;  %v2900_v21 = vld [vmem:[%s4261_s1 + $0x54] ss:$8 sps:$4 sm:$0xff]   ;;  %v2903_v23 = vld [vmem:[%s4261_s1 + $0x50] ss:$8 sps:$4 sm:$0xff]  }
   0x9   :  { %1965 = vmatprep.subr.bf16.mxu0 %v2882_v9  ;;  %v2904_v24 = vld [vmem:[%s4261_s1 + $0x464] ss:$8 sps:$4 sm:$0xff]   ;;  %v2908_v26 = vld [vmem:[%s4261_s1 + $0x460] ss:$8 sps:$4 sm:$0xff]   ;;  %v2910_v28 = vld [vmem:[%s4261_s1 + $0x474] ss:$8 sps:$4 sm:$0xff]  }
   0xa   :  { %v2906_v25 = vld [vmem:[%s4261_s1 + $0x64] ss:$8 sps:$4 sm:$0xff]   ;;  %v2909_v27 = vld [vmem:[%s4261_s1 + $0x60] ss:$8 sps:$4 sm:$0xff]   ;;  %v2912_v29 = vld [vmem:[%s4261_s1 + $0x74] ss:$8 sps:$4 sm:$0xff]  }
   0xb   :  { %1034 = vmatpush1.bf16.msra.mxu1 %v2884_v10  ;;  %v2914_v30 = vld [vmem:[%s4261_s1 + $0x470] ss:$8 sps:$4 sm:$0xff]   ;;  %v2916_v32 = vld [vmem:[%s4261_s1 + $0x484] ss:$8 sps:$4 sm:$0xff]   ;;  %v2920_v34 = vld [vmem:[%s4261_s1 + $0x480] ss:$8 sps:$4 sm:$0xff]  }
   0xc   :  { %1966 = vmatpush1.bf16.msra.mxu0 %v2885_v11  ;;  %1035 = vmatprep.subr.bf16.mxu1 %v2886_v12  ;;  %v2915_v31 = vld [vmem:[%s4261_s1 + $0x70] ss:$8 sps:$4 sm:$0xff]   ;;  %v2918_v33 = vld [vmem:[%s4261_s1 + $0x84] ss:$8 sps:$4 sm:$0xff]   ;;  %v2921_v35 = vld [vmem:[%s4261_s1 + $0x80] ss:$8 sps:$4 sm:$0xff]  }
   0xd   :  { %1967 = vmatprep.subr.bf16.mxu0 %v2888_v13  ;;  %v2922_v36 = vld [vmem:[%s4261_s1 + $0x494] ss:$8 sps:$4 sm:$0xff]   ;;  %v2926_v38 = vld [vmem:[%s4261_s1 + $0x490] ss:$8 sps:$4 sm:$0xff]   ;;  %v2928_v40 = vld [vmem:[%s4261_s1 + $0x4a4] ss:$8 sps:$4 sm:$0xff]  }
   0xe   :  { %v2924_v37 = vld [vmem:[%s4261_s1 + $0x94] ss:$8 sps:$4 sm:$0xff]   ;;  %v2927_v39 = vld [vmem:[%s4261_s1 + $0x90] ss:$8 sps:$4 sm:$0xff]   ;;  %v2930_v41 = vld [vmem:[%s4261_s1 + $0xa4] ss:$8 sps:$4 sm:$0xff]  }
   0xf   :  { %1036 = vmatpush1.bf16.msra.mxu1 %v2890_v14  ;;  %v2932_v42 = vld [vmem:[%s4261_s1 + $0x4a0] ss:$8 sps:$4 sm:$0xff]   ;;  %v2934_v44 = vld [vmem:[%s4261_s1 + $0x4b4] ss:$8 sps:$4 sm:$0xff]   ;;  %v2938_v46 = vld [vmem:[%s4261_s1 + $0x4b0] ss:$8 sps:$4 sm:$0xff]  }
  0x10   :  { %1968 = vmatpush1.bf16.msra.mxu0 %v2891_v15  ;;  %1037 = vmatprep.subr.bf16.mxu1 %v2892_v16  ;;  %v2933_v43 = vld [vmem:[%s4261_s1 + $0xa0] ss:$8 sps:$4 sm:$0xff]   ;;  %v2936_v45 = vld [vmem:[%s4261_s1 + $0xb4] ss:$8 sps:$4 sm:$0xff]   ;;  %v2939_v49 = vld [vmem:[%s4261_s1 + $0xb0] ss:$8 sps:$4 sm:$0xff]  }
  0x11   :  { %1969 = vmatprep.subr.bf16.mxu0 %v2894_v17  ;;  %v36_v47 = vld [vmem:[%s4262_s0 + $0x20] sm:$0xff]  ;;  %v2946_v57 = vld [vmem:[%s4261_s1 + $0x4d4] ss:$8 sps:$4 sm:$0xff]   ;;  %v2950_v59 = vld [vmem:[%s4261_s1 + $0x4d0] ss:$8 sps:$4 sm:$0xff]  }
  0x12   :  { %v3434_v48 = vld [vmem:[%s4262_s0 + $0x40] sm:$0xff]  ;;  %v2948_v58 = vld [vmem:[%s4261_s1 + $0xd4] ss:$8 sps:$4 sm:$0xff]   ;;  %v2951_v60 = vld [vmem:[%s4261_s1 + $0xd0] ss:$8 sps:$4 sm:$0xff]  }
  0x13   :  { %1038 = vmatpush1.bf16.msra.mxu1 %v2896_v18  ;;  %v2940_v50 = vld [vmem:[%s4261_s1 + $0x4c4] ss:$8 sps:$4 sm:$0xff]   ;;  %v2516_v51 = vcombine.high %v36_v47, %v3434_v48  ;;  %v2944_v55 = vld [vmem:[%s4261_s1 + $0x4c0] ss:$8 sps:$4 sm:$0xff]   ;;  %v2958_v1 = vld [vmem:[%s4261_s1 + $0x4f4] ss:$8 sps:$4 sm:$0xff]   ;;  %v2515_v7 = vcombine.low %v36_v47, %v3434_v48 }
  0x14   :  { %1970 = vmatpush1.bf16.msra.mxu0 %v2897_v19  ;;  %1039 = vmatprep.subr.bf16.mxu1 %v2898_v20  ;;  %v20_v52 = vld [vmem:[%s4262_s0] sm:$0xff]  ;;  %v2960_v2 = vld [vmem:[%s4261_s1 + $0xf4] ss:$8 sps:$4 sm:$0xff]   ;;  %v2962_v3 = vld [vmem:[%s4261_s1 + $0x4f0] ss:$8 sps:$4 sm:$0xff]  }
  0x15   :  { %1971 = vmatprep.subr.bf16.mxu0 %v2900_v21  ;;  %v2942_v53 = vld [vmem:[%s4261_s1 + $0xc4] ss:$8 sps:$4 sm:$0xff]   ;;  %v2660_v54 = vcombine.high %v20_v52, %v36_v47  ;;  %1061 = vmatprep.mubr.bf16.mxu1 %v2516_v51  ;;  %v2945_v56 = vld [vmem:[%s4261_s1 + $0xc0] ss:$8 sps:$4 sm:$0xff]   ;;  %v2963_v4 = vld [vmem:[%s4261_s1 + $0xf0] ss:$8 sps:$4 sm:$0xff]   ;;  %v2659_v9 = vcombine.low %v20_v52, %v36_v47 }
  0x16   :  { %v2952_v61 = vld [vmem:[%s4261_s1 + $0x4e4] ss:$8 sps:$4 sm:$0xff]   ;;  %v2956_v63 = vld [vmem:[%s4261_s1 + $0x4e0] ss:$8 sps:$4 sm:$0xff]   ;;  %v2972_v11 = vld [vmem:[%s4261_s1 + $0x514] ss:$8 sps:$4 sm:$0xff]  }
  0x17   :  { %1040 = vmatpush1.bf16.msra.mxu1 %v2902_v22  ;;  %1993 = vmatprep.mubr.bf16.mxu0 %v2660_v54  ;;  %v2954_v62 = vld [vmem:[%s4261_s1 + $0xe4] ss:$8 sps:$4 sm:$0xff]   ;;  %v2957_v0 = vld [vmem:[%s4261_s1 + $0xe0] ss:$8 sps:$4 sm:$0xff]   ;;  %v2975_v12 = vld [vmem:[%s4261_s1 + $0x114] ss:$8 sps:$4 sm:$0xff]  }
  0x18   :  { %1972 = vmatpush1.bf16.msra.mxu0 %v2903_v23  ;;  %1041 = vmatprep.subr.bf16.mxu1 %v2904_v24  ;;  %v2966_v5 = vld [vmem:[%s4261_s1 + $0x504] ss:$8 sps:$4 sm:$0xff]   ;;  %v2964_v8 = vld [vmem:[%s4261_s1 + $0x500] ss:$8 sps:$4 sm:$0xff]   ;;  %v2970_v13 = vld [vmem:[%s4261_s1 + $0x510] ss:$8 sps:$4 sm:$0xff]  }
  0x19   :  { %1973 = vmatprep.subr.bf16.mxu0 %v2906_v25  ;;  %v2969_v6 = vld [vmem:[%s4261_s1 + $0x104] ss:$8 sps:$4 sm:$0xff]   ;;  %v2967_v10 = vld [vmem:[%s4261_s1 + $0x100] ss:$8 sps:$4 sm:$0xff]   ;;  %v2973_v14 = vld [vmem:[%s4261_s1 + $0x110] ss:$8 sps:$4 sm:$0xff]  }
  0x1a   :  { %v2978_v15 = vld [vmem:[%s4261_s1 + $0x524] ss:$8 sps:$4 sm:$0xff]   ;;  %v2976_v17 = vld [vmem:[%s4261_s1 + $0x520] ss:$8 sps:$4 sm:$0xff]   ;;  %v2984_v19 = vld [vmem:[%s4261_s1 + $0x534] ss:$8 sps:$4 sm:$0xff]  }
  0x1b   :  { %1042 = vmatpush1.bf16.msra.mxu1 %v2908_v26  ;;  %v2981_v16 = vld [vmem:[%s4261_s1 + $0x124] ss:$8 sps:$4 sm:$0xff]   ;;  %v2979_v18 = vld [vmem:[%s4261_s1 + $0x120] ss:$8 sps:$4 sm:$0xff]   ;;  %v2987_v20 = vld [vmem:[%s4261_s1 + $0x134] ss:$8 sps:$4 sm:$0xff]  }
  0x1c   :  { %1974 = vmatpush1.bf16.msra.mxu0 %v2909_v27  ;;  %1043 = vmatprep.subr.bf16.mxu1 %v2910_v28  ;;  %v2982_v21 = vld [vmem:[%s4261_s1 + $0x530] ss:$8 sps:$4 sm:$0xff]   ;;  %v2990_v23 = vld [vmem:[%s4261_s1 + $0x544] ss:$8 sps:$4 sm:$0xff]   ;;  %v2988_v25 = vld [vmem:[%s4261_s1 + $0x540] ss:$8 sps:$4 sm:$0xff]  }
  0x1d   :  { %1975 = vmatprep.subr.bf16.mxu0 %v2912_v29  ;;  %v2985_v22 = vld [vmem:[%s4261_s1 + $0x130] ss:$8 sps:$4 sm:$0xff]   ;;  %v2993_v24 = vld [vmem:[%s4261_s1 + $0x144] ss:$8 sps:$4 sm:$0xff]   ;;  %v2991_v26 = vld [vmem:[%s4261_s1 + $0x140] ss:$8 sps:$4 sm:$0xff]  }
  0x1e   :  { %v2996_v27 = vld [vmem:[%s4261_s1 + $0x554] ss:$8 sps:$4 sm:$0xff]   ;;  %v44_v29 = vld [vmem:[%s4262_s0 + $0x60] sm:$0xff] }
  0x1f   :  { %1044 = vmatpush1.bf16.msra.mxu1 %v2914_v30  ;;  %v2999_v28 = vld [vmem:[%s4261_s1 + $0x154] ss:$8 sps:$4 sm:$0xff]   ;;  %v48_v30 = vld [vmem:[%s4262_s0 + $0x80] sm:$0xff] }
  0x20   :  { %1976 = vmatpush1.bf16.msra.mxu0 %v2915_v31  ;;  %1045 = vmatprep.subr.bf16.mxu1 %v2916_v32  ;;  %v2524_v31 = vcombine.high %v44_v29, %v48_v30  ;;  %v2668_v32 = vcombine.high %v3434_v48, %v44_v29  ;;  %v3017_v51 = vld [vmem:[%s4261_s1 + $0x184] ss:$8 sps:$4 sm:$0xff]   ;;  %v3012_v52 = vld [vmem:[%s4261_s1 + $0x580] ss:$8 sps:$4 sm:$0xff]   ;;  %v3020_v54 = vld [vmem:[%s4261_s1 + $0x594] ss:$8 sps:$4 sm:$0xff]  }
  0x21   :  { %1977 = vmatprep.subr.bf16.mxu0 %v2918_v33  ;;  %v2994_v33 = vld [vmem:[%s4261_s1 + $0x550] ss:$8 sps:$4 sm:$0xff]  }
  0x23   :  { %1046 = vmatpush1.bf16.msra.mxu1 %v2920_v34  ;;  %v2523_v34 = vcombine.low %v44_v29, %v48_v30  ;;  %v3066_v30 = vld [vmem:[%s4261_s1 + $0x610] ss:$8 sps:$4 sm:$0xff]  }
  0x24   :  { %1978 = vmatpush1.bf16.msra.mxu0 %v2921_v35  ;;  %1047 = vmatprep.subr.bf16.mxu1 %v2922_v36  ;;  %v2667_v35 = vcombine.low %v3434_v48, %v44_v29  ;;  %v2997_v36 = vld [vmem:[%s4261_s1 + $0x150] ss:$8 sps:$4 sm:$0xff]  }
  0x25   :  { %1979 = vmatprep.subr.bf16.mxu0 %v2924_v37  ;;  %v3002_v37 = vld [vmem:[%s4261_s1 + $0x564] ss:$8 sps:$4 sm:$0xff]   ;;  %v3006_v48 = vld [vmem:[%s4261_s1 + $0x570] ss:$8 sps:$4 sm:$0xff]  }
  0x27   :  { %1048 = vmatpush1.bf16.msra.mxu1 %v2926_v38  ;;  %v3005_v38 = vld [vmem:[%s4261_s1 + $0x164] ss:$8 sps:$4 sm:$0xff]  }
  0x28   :  { %1980 = vmatpush1.bf16.msra.mxu0 %v2927_v39  ;;  %1049 = vmatprep.subr.bf16.mxu1 %v2928_v40  ;;  %v3000_v39 = vld [vmem:[%s4261_s1 + $0x560] ss:$8 sps:$4 sm:$0xff]  }
  0x29   :  { %1981 = vmatprep.subr.bf16.mxu0 %v2930_v41  ;;  %v3003_v40 = vld [vmem:[%s4261_s1 + $0x160] ss:$8 sps:$4 sm:$0xff]  }
  0x2a   :  { %v3587_v41 = vld [vmem:[%s4262_s0 + $0x28] sm:$0xff] }
  0x2b   :  { %1050 = vmatpush1.bf16.msra.mxu1 %v2932_v42  ;;  %v3592_v42 = vld [vmem:[%s4262_s0 + $0x48] sm:$0xff] }
  0x2c   :  { %1982 = vmatpush1.bf16.msra.mxu0 %v2933_v43  ;;  %1051 = vmatprep.subr.bf16.mxu1 %v2934_v44  ;;  %v3008_v43 = vld [vmem:[%s4261_s1 + $0x574] ss:$8 sps:$4 sm:$0xff]  }
  0x2d   :  { %1983 = vmatprep.subr.bf16.mxu0 %v2936_v45  ;;  %v3011_v44 = vld [vmem:[%s4261_s1 + $0x174] ss:$8 sps:$4 sm:$0xff]   ;;  %v2518_v45 = vcombine.high %v3587_v41, %v3592_v42 }
  0x2f   :  { %1052 = vmatpush1.bf16.msra.mxu1 %v2938_v46  ;;  %v3605_v46 = vld [vmem:[%s4262_s0 + $0x8] sm:$0xff] }
  0x30   :  { %1984 = vmatpush1.bf16.msra.mxu0 %v2939_v49  ;;  %1053 = vmatprep.subr.bf16.mxu1 %v2940_v50  ;;  %v2662_v47 = vcombine.high %v3605_v46, %v3587_v41  ;;  %v3009_v49 = vld [vmem:[%s4261_s1 + $0x170] ss:$8 sps:$4 sm:$0xff]   ;;  %v3014_v50 = vld [vmem:[%s4261_s1 + $0x584] ss:$8 sps:$4 sm:$0xff]  }
  0x31   :  { %1985 = vmatprep.subr.bf16.mxu0 %v2942_v53  ;;  %v3015_v53 = vld [vmem:[%s4261_s1 + $0x180] ss:$8 sps:$4 sm:$0xff]  }
  0x33   :  { %1054 = vmatpush1.bf16.msra.mxu1 %v2944_v55  ;;  %v3023_v55 = vld [vmem:[%s4261_s1 + $0x194] ss:$8 sps:$4 sm:$0xff]  }
  0x34   :  { %1986 = vmatpush1.bf16.msra.mxu0 %v2945_v56  ;;  %1055 = vmatprep.subr.bf16.mxu1 %v2946_v57  ;;  %v3018_v56 = vld [vmem:[%s4261_s1 + $0x590] ss:$8 sps:$4 sm:$0xff]  }
  0x35   :  { %1987 = vmatprep.subr.bf16.mxu0 %v2948_v58  ;;  %v3021_v57 = vld [vmem:[%s4261_s1 + $0x190] ss:$8 sps:$4 sm:$0xff]   ;;  %v3026_v58 = vld [vmem:[%s4261_s1 + $0x5a4] ss:$8 sps:$4 sm:$0xff]  }
  0x37   :  { %1056 = vmatpush1.bf16.msra.mxu1 %v2950_v59  ;;  %v3029_v59 = vld [vmem:[%s4261_s1 + $0x1a4] ss:$8 sps:$4 sm:$0xff]  }
  0x38   :  { %1988 = vmatpush1.bf16.msra.mxu0 %v2951_v60  ;;  %1057 = vmatprep.subr.bf16.mxu1 %v2952_v61  ;;  %v3024_v60 = vld [vmem:[%s4261_s1 + $0x5a0] ss:$8 sps:$4 sm:$0xff]  }
  0x39   :  { %1989 = vmatprep.subr.bf16.mxu0 %v2954_v62  ;;  %v3027_v61 = vld [vmem:[%s4261_s1 + $0x1a0] ss:$8 sps:$4 sm:$0xff]   ;;  %v3032_v62 = vld [vmem:[%s4261_s1 + $0x5b4] ss:$8 sps:$4 sm:$0xff]  }
  0x3b   :  { %1058 = vmatpush1.bf16.msra.mxu1 %v2956_v63  ;;  %v3035_v63 = vld [vmem:[%s4261_s1 + $0x1b4] ss:$8 sps:$4 sm:$0xff]  }
  0x3c   :  { %1990 = vmatpush1.bf16.msra.mxu0 %v2957_v0  ;;  %1059 = vmatprep.subr.bf16.mxu1 %v2958_v1  ;;  %v3030_v0 = vld [vmem:[%s4261_s1 + $0x5b0] ss:$8 sps:$4 sm:$0xff]  }
  0x3d   :  { %1991 = vmatprep.subr.bf16.mxu0 %v2960_v2  ;;  %v3033_v1 = vld [vmem:[%s4261_s1 + $0x1b0] ss:$8 sps:$4 sm:$0xff]   ;;  %v3038_v2 = vld [vmem:[%s4261_s1 + $0x5c4] ss:$8 sps:$4 sm:$0xff]  }
  0x3f   :  { %1060 = vmatpush1.bf16.msra.mxu1 %v2962_v3  ;;  %v3041_v3 = vld [vmem:[%s4261_s1 + $0x1c4] ss:$8 sps:$4 sm:$0xff]  }
  0x40   :  { %1992 = vmatpush1.bf16.msra.mxu0 %v2963_v4  ;;  %1082 = vmatprep.subr.bf16.mxu1 %v2966_v5  ;;  %v3036_v4 = vld [vmem:[%s4261_s1 + $0x5c0] ss:$8 sps:$4 sm:$0xff]  }
  0x41   :  { %2014 = vmatprep.subr.bf16.mxu0 %v2969_v6  ;;  %v3039_v5 = vld [vmem:[%s4261_s1 + $0x1c0] ss:$8 sps:$4 sm:$0xff]   ;;  %v3044_v6 = vld [vmem:[%s4261_s1 + $0x5d4] ss:$8 sps:$4 sm:$0xff]  }
  0x42   :  { %1062 = vmatmul.mubr.bf16.vlgmr.msra.gmra.mrb[0].mxu1 %v2515_v7  ;;  %v3047_v7 = vld [vmem:[%s4261_s1 + $0x1d4] ss:$8 sps:$4 sm:$0xff]  }
  0x43   :  { %1994 = vmatmul.mubr.bf16.vlgmr.msra.gmra.mrb[0].mxu0 %v2659_v9  ;;  %1083 = vmatpush1.bf16.msra.mxu1 %v2964_v8  ;;  %v3042_v8 = vld [vmem:[%s4261_s1 + $0x5d0] ss:$8 sps:$4 sm:$0xff]  }
  0x44   :  { %2015 = vmatpush1.bf16.msra.mxu0 %v2967_v10  ;;  %1084 = vmatprep.subr.bf16.mxu1 %v2972_v11  ;;  %v3045_v9 = vld [vmem:[%s4261_s1 + $0x1d0] ss:$8 sps:$4 sm:$0xff]   ;;  %v3050_v10 = vld [vmem:[%s4261_s1 + $0x5e4] ss:$8 sps:$4 sm:$0xff]  }
  0x45   :  { %2016 = vmatprep.subr.bf16.mxu0 %v2975_v12  ;;  %1071 = vmatprep.mubr.bf16.mxu1 %v2524_v31  ;;  %v3053_v11 = vld [vmem:[%s4261_s1 + $0x1e4] ss:$8 sps:$4 sm:$0xff]   ;;  %v3048_v12 = vld [vmem:[%s4261_s1 + $0x5e0] ss:$8 sps:$4 sm:$0xff]   ;;  %v3069_v31 = vld [vmem:[%s4261_s1 + $0x210] ss:$8 sps:$4 sm:$0xff]  }
  0x46   :  { %2003 = vmatprep.mubr.bf16.mxu0 %v2668_v32  ;;  %v3074_v32 = vld [vmem:[%s4261_s1 + $0x624] ss:$8 sps:$4 sm:$0xff]  }
  0x47   :  { %1085 = vmatpush1.bf16.msra.mxu1 %v2970_v13  ;;  %v3051_v13 = vld [vmem:[%s4261_s1 + $0x1e0] ss:$8 sps:$4 sm:$0xff]  }
  0x48   :  { %2017 = vmatpush1.bf16.msra.mxu0 %v2973_v14  ;;  %1086 = vmatprep.subr.bf16.mxu1 %v2978_v15  ;;  %v3056_v14 = vld [vmem:[%s4261_s1 + $0x5f4] ss:$8 sps:$4 sm:$0xff]  }
  0x49   :  { %2018 = vmatprep.subr.bf16.mxu0 %v2981_v16  ;;  %v3059_v15 = vld [vmem:[%s4261_s1 + $0x1f4] ss:$8 sps:$4 sm:$0xff]   ;;  %v3054_v16 = vld [vmem:[%s4261_s1 + $0x5f0] ss:$8 sps:$4 sm:$0xff]  }
  0x4a   :  { %1072 = vmatmul.mubr.bf16.gmra.mrb[4].mxu1 %v2523_v34  ;;  %v3072_v34 = vld [vmem:[%s4261_s1 + $0x620] ss:$8 sps:$4 sm:$0xff]  }
  0x4b   :  { %1087 = vmatpush1.bf16.msra.mxu1 %v2976_v17  ;;  %2004 = vmatmul.mubr.bf16.gmra.mrb[4].mxu0 %v2667_v35  ;;  %v3057_v17 = vld [vmem:[%s4261_s1 + $0x1f0] ss:$8 sps:$4 sm:$0xff]  }
  0x4c   :  { %2019 = vmatpush1.bf16.msra.mxu0 %v2979_v18  ;;  %1088 = vmatprep.subr.bf16.mxu1 %v2984_v19  ;;  %v3062_v18 = vld [vmem:[%s4261_s1 + $0x604] ss:$8 sps:$4 sm:$0xff]   ;;  %v3758_v35 = vld [vmem:[%s4262_s0 + $0x30] sm:$0xff] }
  0x4d   :  { %2020 = vmatprep.subr.bf16.mxu0 %v2987_v20  ;;  %1114 = vmatprep.mubr.bf16.mxu1 %v2518_v45  ;;  %v3065_v19 = vld [vmem:[%s4261_s1 + $0x204] ss:$8 sps:$4 sm:$0xff]   ;;  %v3078_v45 = vld [vmem:[%s4261_s1 + $0x630] ss:$8 sps:$4 sm:$0xff]  }
  0x4e   :  { %2046 = vmatprep.mubr.bf16.mxu0 %v2662_v47  ;;  %v45_v20 = vld [vmem:[%s4262_s0 + $0x68] sm:$0xff] }
  0x4f   :  { %1089 = vmatpush1.bf16.msra.mxu1 %v2982_v21  ;;  %v2517_v21 = vcombine.low %v3587_v41, %v3592_v42  ;;  %v2670_v29 = vcombine.high %v3592_v42, %v45_v20  ;;  %v3086_v47 = vld [vmem:[%s4261_s1 + $0x644] ss:$8 sps:$4 sm:$0xff]  }
  0x50   :  { %2021 = vmatpush1.bf16.msra.mxu0 %v2985_v22  ;;  %1090 = vmatprep.subr.bf16.mxu1 %v2990_v23  ;;  %v2661_v22 = vcombine.low %v3605_v46, %v3587_v41  ;;  %v49_v23 = vld [vmem:[%s4262_s0 + $0x88] sm:$0xff]  ;;  %v3080_v41 = vld [vmem:[%s4261_s1 + $0x634] ss:$8 sps:$4 sm:$0xff]   ;;  %v3081_v46 = vld [vmem:[%s4261_s1 + $0x230] ss:$8 sps:$4 sm:$0xff]  }
  0x51   :  { %2022 = vmatprep.subr.bf16.mxu0 %v2993_v24  ;;  %v3060_v24 = vld [vmem:[%s4261_s1 + $0x600] ss:$8 sps:$4 sm:$0xff]  }
  0x53   :  { %1091 = vmatpush1.bf16.msra.mxu1 %v2988_v25  ;;  %v3063_v25 = vld [vmem:[%s4261_s1 + $0x200] ss:$8 sps:$4 sm:$0xff]  }
  0x54   :  { %2023 = vmatpush1.bf16.msra.mxu0 %v2991_v26  ;;  %1092 = vmatprep.subr.bf16.mxu1 %v2996_v27  ;;  %v3068_v26 = vld [vmem:[%s4261_s1 + $0x614] ss:$8 sps:$4 sm:$0xff]  }
  0x55   :  { %2024 = vmatprep.subr.bf16.mxu0 %v2999_v28  ;;  %v3071_v27 = vld [vmem:[%s4261_s1 + $0x214] ss:$8 sps:$4 sm:$0xff]   ;;  %v2526_v28 = vcombine.high %v45_v20, %v49_v23 }
  0x57   :  { %1093 = vmatpush1.bf16.msra.mxu1 %v2994_v33  ;;  %v3077_v33 = vld [vmem:[%s4261_s1 + $0x224] ss:$8 sps:$4 sm:$0xff]  }
  0x58   :  { %2025 = vmatpush1.bf16.msra.mxu0 %v2997_v36  ;;  %1094 = vmatprep.subr.bf16.mxu1 %v3002_v37  ;;  %v3763_v36 = vld [vmem:[%s4262_s0 + $0x50] sm:$0xff]  ;;  %v2525_v37 = vcombine.low %v45_v20, %v49_v23  ;;  %v3146_v23 = vld [vmem:[%s4261_s1 + $0x6e4] ss:$8 sps:$4 sm:$0xff]  }
  0x59   :  { %2026 = vmatprep.subr.bf16.mxu0 %v3005_v38  ;;  %v2669_v38 = vcombine.low %v3592_v42, %v45_v20  ;;  %v3083_v42 = vld [vmem:[%s4261_s1 + $0x234] ss:$8 sps:$4 sm:$0xff]  }
  0x5a   :  { %v3143_v20 = vld [vmem:[%s4261_s1 + $0x2d4] ss:$8 sps:$4 sm:$0xff]  }
  0x5b   :  { %1095 = vmatpush1.bf16.msra.mxu1 %v3000_v39  ;;  %v3769_v39 = vld [vmem:[%s4262_s0 + $0x10] sm:$0xff] }
  0x5c   :  { %2027 = vmatpush1.bf16.msra.mxu0 %v3003_v40  ;;  %1096 = vmatprep.subr.bf16.mxu1 %v3008_v43  ;;  %v3075_v40 = vld [vmem:[%s4261_s1 + $0x220] ss:$8 sps:$4 sm:$0xff]   ;;  %v2520_v43 = vcombine.high %v3758_v35, %v3763_v36 }
  0x5d   :  { %2028 = vmatprep.subr.bf16.mxu0 %v3011_v44  ;;  %v2664_v44 = vcombine.high %v3769_v39, %v3758_v35 }
  0x5f   :  { %1097 = vmatpush1.bf16.msra.mxu1 %v3006_v48  ;;  %v3089_v48 = vld [vmem:[%s4261_s1 + $0x244] ss:$8 sps:$4 sm:$0xff]  }
  0x60   :  { %2029 = vmatpush1.bf16.msra.mxu0 %v3009_v49  ;;  %1098 = vmatprep.subr.bf16.mxu1 %v3014_v50  ;;  %v3084_v49 = vld [vmem:[%s4261_s1 + $0x640] ss:$8 sps:$4 sm:$0xff]  }
  0x61   :  { %2030 = vmatprep.subr.bf16.mxu0 %v3017_v51  ;;  %v3087_v50 = vld [vmem:[%s4261_s1 + $0x240] ss:$8 sps:$4 sm:$0xff]   ;;  %v3092_v51 = vld [vmem:[%s4261_s1 + $0x654] ss:$8 sps:$4 sm:$0xff]  }
  0x63   :  { %1099 = vmatpush1.bf16.msra.mxu1 %v3012_v52  ;;  %v3095_v52 = vld [vmem:[%s4261_s1 + $0x254] ss:$8 sps:$4 sm:$0xff]  }
  0x64   :  { %2031 = vmatpush1.bf16.msra.mxu0 %v3015_v53  ;;  %1100 = vmatprep.subr.bf16.mxu1 %v3020_v54  ;;  %v3090_v53 = vld [vmem:[%s4261_s1 + $0x650] ss:$8 sps:$4 sm:$0xff]  }
  0x65   :  { %2032 = vmatprep.subr.bf16.mxu0 %v3023_v55  ;;  %v3093_v54 = vld [vmem:[%s4261_s1 + $0x250] ss:$8 sps:$4 sm:$0xff]   ;;  %v3098_v55 = vld [vmem:[%s4261_s1 + $0x664] ss:$8 sps:$4 sm:$0xff]  }
  0x67   :  { %1101 = vmatpush1.bf16.msra.mxu1 %v3018_v56  ;;  %v3101_v56 = vld [vmem:[%s4261_s1 + $0x264] ss:$8 sps:$4 sm:$0xff]  }
  0x68   :  { %2033 = vmatpush1.bf16.msra.mxu0 %v3021_v57  ;;  %1102 = vmatprep.subr.bf16.mxu1 %v3026_v58  ;;  %v3096_v57 = vld [vmem:[%s4261_s1 + $0x660] ss:$8 sps:$4 sm:$0xff]  }
  0x69   :  { %2034 = vmatprep.subr.bf16.mxu0 %v3029_v59  ;;  %v3099_v58 = vld [vmem:[%s4261_s1 + $0x260] ss:$8 sps:$4 sm:$0xff]   ;;  %v3104_v59 = vld [vmem:[%s4261_s1 + $0x674] ss:$8 sps:$4 sm:$0xff]  }
  0x6b   :  { %1103 = vmatpush1.bf16.msra.mxu1 %v3024_v60  ;;  %v3107_v60 = vld [vmem:[%s4261_s1 + $0x274] ss:$8 sps:$4 sm:$0xff]  }
  0x6c   :  { %2035 = vmatpush1.bf16.msra.mxu0 %v3027_v61  ;;  %1104 = vmatprep.subr.bf16.mxu1 %v3032_v62  ;;  %v3102_v61 = vld [vmem:[%s4261_s1 + $0x670] ss:$8 sps:$4 sm:$0xff]  }
  0x6d   :  { %2036 = vmatprep.subr.bf16.mxu0 %v3035_v63  ;;  %v3105_v62 = vld [vmem:[%s4261_s1 + $0x270] ss:$8 sps:$4 sm:$0xff]   ;;  %v3110_v63 = vld [vmem:[%s4261_s1 + $0x684] ss:$8 sps:$4 sm:$0xff]  }
  0x6f   :  { %1105 = vmatpush1.bf16.msra.mxu1 %v3030_v0  ;;  %v3113_v0 = vld [vmem:[%s4261_s1 + $0x284] ss:$8 sps:$4 sm:$0xff]  }
  0x70   :  { %2037 = vmatpush1.bf16.msra.mxu0 %v3033_v1  ;;  %1106 = vmatprep.subr.bf16.mxu1 %v3038_v2  ;;  %v3108_v1 = vld [vmem:[%s4261_s1 + $0x680] ss:$8 sps:$4 sm:$0xff]  }
  0x71   :  { %2038 = vmatprep.subr.bf16.mxu0 %v3041_v3  ;;  %v3111_v2 = vld [vmem:[%s4261_s1 + $0x280] ss:$8 sps:$4 sm:$0xff]   ;;  %v3116_v3 = vld [vmem:[%s4261_s1 + $0x694] ss:$8 sps:$4 sm:$0xff]  }
  0x73   :  { %1107 = vmatpush1.bf16.msra.mxu1 %v3036_v4  ;;  %v3119_v4 = vld [vmem:[%s4261_s1 + $0x294] ss:$8 sps:$4 sm:$0xff]  }
  0x74   :  { %2039 = vmatpush1.bf16.msra.mxu0 %v3039_v5  ;;  %1108 = vmatprep.subr.bf16.mxu1 %v3044_v6  ;;  %v3114_v5 = vld [vmem:[%s4261_s1 + $0x690] ss:$8 sps:$4 sm:$0xff]  }
  0x75   :  { %2040 = vmatprep.subr.bf16.mxu0 %v3047_v7  ;;  %v3117_v6 = vld [vmem:[%s4261_s1 + $0x290] ss:$8 sps:$4 sm:$0xff]   ;;  %v3122_v7 = vld [vmem:[%s4261_s1 + $0x6a4] ss:$8 sps:$4 sm:$0xff]  }
  0x77   :  { %1109 = vmatpush1.bf16.msra.mxu1 %v3042_v8  ;;  %v3125_v8 = vld [vmem:[%s4261_s1 + $0x2a4] ss:$8 sps:$4 sm:$0xff]  }
  0x78   :  { %2041 = vmatpush1.bf16.msra.mxu0 %v3045_v9  ;;  %1110 = vmatprep.subr.bf16.mxu1 %v3050_v10  ;;  %v3120_v9 = vld [vmem:[%s4261_s1 + $0x6a0] ss:$8 sps:$4 sm:$0xff]  }
  0x79   :  { %2042 = vmatprep.subr.bf16.mxu0 %v3053_v11  ;;  %v3123_v10 = vld [vmem:[%s4261_s1 + $0x2a0] ss:$8 sps:$4 sm:$0xff]   ;;  %v3128_v11 = vld [vmem:[%s4261_s1 + $0x6b4] ss:$8 sps:$4 sm:$0xff]  }
  0x7b   :  { %1111 = vmatpush1.bf16.msra.mxu1 %v3048_v12  ;;  %v3131_v12 = vld [vmem:[%s4261_s1 + $0x2b4] ss:$8 sps:$4 sm:$0xff]  }
  0x7c   :  { %2043 = vmatpush1.bf16.msra.mxu0 %v3051_v13  ;;  %1112 = vmatprep.subr.bf16.mxu1 %v3056_v14  ;;  %v3126_v13 = vld [vmem:[%s4261_s1 + $0x6b0] ss:$8 sps:$4 sm:$0xff]  }
  0x7d   :  { %2044 = vmatprep.subr.bf16.mxu0 %v3059_v15  ;;  %v3129_v14 = vld [vmem:[%s4261_s1 + $0x2b0] ss:$8 sps:$4 sm:$0xff]   ;;  %v3134_v15 = vld [vmem:[%s4261_s1 + $0x6c4] ss:$8 sps:$4 sm:$0xff]  }
  0x7f   :  { %1113 = vmatpush1.bf16.msra.mxu1 %v3054_v16  ;;  %v3137_v16 = vld [vmem:[%s4261_s1 + $0x2c4] ss:$8 sps:$4 sm:$0xff]  }
  0x80   :  { %2045 = vmatpush1.bf16.msra.mxu0 %v3057_v17  ;;  %1135 = vmatprep.subr.bf16.mxu1 %v3062_v18  ;;  %v3132_v17 = vld [vmem:[%s4261_s1 + $0x6c0] ss:$8 sps:$4 sm:$0xff]  }
  0x81   :  { %2067 = vmatprep.subr.bf16.mxu0 %v3065_v19  ;;  %v3135_v18 = vld [vmem:[%s4261_s1 + $0x2c0] ss:$8 sps:$4 sm:$0xff]   ;;  %v3140_v19 = vld [vmem:[%s4261_s1 + $0x6d4] ss:$8 sps:$4 sm:$0xff]  }
  0x82   :  { %1115 = vmatmul.mubr.bf16.vlgmr.msra.gmra.mrb[0].mxu1 %v2517_v21  ;;  %v3138_v21 = vld [vmem:[%s4261_s1 + $0x6d0] ss:$8 sps:$4 sm:$0xff]  }
  0x83   :  { %2047 = vmatmul.mubr.bf16.vlgmr.msra.gmra.mrb[0].mxu0 %v2661_v22  ;;  %1136 = vmatpush1.bf16.msra.mxu1 %v3060_v24  ;;  %v3141_v22 = vld [vmem:[%s4261_s1 + $0x2d0] ss:$8 sps:$4 sm:$0xff]   ;;  %v3149_v24 = vld [vmem:[%s4261_s1 + $0x2e4] ss:$8 sps:$4 sm:$0xff]  }
  0x84   :  { %2068 = vmatpush1.bf16.msra.mxu0 %v3063_v25  ;;  %1137 = vmatprep.subr.bf16.mxu1 %v3068_v26  ;;  %v3144_v25 = vld [vmem:[%s4261_s1 + $0x6e0] ss:$8 sps:$4 sm:$0xff]  }
  0x85   :  { %2069 = vmatprep.subr.bf16.mxu0 %v3071_v27  ;;  %1124 = vmatprep.mubr.bf16.mxu1 %v2526_v28  ;;  %v3147_v26 = vld [vmem:[%s4261_s1 + $0x2e0] ss:$8 sps:$4 sm:$0xff]   ;;  %v3152_v27 = vld [vmem:[%s4261_s1 + $0x6f4] ss:$8 sps:$4 sm:$0xff]  }
  0x86   :  { %2056 = vmatprep.mubr.bf16.mxu0 %v2670_v29  ;;  %v3155_v28 = vld [vmem:[%s4261_s1 + $0x2f4] ss:$8 sps:$4 sm:$0xff]   ;;  %v3150_v29 = vld [vmem:[%s4261_s1 + $0x6f0] ss:$8 sps:$4 sm:$0xff]  }
  0x87   :  { %1138 = vmatpush1.bf16.msra.mxu1 %v3066_v30  ;;  %v3153_v30 = vld [vmem:[%s4261_s1 + $0x2f0] ss:$8 sps:$4 sm:$0xff]  }
  0x88   :  { %2070 = vmatpush1.bf16.msra.mxu0 %v3069_v31  ;;  %1139 = vmatprep.subr.bf16.mxu1 %v3074_v32  ;;  %v3158_v31 = vld [vmem:[%s4261_s1 + $0x704] ss:$8 sps:$4 sm:$0xff]  }
  0x89   :  { %2071 = vmatprep.subr.bf16.mxu0 %v3077_v33  ;;  %v3161_v32 = vld [vmem:[%s4261_s1 + $0x304] ss:$8 sps:$4 sm:$0xff]   ;;  %v2519_v33 = vcombine.low %v3758_v35, %v3763_v36 }
  0x8a   :  { %1125 = vmatmul.mubr.bf16.gmra.mrb[4].mxu1 %v2525_v37  ;;  %v46_v37 = vld [vmem:[%s4262_s0 + $0x70] sm:$0xff] }
  0x8b   :  { %2057 = vmatmul.mubr.bf16.gmra.mrb[4].mxu0 %v2669_v38  ;;  %1140 = vmatpush1.bf16.msra.mxu1 %v3072_v34  ;;  %v2663_v34 = vcombine.low %v3769_v39, %v3758_v35  ;;  %v50_v38 = vld [vmem:[%s4262_s0 + $0x90] sm:$0xff] }
  0x8c   :  { %2072 = vmatpush1.bf16.msra.mxu0 %v3075_v40  ;;  %1141 = vmatprep.subr.bf16.mxu1 %v3080_v41  ;;  %v3156_v40 = vld [vmem:[%s4261_s1 + $0x700] ss:$8 sps:$4 sm:$0xff]   ;;  %v3164_v35 = vld [vmem:[%s4261_s1 + $0x714] ss:$8 sps:$4 sm:$0xff]  }
  0x8d   :  { %2073 = vmatprep.subr.bf16.mxu0 %v3083_v42  ;;  %1167 = vmatprep.mubr.bf16.mxu1 %v2520_v43  ;;  %v3159_v41 = vld [vmem:[%s4261_s1 + $0x300] ss:$8 sps:$4 sm:$0xff]   ;;  %v3167_v39 = vld [vmem:[%s4261_s1 + $0x314] ss:$8 sps:$4 sm:$0xff]   ;;  %v2528_v42 = vcombine.high %v46_v37, %v50_v38  ;;  %v2672_v43 = vcombine.high %v3763_v36, %v46_v37 }
  0x8e   :  { %2099 = vmatprep.mubr.bf16.mxu0 %v2664_v44  ;;  %v3162_v44 = vld [vmem:[%s4261_s1 + $0x710] ss:$8 sps:$4 sm:$0xff]  }
  0x8f   :  { %1142 = vmatpush1.bf16.msra.mxu1 %v3078_v45  ;;  %v3165_v45 = vld [vmem:[%s4261_s1 + $0x310] ss:$8 sps:$4 sm:$0xff]  }
  0x90   :  { %2074 = vmatpush1.bf16.msra.mxu0 %v3081_v46  ;;  %1143 = vmatprep.subr.bf16.mxu1 %v3086_v47  ;;  %v3170_v46 = vld [vmem:[%s4261_s1 + $0x724] ss:$8 sps:$4 sm:$0xff]  }
  0x91   :  { %2075 = vmatprep.subr.bf16.mxu0 %v3089_v48  ;;  %v3173_v47 = vld [vmem:[%s4261_s1 + $0x324] ss:$8 sps:$4 sm:$0xff]   ;;  %v2527_v48 = vcombine.low %v46_v37, %v50_v38 }
  0x92   :  { %v3242_v38 = vld [vmem:[%s4261_s1 + $0x7e4] ss:$8 sps:$4 sm:$0xff]  }
  0x93   :  { %1144 = vmatpush1.bf16.msra.mxu1 %v3084_v49  ;;  %v2671_v49 = vcombine.low %v3763_v36, %v46_v37  ;;  %v3168_v36 = vld [vmem:[%s4261_s1 + $0x720] ss:$8 sps:$4 sm:$0xff]   ;;  %v3237_v37 = vld [vmem:[%s4261_s1 + $0x3d0] ss:$8 sps:$4 sm:$0xff]  }
  0x94   :  { %2076 = vmatpush1.bf16.msra.mxu0 %v3087_v50  ;;  %1145 = vmatprep.subr.bf16.mxu1 %v3092_v51  ;;  %v3979_v50 = vld [vmem:[%s4262_s0 + $0x38] sm:$0xff] }
  0x95   :  { %2077 = vmatprep.subr.bf16.mxu0 %v3095_v52  ;;  %v3984_v51 = vld [vmem:[%s4262_s0 + $0x58] sm:$0xff] }
  0x96   :  { %v3989_v52 = vld [vmem:[%s4262_s0 + $0x18] sm:$0xff] }
  0x97   :  { %1146 = vmatpush1.bf16.msra.mxu1 %v3090_v53  ;;  %v3171_v53 = vld [vmem:[%s4261_s1 + $0x320] ss:$8 sps:$4 sm:$0xff]  }
  0x98   :  { %2078 = vmatpush1.bf16.msra.mxu0 %v3093_v54  ;;  %1147 = vmatprep.subr.bf16.mxu1 %v3098_v55  ;;  %v3176_v54 = vld [vmem:[%s4261_s1 + $0x734] ss:$8 sps:$4 sm:$0xff]  }
  0x99   :  { %2079 = vmatprep.subr.bf16.mxu0 %v3101_v56  ;;  %v3179_v55 = vld [vmem:[%s4261_s1 + $0x334] ss:$8 sps:$4 sm:$0xff]   ;;  %v2522_v56 = vcombine.high %v3979_v50, %v3984_v51 }
  0x9b   :  { %1148 = vmatpush1.bf16.msra.mxu1 %v3096_v57  ;;  %v2666_v57 = vcombine.high %v3989_v52, %v3979_v50 }
  0x9c   :  { %2080 = vmatpush1.bf16.msra.mxu0 %v3099_v58  ;;  %1149 = vmatprep.subr.bf16.mxu1 %v3104_v59  ;;  %v3174_v58 = vld [vmem:[%s4261_s1 + $0x730] ss:$8 sps:$4 sm:$0xff]  }
  0x9d   :  { %2081 = vmatprep.subr.bf16.mxu0 %v3107_v60  ;;  %v3177_v59 = vld [vmem:[%s4261_s1 + $0x330] ss:$8 sps:$4 sm:$0xff]   ;;  %v3182_v60 = vld [vmem:[%s4261_s1 + $0x744] ss:$8 sps:$4 sm:$0xff]  }
  0x9f   :  { %1150 = vmatpush1.bf16.msra.mxu1 %v3102_v61  ;;  %v3185_v61 = vld [vmem:[%s4261_s1 + $0x344] ss:$8 sps:$4 sm:$0xff]  }
  0xa0   :  { %2082 = vmatpush1.bf16.msra.mxu0 %v3105_v62  ;;  %1151 = vmatprep.subr.bf16.mxu1 %v3110_v63  ;;  %v3180_v62 = vld [vmem:[%s4261_s1 + $0x740] ss:$8 sps:$4 sm:$0xff]  }
  0xa1   :  { %2083 = vmatprep.subr.bf16.mxu0 %v3113_v0  ;;  %v3183_v63 = vld [vmem:[%s4261_s1 + $0x340] ss:$8 sps:$4 sm:$0xff]   ;;  %v3188_v0 = vld [vmem:[%s4261_s1 + $0x754] ss:$8 sps:$4 sm:$0xff]  }
  0xa3   :  { %1152 = vmatpush1.bf16.msra.mxu1 %v3108_v1  ;;  %v3191_v1 = vld [vmem:[%s4261_s1 + $0x354] ss:$8 sps:$4 sm:$0xff]  }
  0xa4   :  { %2084 = vmatpush1.bf16.msra.mxu0 %v3111_v2  ;;  %1153 = vmatprep.subr.bf16.mxu1 %v3116_v3  ;;  %v3186_v2 = vld [vmem:[%s4261_s1 + $0x750] ss:$8 sps:$4 sm:$0xff]  }
  0xa5   :  { %2085 = vmatprep.subr.bf16.mxu0 %v3119_v4  ;;  %v3189_v3 = vld [vmem:[%s4261_s1 + $0x350] ss:$8 sps:$4 sm:$0xff]   ;;  %v3194_v4 = vld [vmem:[%s4261_s1 + $0x764] ss:$8 sps:$4 sm:$0xff]  }
  0xa7   :  { %1154 = vmatpush1.bf16.msra.mxu1 %v3114_v5  ;;  %v3197_v5 = vld [vmem:[%s4261_s1 + $0x364] ss:$8 sps:$4 sm:$0xff]  }
  0xa8   :  { %2086 = vmatpush1.bf16.msra.mxu0 %v3117_v6  ;;  %1155 = vmatprep.subr.bf16.mxu1 %v3122_v7  ;;  %v3192_v6 = vld [vmem:[%s4261_s1 + $0x760] ss:$8 sps:$4 sm:$0xff]  }
  0xa9   :  { %2087 = vmatprep.subr.bf16.mxu0 %v3125_v8  ;;  %v3195_v7 = vld [vmem:[%s4261_s1 + $0x360] ss:$8 sps:$4 sm:$0xff]   ;;  %v3200_v8 = vld [vmem:[%s4261_s1 + $0x774] ss:$8 sps:$4 sm:$0xff]  }
  0xab   :  { %1156 = vmatpush1.bf16.msra.mxu1 %v3120_v9  ;;  %v3203_v9 = vld [vmem:[%s4261_s1 + $0x374] ss:$8 sps:$4 sm:$0xff]  }
  0xac   :  { %2088 = vmatpush1.bf16.msra.mxu0 %v3123_v10  ;;  %1157 = vmatprep.subr.bf16.mxu1 %v3128_v11  ;;  %v3198_v10 = vld [vmem:[%s4261_s1 + $0x770] ss:$8 sps:$4 sm:$0xff]  }
  0xad   :  { %2089 = vmatprep.subr.bf16.mxu0 %v3131_v12  ;;  %v3201_v11 = vld [vmem:[%s4261_s1 + $0x370] ss:$8 sps:$4 sm:$0xff]   ;;  %v3206_v12 = vld [vmem:[%s4261_s1 + $0x784] ss:$8 sps:$4 sm:$0xff]  }
  0xaf   :  { %1158 = vmatpush1.bf16.msra.mxu1 %v3126_v13  ;;  %v3209_v13 = vld [vmem:[%s4261_s1 + $0x384] ss:$8 sps:$4 sm:$0xff]  }
  0xb0   :  { %2090 = vmatpush1.bf16.msra.mxu0 %v3129_v14  ;;  %1159 = vmatprep.subr.bf16.mxu1 %v3134_v15  ;;  %v3204_v14 = vld [vmem:[%s4261_s1 + $0x780] ss:$8 sps:$4 sm:$0xff]  }
  0xb1   :  { %2091 = vmatprep.subr.bf16.mxu0 %v3137_v16  ;;  %v3207_v15 = vld [vmem:[%s4261_s1 + $0x380] ss:$8 sps:$4 sm:$0xff]   ;;  %v3212_v16 = vld [vmem:[%s4261_s1 + $0x794] ss:$8 sps:$4 sm:$0xff]  }
  0xb3   :  { %1160 = vmatpush1.bf16.msra.mxu1 %v3132_v17  ;;  %v3215_v17 = vld [vmem:[%s4261_s1 + $0x394] ss:$8 sps:$4 sm:$0xff]  }
  0xb4   :  { %2092 = vmatpush1.bf16.msra.mxu0 %v3135_v18  ;;  %1161 = vmatprep.subr.bf16.mxu1 %v3140_v19  ;;  %v3210_v18 = vld [vmem:[%s4261_s1 + $0x790] ss:$8 sps:$4 sm:$0xff]  }
  0xb5   :  { %2093 = vmatprep.subr.bf16.mxu0 %v3143_v20  ;;  %v3213_v19 = vld [vmem:[%s4261_s1 + $0x390] ss:$8 sps:$4 sm:$0xff]   ;;  %v3218_v20 = vld [vmem:[%s4261_s1 + $0x7a4] ss:$8 sps:$4 sm:$0xff]  }
  0xb7   :  { %1162 = vmatpush1.bf16.msra.mxu1 %v3138_v21  ;;  %v3221_v21 = vld [vmem:[%s4261_s1 + $0x3a4] ss:$8 sps:$4 sm:$0xff]  }
  0xb8   :  { %2094 = vmatpush1.bf16.msra.mxu0 %v3141_v22  ;;  %1163 = vmatprep.subr.bf16.mxu1 %v3146_v23  ;;  %v3216_v22 = vld [vmem:[%s4261_s1 + $0x7a0] ss:$8 sps:$4 sm:$0xff]  }
  0xb9   :  { %2095 = vmatprep.subr.bf16.mxu0 %v3149_v24  ;;  %v3219_v23 = vld [vmem:[%s4261_s1 + $0x3a0] ss:$8 sps:$4 sm:$0xff]   ;;  %v3224_v24 = vld [vmem:[%s4261_s1 + $0x7b4] ss:$8 sps:$4 sm:$0xff]  }
  0xbb   :  { %1164 = vmatpush1.bf16.msra.mxu1 %v3144_v25  ;;  %v3227_v25 = vld [vmem:[%s4261_s1 + $0x3b4] ss:$8 sps:$4 sm:$0xff]  }
  0xbc   :  { %2096 = vmatpush1.bf16.msra.mxu0 %v3147_v26  ;;  %1165 = vmatprep.subr.bf16.mxu1 %v3152_v27  ;;  %v3222_v26 = vld [vmem:[%s4261_s1 + $0x7b0] ss:$8 sps:$4 sm:$0xff]  }
  0xbd   :  { %2097 = vmatprep.subr.bf16.mxu0 %v3155_v28  ;;  %v3225_v27 = vld [vmem:[%s4261_s1 + $0x3b0] ss:$8 sps:$4 sm:$0xff]   ;;  %v3230_v28 = vld [vmem:[%s4261_s1 + $0x7c4] ss:$8 sps:$4 sm:$0xff]  }
  0xbf   :  { %1166 = vmatpush1.bf16.msra.mxu1 %v3150_v29  ;;  %v3233_v29 = vld [vmem:[%s4261_s1 + $0x3c4] ss:$8 sps:$4 sm:$0xff]  }
  0xc0   :  { %2098 = vmatpush1.bf16.msra.mxu0 %v3153_v30  ;;  %1188 = vmatprep.subr.bf16.mxu1 %v3158_v31  ;;  %v3228_v30 = vld [vmem:[%s4261_s1 + $0x7c0] ss:$8 sps:$4 sm:$0xff]  }
  0xc1   :  { %2120 = vmatprep.subr.bf16.mxu0 %v3161_v32  ;;  %v3231_v31 = vld [vmem:[%s4261_s1 + $0x3c0] ss:$8 sps:$4 sm:$0xff]   ;;  %v3236_v32 = vld [vmem:[%s4261_s1 + $0x7d4] ss:$8 sps:$4 sm:$0xff]  }
  0xc2   :  { %1168 = vmatmul.mubr.bf16.vlgmr.msra.gmra.mrb[0].mxu1 %v2519_v33  ;;  %v3239_v33 = vld [vmem:[%s4261_s1 + $0x3d4] ss:$8 sps:$4 sm:$0xff]  }
  0xc3   :  { %2100 = vmatmul.mubr.bf16.vlgmr.msra.gmra.mrb[0].mxu0 %v2663_v34  ;;  %1189 = vmatpush1.bf16.msra.mxu1 %v3156_v40  ;;  %v3234_v34 = vld [vmem:[%s4261_s1 + $0x7d0] ss:$8 sps:$4 sm:$0xff]   ;;  %v3245_v40 = vld [vmem:[%s4261_s1 + $0x3e4] ss:$8 sps:$4 sm:$0xff]  }
  0xc4   :  { %2121 = vmatpush1.bf16.msra.mxu0 %v3159_v41  ;;  %1190 = vmatprep.subr.bf16.mxu1 %v3164_v35  ;;  %v3240_v41 = vld [vmem:[%s4261_s1 + $0x7e0] ss:$8 sps:$4 sm:$0xff]  }
  0xc5   :  { %2122 = vmatprep.subr.bf16.mxu0 %v3167_v39  ;;  %1177 = vmatprep.mubr.bf16.mxu1 %v2528_v42  ;;  %v3243_v35 = vld [vmem:[%s4261_s1 + $0x3e0] ss:$8 sps:$4 sm:$0xff]   ;;  %v3248_v39 = vld [vmem:[%s4261_s1 + $0x7f4] ss:$8 sps:$4 sm:$0xff]  }
  0xc6   :  { %2109 = vmatprep.mubr.bf16.mxu0 %v2672_v43  ;;  %v3251_v42 = vld [vmem:[%s4261_s1 + $0x3f4] ss:$8 sps:$4 sm:$0xff]   ;;  %v3246_v43 = vld [vmem:[%s4261_s1 + $0x7f0] ss:$8 sps:$4 sm:$0xff]  }
  0xc7   :  { %1191 = vmatpush1.bf16.msra.mxu1 %v3162_v44  ;;  %v3249_v44 = vld [vmem:[%s4261_s1 + $0x3f0] ss:$8 sps:$4 sm:$0xff]  }
  0xc8   :  { %2123 = vmatpush1.bf16.msra.mxu0 %v3165_v45  ;;  %1192 = vmatprep.subr.bf16.mxu1 %v3170_v46  ;;  %v47_v45 = vld [vmem:[%s4262_s0 + $0x78] sm:$0xff] }
  0xc9   :  { %2124 = vmatprep.subr.bf16.mxu0 %v3173_v47  ;;  %v51_v46 = vld [vmem:[%s4262_s0 + $0x98] sm:$0xff]  ;;  %v2521_v47 = vcombine.low %v3979_v50, %v3984_v51 }
  0xca   :  { %1178 = vmatmul.mubr.bf16.gmra.mrb[4].mxu1 %v2527_v48  ;;  %v2665_v48 = vcombine.low %v3989_v52, %v3979_v50  ;;  %v2173_v50 = vld [vmem:[%s4263_s2] sm:$0x3] }
  0xcb   :  { %2110 = vmatmul.mubr.bf16.gmra.mrb[4].mxu0 %v2671_v49  ;;  %1193 = vmatpush1.bf16.msra.mxu1 %v3168_v36  ;;  %v2530_v49 = vcombine.high %v47_v45, %v51_v46  ;;  %v2674_v36 = vcombine.high %v3984_v51, %v47_v45 }
  0xcc   :  { %2125 = vmatpush1.bf16.msra.mxu0 %v3171_v53  ;;  %1194 = vmatprep.subr.bf16.mxu1 %v3176_v54  ;;  %v2529_v53 = vcombine.low %v47_v45, %v51_v46  ;;  %v2673_v54 = vcombine.low %v3984_v51, %v47_v45 }
  0xcd   :  { %2126 = vmatprep.subr.bf16.mxu0 %v3179_v55  ;;  %1220 = vmatprep.mubr.bf16.mxu1 %v2522_v56  ;;  %v2175_v55 = vlaneseq }
  0xce   :  { %2152 = vmatprep.mubr.bf16.mxu0 %v2666_v57 }
  0xcf   :  { %1195 = vmatpush1.bf16.msra.mxu1 %v3174_v58  ;;  %v4169_v56 = vshrl.u32 %v2175_v55, 7 }
  0xd0   :  { %2127 = vmatpush1.bf16.msra.mxu0 %v3177_v59  ;;  %1196 = vmatprep.subr.bf16.mxu1 %v3182_v60 }
  0xd1   :  { %2128 = vmatprep.subr.bf16.mxu0 %v3185_v61  ;;  %v4172_v57 = vsub.s32 0, %v4169_v56  ;;  %v4178_v52 = vsub.s32 1, %v4169_v56 }
  0xd3   :  { %1197 = vmatpush1.bf16.msra.mxu1 %v3180_v62  ;;  %v2178_v58 = vrot.slane %v2173_v50, %v4172_v57  ;;  %v2182_v51 = vrot.slane %v2173_v50, %v4178_v52 }
  0xd4   :  { %2129 = vmatpush1.bf16.msra.mxu0 %v3183_v63  ;;  %1198 = vmatprep.subr.bf16.mxu1 %v3188_v0 }
  0xd5   :  { %2130 = vmatprep.subr.bf16.mxu0 %v3191_v1 }
  0xd7   :  { %1199 = vmatpush1.bf16.msra.mxu1 %v3186_v2 }
  0xd8   :  { %2131 = vmatpush1.bf16.msra.mxu0 %v3189_v3  ;;  %1200 = vmatprep.subr.bf16.mxu1 %v3194_v4 }
  0xd9   :  { %2132 = vmatprep.subr.bf16.mxu0 %v3197_v5 }
  0xdb   :  { %1201 = vmatpush1.bf16.msra.mxu1 %v3192_v6 }
  0xdc   :  { %2133 = vmatpush1.bf16.msra.mxu0 %v3195_v7  ;;  %1202 = vmatprep.subr.bf16.mxu1 %v3200_v8 }
  0xdd   :  { %2134 = vmatprep.subr.bf16.mxu0 %v3203_v9 }
  0xdf   :  { %1203 = vmatpush1.bf16.msra.mxu1 %v3198_v10 }
  0xe0   :  { %2135 = vmatpush1.bf16.msra.mxu0 %v3201_v11  ;;  %1204 = vmatprep.subr.bf16.mxu1 %v3206_v12 }
  0xe1   :  { %2136 = vmatprep.subr.bf16.mxu0 %v3209_v13 }
  0xe3   :  { %1205 = vmatpush1.bf16.msra.mxu1 %v3204_v14 }
  0xe4   :  { %2137 = vmatpush1.bf16.msra.mxu0 %v3207_v15  ;;  %1206 = vmatprep.subr.bf16.mxu1 %v3212_v16 }
  0xe5   :  { %2138 = vmatprep.subr.bf16.mxu0 %v3215_v17 }
  0xe7   :  { %1207 = vmatpush1.bf16.msra.mxu1 %v3210_v18 }
  0xe8   :  { %2139 = vmatpush1.bf16.msra.mxu0 %v3213_v19  ;;  %1208 = vmatprep.subr.bf16.mxu1 %v3218_v20 }
  0xe9   :  { %2140 = vmatprep.subr.bf16.mxu0 %v3221_v21 }
  0xeb   :  { %1209 = vmatpush1.bf16.msra.mxu1 %v3216_v22 }
  0xec   :  { %2141 = vmatpush1.bf16.msra.mxu0 %v3219_v23  ;;  %1210 = vmatprep.subr.bf16.mxu1 %v3224_v24 }
  0xed   :  { %2142 = vmatprep.subr.bf16.mxu0 %v3227_v25 }
  0xef   :  { %1211 = vmatpush1.bf16.msra.mxu1 %v3222_v26 }
  0xf0   :  { %2143 = vmatpush1.bf16.msra.mxu0 %v3225_v27  ;;  %1212 = vmatprep.subr.bf16.mxu1 %v3230_v28 }
  0xf1   :  { %2144 = vmatprep.subr.bf16.mxu0 %v3233_v29 }
  0xf3   :  { %1213 = vmatpush1.bf16.msra.mxu1 %v3228_v30 }
  0xf4   :  { %2145 = vmatpush1.bf16.msra.mxu0 %v3231_v31  ;;  %1214 = vmatprep.subr.bf16.mxu1 %v3236_v32 }
  0xf5   :  { %2146 = vmatprep.subr.bf16.mxu0 %v3239_v33 }
  0xf7   :  { %1215 = vmatpush1.bf16.msra.mxu1 %v3234_v34 }
  0xf8   :  { %2147 = vmatpush1.bf16.msra.mxu0 %v3237_v37  ;;  %1216 = vmatprep.subr.bf16.mxu1 %v3242_v38 }
  0xf9   :  { %2148 = vmatprep.subr.bf16.mxu0 %v3245_v40 }
  0xfb   :  { %1217 = vmatpush1.bf16.msra.mxu1 %v3240_v41 }
  0xfc   :  { %2149 = vmatpush1.bf16.msra.mxu0 %v3243_v35  ;;  %1218 = vmatprep.subr.bf16.mxu1 %v3248_v39 }
  0xfd   :  { %2150 = vmatprep.subr.bf16.mxu0 %v3251_v42 }
  0xff   :  { %1219 = vmatpush1.bf16.msra.mxu1 %v3246_v43 }
 0x100   :  { %2151 = vmatpush1.bf16.msra.mxu0 %v3249_v44 }
 0x102   :  { %1221 = vmatmul.mubr.bf16.vlgmr.msra.gmra.mrb[0].mxu1 %v2521_v47 }
 0x103   :  { %2153 = vmatmul.mubr.bf16.vlgmr.msra.gmra.mrb[0].mxu0 %v2665_v48  ;;  %1230 = vmatprep.mubr.bf16.mxu1 %v2530_v49 }
 0x104   :  { %2162 = vmatprep.mubr.bf16.mxu0 %v2674_v36 }
 0x10a   :  { %1231 = vmatmul.mubr.bf16.gmra.mrb[4].mxu1 %v2529_v53 }
 0x10b   :  { %2163 = vmatmul.mubr.bf16.gmra.mrb[4].mxu0 %v2673_v54 }
 0x1d5   :  { %v1222_v59 = vpop.f32.mrb[0].mxu1 }
 0x1d6   :  { %v2154_v60 = vpop.f32.mrb[0].mxu0  ;;  %v1224_v62 = vpop.f32.mrb[1].mxu1 }
 0x1d7   :  { %v2811_v61 = vadd.f32 %v2154_v60, %v1222_v59  ;;  %v2156_v63 = vpop.f32.mrb[1].mxu0  ;;  %v1226_v1 = vpop.f32.mrb[2].mxu1 }
 0x1d8   :  { %v2812_v0 = vadd.f32 %v2156_v63, %v1224_v62  ;;  %v2158_v2 = vpop.f32.mrb[2].mxu0  ;;  %v1228_v5 = vpop.f32.mrb[3].mxu1 }
 0x1d9   :  { %v4182_v3 = vadd.f32 %v2811_v61, %v2178_v58  ;;  %v2813_v4 = vadd.f32 %v2158_v2, %v1226_v1  ;;  %v2160_v6 = vpop.f32.mrb[3].mxu0 }
 0x1da   :  { %v4184_v7 = vadd.f32 %v2812_v0, %v2182_v51  ;;  %v2814_v8 = vadd.f32 %v2160_v6, %v1228_v5 }
 0x1db   :  { %v4186_v9 = vadd.f32 %v2813_v4, %v2178_v58  ;;  %v2213_v11 = vmul.f32 %v4182_v3, %v4182_v3 }
 0x1dc   :  { %v4188_v10 = vadd.f32 %v2814_v8, %v2182_v51  ;;  %v2214_v14 = vmul.f32 %v4184_v7, %v4184_v7 }
 0x1dd   :  { %v2193_v12 = vadd.f32 %v4186_v9, %v4182_v3  ;;  %v2215_v13 = vmul.f32 %v4186_v9, %v4186_v9  ;;  %v1232_v17 = vpop.f32.mrb[4].mxu1 }
 0x1de   :  { %v2202_v15 = vadd.f32 %v4188_v10, %v4184_v7  ;;  %v2216_v16 = vmul.f32 %v4188_v10, %v4188_v10  ;;  %v2164_v18 = vpop.f32.mrb[4].mxu0  ;;  %v1234_v21 = vpop.f32.mrb[5].mxu1 }
 0x1df   :  { %v2221_v19 = vadd.f32 %v2215_v13, %v2213_v11  ;;  %v2815_v20 = vadd.f32 %v2164_v18, %v1232_v17  ;;  %v2166_v22 = vpop.f32.mrb[5].mxu0  ;;  %v1236_v25 = vpop.f32.mrb[6].mxu1 }
 0x1e0   :  { %v2230_v23 = vadd.f32 %v2216_v16, %v2214_v14  ;;  %v2816_v24 = vadd.f32 %v2166_v22, %v1234_v21  ;;  %v2168_v26 = vpop.f32.mrb[6].mxu0  ;;  %v1238_v29 = vpop.f32.mrb[7].mxu1 }
 0x1e1   :  { %v4202_v27 = vadd.f32 %v2815_v20, %v2178_v58  ;;  %v2817_v28 = vadd.f32 %v2168_v26, %v1236_v25  ;;  %v2170_v30 = vpop.f32.mrb[7].mxu0  ;;  %v3256_v26 = vmov 1966171168  }
 0x1e2   :  { %v4204_v31 = vadd.f32 %v2816_v24, %v2182_v51  ;;  %v2818_v32 = vadd.f32 %v2170_v30, %v1238_v29 }
 0x1e3   :  { %v2194_v33 = vadd.f32 %v2193_v12, %v4202_v27  ;;  %v2217_v34 = vmul.f32 %v4202_v27, %v4202_v27  ;;  %v4209_v37 = vadd.f32 %v2817_v28, %v2178_v58  ;;  %v2256_v28 = vunpack.c.l.s4 %v3256_v26 }
 0x1e4   :  { %v2203_v38 = vadd.f32 %v2202_v15, %v4204_v31  ;;  %v2218_v40 = vmul.f32 %v4204_v31, %v4204_v31  ;;  %v4214_v41 = vadd.f32 %v2818_v32, %v2182_v51 }
 0x1e5   :  { %v2222_v35 = vadd.f32 %v2221_v19, %v2217_v34  ;;  %v2195_v39 = vadd.f32 %v2194_v33, %v4209_v37  ;;  %v2219_v42 = vmul.f32 %v4209_v37, %v4209_v37  ;;  %v2257_v29 = vunpack.c.0.s8 %v2256_v28 }
 0x1e6   :  { %v2231_v43 = vadd.f32 %v2230_v23, %v2218_v40  ;;  %v2204_v44 = vadd.f32 %v2203_v38, %v4214_v41  ;;  %v2220_v45 = vmul.f32 %v4214_v41, %v4214_v41  ;;  %v2247_v40 = vld [vmem:[%s4264_s3] sm:$0x3] }
 0x1e7   :  { %v2196_v46 = vrot.slane %v2195_v39, 4  ;;  %v2223_v47 = vadd.f32 %v2222_v35, %v2219_v42  ;;  %v2260_v32 = vsub.s32 %v2257_v29, %v4169_v56 }
 0x1e8   :  { %v2205_v48 = vrot.slane %v2204_v44, 4  ;;  %v2232_v49 = vadd.f32 %v2231_v43, %v2220_v45 }
 0x1e9   :  { %v2197_v36 = vadd.f32 %v2196_v46, %v2195_v39  ;;  %v2224_v53 = vrot.slane %v2223_v47, 4 }
 0x1ea   :  { %v2206_v54 = vadd.f32 %v2205_v48, %v2204_v44  ;;  %v2233_v55 = vrot.slane %v2232_v49, 4 }
 0x1eb   :  { %v2198_v50 = vrot.slane %v2197_v36, 2  ;;  %v2225_v58 = vadd.f32 %v2224_v53, %v2223_v47 }
 0x1ec   :  { %v2207_v59 = vrot.slane %v2206_v54, 2  ;;  %v2234_v60 = vadd.f32 %v2233_v55, %v2232_v49 }
 0x1ed   :  { %v2199_v51 = vadd.f32 %v2198_v50, %v2197_v36  ;;  %v2226_v61 = vrot.slane %v2225_v58, 2 }
 0x1ee   :  { %v2208_v62 = vadd.f32 %v2207_v59, %v2206_v54  ;;  %v2235_v63 = vrot.slane %v2234_v60, 2 }
 0x1ef   :  { %v2200_v0 = vrot.slane %v2199_v51, 1  ;;  %v2227_v1 = vadd.f32 %v2226_v61, %v2225_v58 }
 0x1f0   :  { %v2209_v2 = vrot.slane %v2208_v62, 1  ;;  %v2236_v4 = vadd.f32 %v2235_v63, %v2234_v60 }
 0x1f1   :  { %v2201_v5 = vadd.f32 %v2200_v0, %v2199_v51  ;;  %v2228_v6 = vrot.slane %v2227_v1, 1 }
 0x1f2   :  { %v2210_v8 = vadd.f32 %v2209_v2, %v2208_v62  ;;  %v2237_v11 = vrot.slane %v2236_v4, 1 }
 0x1f3   :  { %v2211_v12 = vmul.f32 0.03125, %v2201_v5  ;;  %v2229_v13 = vadd.f32 %v2228_v6, %v2227_v1 }
 0x1f4   :  { %v2212_v14 = vmul.f32 0.03125, %v2210_v8  ;;  %v2238_v15 = vadd.f32 %v2237_v11, %v2236_v4 }
 0x1f5   :  { %v2239_v16 = vmul.f32 0.03125, %v2229_v13  ;;  %v2241_v17 = vmul.f32 %v2211_v12, %v2211_v12 }
 0x1f6   :  { %v2240_v18 = vmul.f32 0.03125, %v2238_v15  ;;  %v2242_v19 = vmul.f32 %v2212_v14, %v2212_v14 }
 0x1f7   :  { %v2243_v20 = vsub.f32 %v2239_v16, %v2241_v17 }
 0x1f8   :  { %v2244_v21 = vsub.f32 %v2240_v18, %v2242_v19 }
 0x1f9   :  { %v2245_v22 = vmax.f32 %v2243_v20, 0.0 }
 0x1fa   :  { %v2246_v23 = vmax.f32 %v2244_v21, 0.0 }
 0x1fb   :  { %v2248_v24 = vadd.f32 1e-05, %v2245_v22 }
 0x1fc   :  { %v2249_v25 = vadd.f32 1e-05, %v2246_v23 }
 0x1fd   :  { %3252 = vrsqrt.f32 %v2248_v24 }
 0x1fe   :  { %3254 = vrsqrt.f32 %v2249_v25 }
 0x207   :  { %v3253_v30 = vpop.eup %3252 }
 0x208   :  { %v3255_v33 = vpop.eup %3254 }
 0x209   :  { %v2254_v34 = vcombine.low %v3253_v30, %v3255_v33 }
 0x20b   :  { %v2261_v38 = vrot.slane %v2254_v34, %v2260_v32 }
 0x20d   :  { %v2268_v35 = vrot.slane %v2261_v38, %v2260_v32 }
 0x20f   :  { %v2270_v39 = vmul.f32 %v2268_v35, %v2247_v40 }
 0x211   :  { %v2276_v42 = vrot.slane %v2270_v39, %v4172_v57  ;;  %v2280_v43 = vrot.slane %v2270_v39, %v4178_v52 }
 0x213   :  { %v2283_v44 = vmul.f32 %v2276_v42, %v2211_v12  ;;  %v2284_v45 = vmul.f32 %v2280_v43, %v2212_v14  ;;  %v2304_v46 = vmul.f32 %v2276_v42, %v4182_v3  ;;  %v2305_v47 = vmul.f32 %v2280_v43, %v4184_v7  ;;  %v2271_v3 = vld [vmem:[%s4265_s4] sm:$0x3] }
 0x214   :  { %v2306_v56 = vmul.f32 %v2276_v42, %v4186_v9  ;;  %v2307_v48 = vmul.f32 %v2280_v43, %v4188_v10  ;;  %v2308_v49 = vmul.f32 %v2276_v42, %v4202_v27  ;;  %v2309_v36 = vmul.f32 %v2280_v43, %v4204_v31 }
 0x215   :  { %v2287_v53 = vcombine.low %v2283_v44, %v2284_v45  ;;  %v2310_v54 = vmul.f32 %v2276_v42, %v4209_v37  ;;  %v2311_v55 = vmul.f32 %v2280_v43, %v4214_v41 }
 0x217   :  { %v2294_v50 = vrot.slane %v2287_v53, %v2260_v32 }
 0x219   :  { %v2301_v58 = vrot.slane %v2294_v50, %v2260_v32 }
 0x21b   :  { %v2303_v7 = vsub.f32 %v2271_v3, %v2301_v58 }
 0x21d   :  { %v2316_v9 = vrot.slane %v2303_v7, %v4172_v57  ;;  %v2320_v10 = vrot.slane %v2303_v7, %v4178_v52 }
 0x21f   :  { %v2323_v59 = vadd.f32 %v2316_v9, %v2304_v46  ;;  %v2324_v27 = vadd.f32 %v2320_v10, %v2305_v47  ;;  %v2325_v60 = vadd.f32 %v2316_v9, %v2306_v56  ;;  %v2326_v31 = vadd.f32 %v2320_v10, %v2307_v48 }
 0x220   :  { %v2327_v51 = vadd.f32 %v2316_v9, %v2308_v49  ;;  %v2328_v61 = vadd.f32 %v2320_v10, %v2309_v36  ;;  %v2329_v37 = vadd.f32 %v2316_v9, %v2310_v54  ;;  %v2330_v62 = vadd.f32 %v2320_v10, %v2311_v55 }
 0x221   :  { %vm2331_vm0 = vcmp.ge.f32.partialorder %v2323_v59, 0.0  ;;  %vm2332_vm1 = vcmp.ge.f32.partialorder %v2324_v27, 0.0  ;;  %vm2333_vm2 = vcmp.ge.f32.partialorder %v2325_v60, 0.0  ;;  %vm2334_vm3 = vcmp.ge.f32.partialorder %v2326_v31, 0.0 }
 0x222   :  { %vm2335_vm4 = vcmp.ge.f32.partialorder %v2327_v51, 0.0  ;;  %vm2336_vm5 = vcmp.ge.f32.partialorder %v2328_v61, 0.0  ;;  %vm2337_vm6 = vcmp.ge.f32.partialorder %v2329_v37, 0.0  ;;  %vm2338_vm7 = vcmp.ge.f32.partialorder %v2330_v62, 0.0 }
 0x223   :  { %v2339_v41 = vmul.f32 0.2, %v2323_v59  ;;  %v2340_v57 = vmul.f32 0.2, %v2324_v27  ;;  %v2341_v63 = vmul.f32 0.2, %v2325_v60 }
 0x224   :  { %v2342_v52 = vmul.f32 0.2, %v2326_v31  ;;  %v2343_v0 = vmul.f32 0.2, %v2327_v51  ;;  %v2344_v1 = vmul.f32 0.2, %v2328_v61 }
 0x225   :  { %v2345_v2 = vmul.f32 0.2, %v2329_v37  ;;  %v2346_v4 = vmul.f32 0.2, %v2330_v62  ;;  %v2347_v5 = vsel %vm2331_vm0, %v2323_v59, %v2339_v41  ;;  %v2348_v6 = vsel %vm2332_vm1, %v2324_v27, %v2340_v57 }
 0x226   :  { %v2349_v8 = vsel %vm2333_vm2, %v2325_v60, %v2341_v63  ;;  %v2350_v11 = vsel %vm2334_vm3, %v2326_v31, %v2342_v52  ;;  %v2351_v12 = vsel %vm2335_vm4, %v2327_v51, %v2343_v0  ;;  %v2352_v13 = vsel %vm2336_vm5, %v2328_v61, %v2344_v1 }
 0x227   :  { %v2353_v14 = vsel %vm2337_vm6, %v2329_v37, %v2345_v2  ;;  %v2354_v15 = vsel %vm2338_vm7, %v2330_v62, %v2346_v4  ;;  %v2807_v16 = vpack.c.bf16 %v2348_v6, %v2347_v5  ;;  %v2808_v17 = vpack.c.bf16 %v2350_v11, %v2349_v8 }
 0x228   :  { %v2809_v18 = vpack.c.bf16 %v2352_v13, %v2351_v12  ;;  %v2810_v19 = vpack.c.bf16 %v2354_v15, %v2353_v14 }
 0x229   :  { %2379 = vst [vmem:[%s4266_s5] sm:$0xff] %v2807_v16  ;;  %2380 = vst [vmem:[%s4266_s5 + $0x8] sm:$0xff] %v2808_v17 }
 0x22a   :  { %2381 = vst [vmem:[%s4266_s5 + $0x10] sm:$0xff] %v2809_v18  ;;  %2382 = vst [vmem:[%s4266_s5 + $0x18] sm:$0xff] %v2810_v19 }

// kernel: discriminator_forward.7
= control target key start
LH: loop header
LB: loop body
LE: loop exit
PB: predicated region body
PF: predicated region fallthrough
CT: control target
= control target key end

     0   :  { %s4732_s1 = inlined_call_operand.vmem [shape: bf16[4096,128], index: 1, kind: input, shape index: {}]   ;;  %s4733_s0 = inlined_call_operand.vmem [shape: bf16[16,4096], index: 0, kind: input, shape index: {}]   ;;  %s4734_s2 = inlined_call_operand.vmem [shape: f32[1,128], index: 2, kind: input, shape index: {}]   ;;  %s4735_s3 = inlined_call_operand.vmem [shape: f32[16,128], index: 3, kind: output, shape index: {}]  }
   0x1   :  { %v3575_v0 = vld [vmem:[%s4732_s1 + $0x40] sm:$0xff]   ;;  %v3579_v4 = vld [vmem:[%s4732_s1 + $0x48] sm:$0xff]   ;;  %v3583_v8 = vld [vmem:[%s4732_s1 + $0x50] sm:$0xff]  }
   0x2   :  { %v3576_v1 = vld [vmem:[%s4732_s1 + $0xc0] sm:$0xff]   ;;  %3223 = vmatprep.subr.bf16.mxu0 %v3575_v0  ;;  %v3580_v5 = vld [vmem:[%s4732_s1 + $0xc8] sm:$0xff]   ;;  %v3584_v9 = vld [vmem:[%s4732_s1 + $0xd0] sm:$0xff]  }
   0x3   :  { %v3577_v2 = vld [vmem:[%s4732_s1] sm:$0xff]   ;;  %3245 = vmatprep.subr.bf16.mxu1 %v3576_v1  ;;  %v3581_v6 = vld [vmem:[%s4732_s1 + $0x8] sm:$0xff]   ;;  %v3585_v10 = vld [vmem:[%s4732_s1 + $0x10] sm:$0xff]  }
   0x4   :  { %v3578_v3 = vld [vmem:[%s4732_s1 + $0x80] sm:$0xff]   ;;  %3224 = vmatpush3.bf16.msra.mxu0 %v3577_v2  ;;  %v3582_v7 = vld [vmem:[%s4732_s1 + $0x88] sm:$0xff]   ;;  %v3586_v11 = vld [vmem:[%s4732_s1 + $0x90] sm:$0xff]  }
   0x5   :  { %3246 = vmatpush3.bf16.msra.mxu1 %v3578_v3  ;;  %3225 = vmatprep.subr.bf16.mxu0 %v3579_v4  ;;  %v3587_v12 = vld [vmem:[%s4732_s1 + $0x58] sm:$0xff]   ;;  %v3591_v16 = vld [vmem:[%s4732_s1 + $0x60] sm:$0xff]   ;;  %v3595_v20 = vld [vmem:[%s4732_s1 + $0x68] sm:$0xff]  }
   0x6   :  { %3247 = vmatprep.subr.bf16.mxu1 %v3580_v5  ;;  %v3588_v13 = vld [vmem:[%s4732_s1 + $0xd8] sm:$0xff]   ;;  %v3592_v17 = vld [vmem:[%s4732_s1 + $0xe0] sm:$0xff]   ;;  %v3596_v21 = vld [vmem:[%s4732_s1 + $0xe8] sm:$0xff]  }
   0x7   :  { %v3589_v14 = vld [vmem:[%s4732_s1 + $0x18] sm:$0xff]   ;;  %v3593_v18 = vld [vmem:[%s4732_s1 + $0x20] sm:$0xff]   ;;  %v3597_v22 = vld [vmem:[%s4732_s1 + $0x28] sm:$0xff]  }
   0x8   :  { %3226 = vmatpush3.bf16.msra.mxu0 %v3581_v6  ;;  %v3590_v15 = vld [vmem:[%s4732_s1 + $0x98] sm:$0xff]   ;;  %v3594_v19 = vld [vmem:[%s4732_s1 + $0xa0] sm:$0xff]   ;;  %v3598_v23 = vld [vmem:[%s4732_s1 + $0xa8] sm:$0xff]  }
   0x9   :  { %3248 = vmatpush3.bf16.msra.mxu1 %v3582_v7  ;;  %3227 = vmatprep.subr.bf16.mxu0 %v3583_v8  ;;  %v3599_v24 = vld [vmem:[%s4732_s1 + $0x70] sm:$0xff]   ;;  %v3603_v28 = vld [vmem:[%s4732_s1 + $0x78] sm:$0xff]   ;;  %v15_v32 = vld [vmem:[%s4733_s0] sm:$0xff] }
   0xa   :  { %3249 = vmatprep.subr.bf16.mxu1 %v3584_v9  ;;  %v3600_v25 = vld [vmem:[%s4732_s1 + $0xf0] sm:$0xff]   ;;  %v3604_v29 = vld [vmem:[%s4732_s1 + $0xf8] sm:$0xff]   ;;  %v31_v33 = vld [vmem:[%s4733_s0 + $0x80] sm:$0xff] }
   0xb   :  { %v3601_v26 = vld [vmem:[%s4732_s1 + $0x30] sm:$0xff]   ;;  %v3605_v30 = vld [vmem:[%s4732_s1 + $0x38] sm:$0xff]   ;;  %v16_v34 = vld [vmem:[%s4733_s0 + $0x8] sm:$0xff]  ;;  %v2935_v35 = vcombine.low %v15_v32, %v31_v33  ;;  %v2936_v36 = vcombine.high %v15_v32, %v31_v33 }
   0xc   :  { %3228 = vmatpush3.bf16.msra.mxu0 %v3585_v10  ;;  %v3602_v27 = vld [vmem:[%s4732_s1 + $0xb0] sm:$0xff]   ;;  %v3606_v31 = vld [vmem:[%s4732_s1 + $0xb8] sm:$0xff]   ;;  %v32_v37 = vld [vmem:[%s4733_s0 + $0x88] sm:$0xff] }
   0xd   :  { %3250 = vmatpush3.bf16.msra.mxu1 %v3586_v11  ;;  %3229 = vmatprep.subr.bf16.mxu0 %v3587_v12  ;;  %v2937_v38 = vcombine.low %v16_v34, %v32_v37  ;;  %v2938_v39 = vcombine.high %v16_v34, %v32_v37  ;;  %v3607_v40 = vld [vmem:[%s4732_s1 + $0x140] sm:$0xff]   ;;  %v3611_v44 = vld [vmem:[%s4732_s1 + $0x148] sm:$0xff]   ;;  %v3615_v48 = vld [vmem:[%s4732_s1 + $0x150] sm:$0xff]  }
   0xe   :  { %3251 = vmatprep.subr.bf16.mxu1 %v3588_v13  ;;  %2294 = vmatprep.mubr.bf16.mxu0 %v2936_v36  ;;  %v3608_v41 = vld [vmem:[%s4732_s1 + $0x1c0] sm:$0xff]   ;;  %v3612_v45 = vld [vmem:[%s4732_s1 + $0x1c8] sm:$0xff]   ;;  %v3616_v49 = vld [vmem:[%s4732_s1 + $0x1d0] sm:$0xff]  }
   0xf   :  { %2335 = vmatprep.mubr.bf16.mxu1 %v2938_v39  ;;  %v3609_v42 = vld [vmem:[%s4732_s1 + $0x100] sm:$0xff]   ;;  %v3613_v46 = vld [vmem:[%s4732_s1 + $0x108] sm:$0xff]   ;;  %v3617_v50 = vld [vmem:[%s4732_s1 + $0x110] sm:$0xff]  }
  0x10   :  { %3230 = vmatpush3.bf16.msra.mxu0 %v3589_v14  ;;  %v3610_v43 = vld [vmem:[%s4732_s1 + $0x180] sm:$0xff]   ;;  %v3614_v47 = vld [vmem:[%s4732_s1 + $0x188] sm:$0xff]   ;;  %v3618_v51 = vld [vmem:[%s4732_s1 + $0x190] sm:$0xff]  }
  0x11   :  { %3252 = vmatpush3.bf16.msra.mxu1 %v3590_v15  ;;  %3231 = vmatprep.subr.bf16.mxu0 %v3591_v16  ;;  %v3619_v52 = vld [vmem:[%s4732_s1 + $0x158] sm:$0xff]   ;;  %v3623_v56 = vld [vmem:[%s4732_s1 + $0x160] sm:$0xff]   ;;  %v3627_v60 = vld [vmem:[%s4732_s1 + $0x168] sm:$0xff]  }
  0x12   :  { %3253 = vmatprep.subr.bf16.mxu1 %v3592_v17  ;;  %v3620_v53 = vld [vmem:[%s4732_s1 + $0x1d8] sm:$0xff]   ;;  %v3624_v57 = vld [vmem:[%s4732_s1 + $0x1e0] sm:$0xff]   ;;  %v3628_v61 = vld [vmem:[%s4732_s1 + $0x1e8] sm:$0xff]  }
  0x13   :  { %v3621_v54 = vld [vmem:[%s4732_s1 + $0x118] sm:$0xff]   ;;  %v3625_v58 = vld [vmem:[%s4732_s1 + $0x120] sm:$0xff]   ;;  %v3629_v62 = vld [vmem:[%s4732_s1 + $0x128] sm:$0xff]  }
  0x14   :  { %3232 = vmatpush3.bf16.msra.mxu0 %v3593_v18  ;;  %v3622_v55 = vld [vmem:[%s4732_s1 + $0x198] sm:$0xff]   ;;  %v3626_v59 = vld [vmem:[%s4732_s1 + $0x1a0] sm:$0xff]   ;;  %v3630_v63 = vld [vmem:[%s4732_s1 + $0x1a8] sm:$0xff]  }
  0x15   :  { %3254 = vmatpush3.bf16.msra.mxu1 %v3594_v19  ;;  %3233 = vmatprep.subr.bf16.mxu0 %v3595_v20  ;;  %v3631_v0 = vld [vmem:[%s4732_s1 + $0x170] sm:$0xff]   ;;  %v3635_v4 = vld [vmem:[%s4732_s1 + $0x178] sm:$0xff]   ;;  %v3639_v16 = vld [vmem:[%s4732_s1 + $0x240] sm:$0xff]  }
  0x16   :  { %3255 = vmatprep.subr.bf16.mxu1 %v3596_v21  ;;  %v3632_v1 = vld [vmem:[%s4732_s1 + $0x1f0] sm:$0xff]   ;;  %v3636_v5 = vld [vmem:[%s4732_s1 + $0x1f8] sm:$0xff]   ;;  %v3640_v17 = vld [vmem:[%s4732_s1 + $0x2c0] sm:$0xff]  }
  0x17   :  { %v3633_v2 = vld [vmem:[%s4732_s1 + $0x130] sm:$0xff]   ;;  %v3637_v6 = vld [vmem:[%s4732_s1 + $0x138] sm:$0xff]   ;;  %v3641_v18 = vld [vmem:[%s4732_s1 + $0x200] sm:$0xff]  }
  0x18   :  { %3234 = vmatpush3.bf16.msra.mxu0 %v3597_v22  ;;  %v3634_v3 = vld [vmem:[%s4732_s1 + $0x1b0] sm:$0xff]   ;;  %v3638_v7 = vld [vmem:[%s4732_s1 + $0x1b8] sm:$0xff]   ;;  %v3642_v19 = vld [vmem:[%s4732_s1 + $0x280] sm:$0xff]  }
  0x19   :  { %3256 = vmatpush3.bf16.msra.mxu1 %v3598_v23  ;;  %3235 = vmatprep.subr.bf16.mxu0 %v3599_v24  ;;  %v17_v8 = vld [vmem:[%s4733_s0 + $0x10] sm:$0xff]  ;;  %v18_v12 = vld [vmem:[%s4733_s0 + $0x18] sm:$0xff]  ;;  %v3643_v20 = vld [vmem:[%s4732_s1 + $0x248] sm:$0xff]  }
  0x1a   :  { %3257 = vmatprep.subr.bf16.mxu1 %v3600_v25  ;;  %v33_v9 = vld [vmem:[%s4733_s0 + $0x90] sm:$0xff]  ;;  %v34_v13 = vld [vmem:[%s4733_s0 + $0x98] sm:$0xff]  ;;  %v3644_v21 = vld [vmem:[%s4732_s1 + $0x2c8] sm:$0xff]  }
  0x1b   :  { %v2939_v10 = vcombine.low %v17_v8, %v33_v9  ;;  %v2940_v11 = vcombine.high %v17_v8, %v33_v9  ;;  %v2941_v14 = vcombine.low %v18_v12, %v34_v13  ;;  %v2942_v15 = vcombine.high %v18_v12, %v34_v13  ;;  %v3645_v22 = vld [vmem:[%s4732_s1 + $0x208] sm:$0xff]   ;;  %v3647_v24 = vld [vmem:[%s4732_s1 + $0x250] sm:$0xff]   ;;  %v3655_v32 = vld [vmem:[%s4732_s1 + $0x260] sm:$0xff]  }
  0x1c   :  { %3236 = vmatpush3.bf16.msra.mxu0 %v3601_v26  ;;  %v3646_v23 = vld [vmem:[%s4732_s1 + $0x288] sm:$0xff]   ;;  %v3648_v25 = vld [vmem:[%s4732_s1 + $0x2d0] sm:$0xff]   ;;  %v3656_v33 = vld [vmem:[%s4732_s1 + $0x2e0] sm:$0xff]  }
  0x1d   :  { %3258 = vmatpush3.bf16.msra.mxu1 %v3602_v27  ;;  %3237 = vmatprep.subr.bf16.mxu0 %v3603_v28  ;;  %v3649_v26 = vld [vmem:[%s4732_s1 + $0x210] sm:$0xff]   ;;  %v3651_v28 = vld [vmem:[%s4732_s1 + $0x258] sm:$0xff]   ;;  %v3657_v34 = vld [vmem:[%s4732_s1 + $0x220] sm:$0xff]  }
  0x1e   :  { %3259 = vmatprep.subr.bf16.mxu1 %v3604_v29  ;;  %v3650_v27 = vld [vmem:[%s4732_s1 + $0x290] sm:$0xff]   ;;  %v3652_v29 = vld [vmem:[%s4732_s1 + $0x2d8] sm:$0xff]   ;;  %v3659_v36 = vld [vmem:[%s4732_s1 + $0x268] sm:$0xff]  }
  0x1f   :  { %v3660_v37 = vld [vmem:[%s4732_s1 + $0x2e8] sm:$0xff]   ;;  %v3687_v8 = vld [vmem:[%s4732_s1 + $0x360] sm:$0xff]  }
  0x20   :  { %3238 = vmatpush3.bf16.msra.mxu0 %v3605_v30  ;;  %v3653_v30 = vld [vmem:[%s4732_s1 + $0x218] sm:$0xff]   ;;  %v3662_v39 = vld [vmem:[%s4732_s1 + $0x2a8] sm:$0xff]   ;;  %v3688_v9 = vld [vmem:[%s4732_s1 + $0x3e0] sm:$0xff]  }
  0x21   :  { %3260 = vmatpush3.bf16.msra.mxu1 %v3606_v31  ;;  %3267 = vmatprep.subr.bf16.mxu0 %v3607_v40  ;;  %v3654_v31 = vld [vmem:[%s4732_s1 + $0x298] sm:$0xff]   ;;  %v3663_v40 = vld [vmem:[%s4732_s1 + $0x270] sm:$0xff]   ;;  %v3691_v12 = vld [vmem:[%s4732_s1 + $0x368] sm:$0xff]  }
  0x22   :  { %3289 = vmatprep.subr.bf16.mxu1 %v3608_v41  ;;  %v3664_v41 = vld [vmem:[%s4732_s1 + $0x2f0] sm:$0xff]   ;;  %v3692_v13 = vld [vmem:[%s4732_s1 + $0x3e8] sm:$0xff]  }
  0x23   :  { %2295 = vmatmul.mubr.bf16.vlgmr.msra.gmra.mrb[0].mxu0 %v2935_v35  ;;  %v3658_v35 = vld [vmem:[%s4732_s1 + $0x2a0] sm:$0xff]  }
  0x24   :  { %2336 = vmatmul.mubr.bf16.vlgmr.msra.gmra.mrb[0].mxu1 %v2937_v38  ;;  %3268 = vmatpush3.bf16.msra.mxu0 %v3609_v42  ;;  %v3661_v38 = vld [vmem:[%s4732_s1 + $0x228] sm:$0xff]   ;;  %v3665_v42 = vld [vmem:[%s4732_s1 + $0x230] sm:$0xff]  }
  0x25   :  { %3290 = vmatpush3.bf16.msra.mxu1 %v3610_v43  ;;  %3269 = vmatprep.subr.bf16.mxu0 %v3611_v44  ;;  %v3666_v43 = vld [vmem:[%s4732_s1 + $0x2b0] sm:$0xff]   ;;  %v3667_v44 = vld [vmem:[%s4732_s1 + $0x278] sm:$0xff]  }
  0x26   :  { %3291 = vmatprep.subr.bf16.mxu1 %v3612_v45  ;;  %2376 = vmatprep.mubr.bf16.mxu0 %v2940_v11  ;;  %v3668_v45 = vld [vmem:[%s4732_s1 + $0x2f8] sm:$0xff]   ;;  %v3690_v11 = vld [vmem:[%s4732_s1 + $0x3a0] sm:$0xff]  }
  0x27   :  { %2417 = vmatprep.mubr.bf16.mxu1 %v2942_v15  ;;  %v3694_v15 = vld [vmem:[%s4732_s1 + $0x3a8] sm:$0xff]  }
  0x28   :  { %3270 = vmatpush3.bf16.msra.mxu0 %v3613_v46  ;;  %v3669_v46 = vld [vmem:[%s4732_s1 + $0x238] sm:$0xff]  }
  0x29   :  { %3292 = vmatpush3.bf16.msra.mxu1 %v3614_v47  ;;  %3271 = vmatprep.subr.bf16.mxu0 %v3615_v48  ;;  %v3670_v47 = vld [vmem:[%s4732_s1 + $0x2b8] sm:$0xff]   ;;  %v19_v48 = vld [vmem:[%s4733_s0 + $0x20] sm:$0xff] }
  0x2a   :  { %3293 = vmatprep.subr.bf16.mxu1 %v3616_v49  ;;  %v35_v49 = vld [vmem:[%s4733_s0 + $0xa0] sm:$0xff] }
  0x2c   :  { %3272 = vmatpush3.bf16.msra.mxu0 %v3617_v50  ;;  %v20_v50 = vld [vmem:[%s4733_s0 + $0x28] sm:$0xff] }
  0x2d   :  { %3294 = vmatpush3.bf16.msra.mxu1 %v3618_v51  ;;  %3273 = vmatprep.subr.bf16.mxu0 %v3619_v52  ;;  %v36_v51 = vld [vmem:[%s4733_s0 + $0xa8] sm:$0xff]  ;;  %v2943_v52 = vcombine.low %v19_v48, %v35_v49 }
  0x2e   :  { %3295 = vmatprep.subr.bf16.mxu1 %v3620_v53  ;;  %v2944_v53 = vcombine.high %v19_v48, %v35_v49  ;;  %v3719_v48 = vld [vmem:[%s4732_s1 + $0x460] sm:$0xff]  }
  0x2f   :  { %v3720_v49 = vld [vmem:[%s4732_s1 + $0x4e0] sm:$0xff]  }
  0x30   :  { %3274 = vmatpush3.bf16.msra.mxu0 %v3621_v54  ;;  %v2945_v54 = vcombine.low %v20_v50, %v36_v51 }
  0x31   :  { %3296 = vmatpush3.bf16.msra.mxu1 %v3622_v55  ;;  %3275 = vmatprep.subr.bf16.mxu0 %v3623_v56  ;;  %v2946_v55 = vcombine.high %v20_v50, %v36_v51  ;;  %v3671_v56 = vld [vmem:[%s4732_s1 + $0x340] sm:$0xff]  }
  0x32   :  { %3297 = vmatprep.subr.bf16.mxu1 %v3624_v57  ;;  %v3672_v57 = vld [vmem:[%s4732_s1 + $0x3c0] sm:$0xff]  }
  0x33   :  { %v3721_v50 = vld [vmem:[%s4732_s1 + $0x420] sm:$0xff]  }
  0x34   :  { %3276 = vmatpush3.bf16.msra.mxu0 %v3625_v58  ;;  %v3673_v58 = vld [vmem:[%s4732_s1 + $0x300] sm:$0xff]  }
  0x35   :  { %3298 = vmatpush3.bf16.msra.mxu1 %v3626_v59  ;;  %3277 = vmatprep.subr.bf16.mxu0 %v3627_v60  ;;  %v3674_v59 = vld [vmem:[%s4732_s1 + $0x380] sm:$0xff]   ;;  %v3675_v60 = vld [vmem:[%s4732_s1 + $0x348] sm:$0xff]  }
  0x36   :  { %3299 = vmatprep.subr.bf16.mxu1 %v3628_v61  ;;  %v3676_v61 = vld [vmem:[%s4732_s1 + $0x3c8] sm:$0xff]   ;;  %v3722_v51 = vld [vmem:[%s4732_s1 + $0x4a0] sm:$0xff]  }
  0x38   :  { %3278 = vmatpush3.bf16.msra.mxu0 %v3629_v62  ;;  %v3677_v62 = vld [vmem:[%s4732_s1 + $0x308] sm:$0xff]  }
  0x39   :  { %3300 = vmatpush3.bf16.msra.mxu1 %v3630_v63  ;;  %3279 = vmatprep.subr.bf16.mxu0 %v3631_v0  ;;  %v3678_v63 = vld [vmem:[%s4732_s1 + $0x388] sm:$0xff]   ;;  %v3679_v0 = vld [vmem:[%s4732_s1 + $0x350] sm:$0xff]  }
  0x3a   :  { %3301 = vmatprep.subr.bf16.mxu1 %v3632_v1  ;;  %v3680_v1 = vld [vmem:[%s4732_s1 + $0x3d0] sm:$0xff]  }
  0x3c   :  { %3280 = vmatpush3.bf16.msra.mxu0 %v3633_v2  ;;  %v3681_v2 = vld [vmem:[%s4732_s1 + $0x310] sm:$0xff]  }
  0x3d   :  { %3302 = vmatpush3.bf16.msra.mxu1 %v3634_v3  ;;  %3281 = vmatprep.subr.bf16.mxu0 %v3635_v4  ;;  %v3682_v3 = vld [vmem:[%s4732_s1 + $0x390] sm:$0xff]   ;;  %v3683_v4 = vld [vmem:[%s4732_s1 + $0x358] sm:$0xff]  }
  0x3e   :  { %3303 = vmatprep.subr.bf16.mxu1 %v3636_v5  ;;  %v3684_v5 = vld [vmem:[%s4732_s1 + $0x3d8] sm:$0xff]  }
  0x40   :  { %3282 = vmatpush3.bf16.msra.mxu0 %v3637_v6  ;;  %v3685_v6 = vld [vmem:[%s4732_s1 + $0x318] sm:$0xff]  }
  0x41   :  { %3304 = vmatpush3.bf16.msra.mxu1 %v3638_v7  ;;  %3311 = vmatprep.subr.bf16.mxu0 %v3639_v16  ;;  %v3686_v7 = vld [vmem:[%s4732_s1 + $0x398] sm:$0xff]   ;;  %v3695_v16 = vld [vmem:[%s4732_s1 + $0x370] sm:$0xff]  }
  0x42   :  { %3333 = vmatprep.subr.bf16.mxu1 %v3640_v17  ;;  %v3696_v17 = vld [vmem:[%s4732_s1 + $0x3f0] sm:$0xff]  }
  0x43   :  { %2377 = vmatmul.mubr.bf16.vlgmr.msra.gmra.mrb[4].mxu0 %v2939_v10  ;;  %v3689_v10 = vld [vmem:[%s4732_s1 + $0x320] sm:$0xff]  }
  0x44   :  { %2418 = vmatmul.mubr.bf16.vlgmr.msra.gmra.mrb[4].mxu1 %v2941_v14  ;;  %3312 = vmatpush3.bf16.msra.mxu0 %v3641_v18  ;;  %v3693_v14 = vld [vmem:[%s4732_s1 + $0x328] sm:$0xff]   ;;  %v3697_v18 = vld [vmem:[%s4732_s1 + $0x330] sm:$0xff]  }
  0x45   :  { %3334 = vmatpush3.bf16.msra.mxu1 %v3642_v19  ;;  %3313 = vmatprep.subr.bf16.mxu0 %v3643_v20  ;;  %v3698_v19 = vld [vmem:[%s4732_s1 + $0x3b0] sm:$0xff]   ;;  %v3699_v20 = vld [vmem:[%s4732_s1 + $0x378] sm:$0xff]  }
  0x46   :  { %3335 = vmatprep.subr.bf16.mxu1 %v3644_v21  ;;  %2458 = vmatprep.mubr.bf16.mxu0 %v2944_v53  ;;  %v3700_v21 = vld [vmem:[%s4732_s1 + $0x3f8] sm:$0xff]   ;;  %v3724_v53 = vld [vmem:[%s4732_s1 + $0x4e8] sm:$0xff]  }
  0x47   :  { %2499 = vmatprep.mubr.bf16.mxu1 %v2946_v55  ;;  %v3726_v55 = vld [vmem:[%s4732_s1 + $0x4a8] sm:$0xff]  }
  0x48   :  { %3314 = vmatpush3.bf16.msra.mxu0 %v3645_v22  ;;  %v3701_v22 = vld [vmem:[%s4732_s1 + $0x338] sm:$0xff]  }
  0x49   :  { %3336 = vmatpush3.bf16.msra.mxu1 %v3646_v23  ;;  %3315 = vmatprep.subr.bf16.mxu0 %v3647_v24  ;;  %v3702_v23 = vld [vmem:[%s4732_s1 + $0x3b8] sm:$0xff]   ;;  %v21_v24 = vld [vmem:[%s4733_s0 + $0x30] sm:$0xff] }
  0x4a   :  { %3337 = vmatprep.subr.bf16.mxu1 %v3648_v25  ;;  %v37_v25 = vld [vmem:[%s4733_s0 + $0xb0] sm:$0xff] }
  0x4c   :  { %3316 = vmatpush3.bf16.msra.mxu0 %v3649_v26  ;;  %v22_v26 = vld [vmem:[%s4733_s0 + $0x38] sm:$0xff] }
  0x4d   :  { %3338 = vmatpush3.bf16.msra.mxu1 %v3650_v27  ;;  %3317 = vmatprep.subr.bf16.mxu0 %v3651_v28  ;;  %v2947_v27 = vcombine.low %v21_v24, %v37_v25  ;;  %v2948_v28 = vcombine.high %v21_v24, %v37_v25  ;;  %v3751_v24 = vld [vmem:[%s4732_s1 + $0x560] sm:$0xff]  }
  0x4e   :  { %3339 = vmatprep.subr.bf16.mxu1 %v3652_v29  ;;  %v38_v29 = vld [vmem:[%s4733_s0 + $0xb8] sm:$0xff]  ;;  %v3752_v25 = vld [vmem:[%s4732_s1 + $0x5e0] sm:$0xff]  }
  0x50   :  { %3318 = vmatpush3.bf16.msra.mxu0 %v3653_v30  ;;  %v2949_v30 = vcombine.low %v22_v26, %v38_v29 }
  0x51   :  { %3340 = vmatpush3.bf16.msra.mxu1 %v3654_v31  ;;  %3319 = vmatprep.subr.bf16.mxu0 %v3655_v32  ;;  %v2950_v31 = vcombine.high %v22_v26, %v38_v29  ;;  %v3703_v32 = vld [vmem:[%s4732_s1 + $0x440] sm:$0xff]   ;;  %v3756_v29 = vld [vmem:[%s4732_s1 + $0x5e8] sm:$0xff]  }
  0x52   :  { %3341 = vmatprep.subr.bf16.mxu1 %v3656_v33  ;;  %v3704_v33 = vld [vmem:[%s4732_s1 + $0x4c0] sm:$0xff]  }
  0x53   :  { %v3753_v26 = vld [vmem:[%s4732_s1 + $0x520] sm:$0xff]  }
  0x54   :  { %3320 = vmatpush3.bf16.msra.mxu0 %v3657_v34  ;;  %v3705_v34 = vld [vmem:[%s4732_s1 + $0x400] sm:$0xff]  }
  0x55   :  { %3342 = vmatpush3.bf16.msra.mxu1 %v3658_v35  ;;  %3321 = vmatprep.subr.bf16.mxu0 %v3659_v36  ;;  %v3706_v35 = vld [vmem:[%s4732_s1 + $0x480] sm:$0xff]   ;;  %v3707_v36 = vld [vmem:[%s4732_s1 + $0x448] sm:$0xff]  }
  0x56   :  { %3343 = vmatprep.subr.bf16.mxu1 %v3660_v37  ;;  %v3708_v37 = vld [vmem:[%s4732_s1 + $0x4c8] sm:$0xff]  }
  0x58   :  { %3322 = vmatpush3.bf16.msra.mxu0 %v3661_v38  ;;  %v3709_v38 = vld [vmem:[%s4732_s1 + $0x408] sm:$0xff]  }
  0x59   :  { %3344 = vmatpush3.bf16.msra.mxu1 %v3662_v39  ;;  %3323 = vmatprep.subr.bf16.mxu0 %v3663_v40  ;;  %v3710_v39 = vld [vmem:[%s4732_s1 + $0x488] sm:$0xff]   ;;  %v3711_v40 = vld [vmem:[%s4732_s1 + $0x450] sm:$0xff]  }
  0x5a   :  { %3345 = vmatprep.subr.bf16.mxu1 %v3664_v41  ;;  %v3712_v41 = vld [vmem:[%s4732_s1 + $0x4d0] sm:$0xff]  }
  0x5c   :  { %3324 = vmatpush3.bf16.msra.mxu0 %v3665_v42  ;;  %v3713_v42 = vld [vmem:[%s4732_s1 + $0x410] sm:$0xff]  }
  0x5d   :  { %3346 = vmatpush3.bf16.msra.mxu1 %v3666_v43  ;;  %3325 = vmatprep.subr.bf16.mxu0 %v3667_v44  ;;  %v3714_v43 = vld [vmem:[%s4732_s1 + $0x490] sm:$0xff]   ;;  %v3715_v44 = vld [vmem:[%s4732_s1 + $0x458] sm:$0xff]  }
  0x5e   :  { %3347 = vmatprep.subr.bf16.mxu1 %v3668_v45  ;;  %v3716_v45 = vld [vmem:[%s4732_s1 + $0x4d8] sm:$0xff]  }
  0x60   :  { %3326 = vmatpush3.bf16.msra.mxu0 %v3669_v46  ;;  %v3717_v46 = vld [vmem:[%s4732_s1 + $0x418] sm:$0xff]  }
  0x61   :  { %3348 = vmatpush3.bf16.msra.mxu1 %v3670_v47  ;;  %3355 = vmatprep.subr.bf16.mxu0 %v3671_v56  ;;  %v3718_v47 = vld [vmem:[%s4732_s1 + $0x498] sm:$0xff]   ;;  %v3727_v56 = vld [vmem:[%s4732_s1 + $0x470] sm:$0xff]  }
  0x62   :  { %3377 = vmatprep.subr.bf16.mxu1 %v3672_v57  ;;  %v3728_v57 = vld [vmem:[%s4732_s1 + $0x4f0] sm:$0xff]  }
  0x63   :  { %2459 = vmatmul.mubr.bf16.vlgmr.msra.gmra.mrb[8].mxu0 %v2943_v52  ;;  %v3723_v52 = vld [vmem:[%s4732_s1 + $0x468] sm:$0xff]  }
  0x64   :  { %2500 = vmatmul.mubr.bf16.vlgmr.msra.gmra.mrb[8].mxu1 %v2945_v54  ;;  %3356 = vmatpush3.bf16.msra.mxu0 %v3673_v58  ;;  %v3725_v54 = vld [vmem:[%s4732_s1 + $0x428] sm:$0xff]   ;;  %v3729_v58 = vld [vmem:[%s4732_s1 + $0x430] sm:$0xff]  }
  0x65   :  { %3378 = vmatpush3.bf16.msra.mxu1 %v3674_v59  ;;  %3357 = vmatprep.subr.bf16.mxu0 %v3675_v60  ;;  %v3730_v59 = vld [vmem:[%s4732_s1 + $0x4b0] sm:$0xff]   ;;  %v3731_v60 = vld [vmem:[%s4732_s1 + $0x478] sm:$0xff]  }
  0x66   :  { %3379 = vmatprep.subr.bf16.mxu1 %v3676_v61  ;;  %2540 = vmatprep.mubr.bf16.mxu0 %v2948_v28  ;;  %v3732_v61 = vld [vmem:[%s4732_s1 + $0x4f8] sm:$0xff]   ;;  %v3755_v28 = vld [vmem:[%s4732_s1 + $0x568] sm:$0xff]  }
  0x67   :  { %2581 = vmatprep.mubr.bf16.mxu1 %v2950_v31  ;;  %v3758_v31 = vld [vmem:[%s4732_s1 + $0x5a8] sm:$0xff]  }
  0x68   :  { %3358 = vmatpush3.bf16.msra.mxu0 %v3677_v62  ;;  %v3733_v62 = vld [vmem:[%s4732_s1 + $0x438] sm:$0xff]  }
  0x69   :  { %3380 = vmatpush3.bf16.msra.mxu1 %v3678_v63  ;;  %3359 = vmatprep.subr.bf16.mxu0 %v3679_v0  ;;  %v3734_v63 = vld [vmem:[%s4732_s1 + $0x4b8] sm:$0xff]   ;;  %v23_v0 = vld [vmem:[%s4733_s0 + $0x40] sm:$0xff] }
  0x6a   :  { %3381 = vmatprep.subr.bf16.mxu1 %v3680_v1  ;;  %v39_v1 = vld [vmem:[%s4733_s0 + $0xc0] sm:$0xff] }
  0x6c   :  { %3360 = vmatpush3.bf16.msra.mxu0 %v3681_v2  ;;  %v2951_v2 = vcombine.low %v23_v0, %v39_v1 }
  0x6d   :  { %3382 = vmatpush3.bf16.msra.mxu1 %v3682_v3  ;;  %3361 = vmatprep.subr.bf16.mxu0 %v3683_v4  ;;  %v2952_v3 = vcombine.high %v23_v0, %v39_v1  ;;  %v24_v4 = vld [vmem:[%s4733_s0 + $0x48] sm:$0xff]  ;;  %v3783_v0 = vld [vmem:[%s4732_s1 + $0x660] sm:$0xff]  }
  0x6e   :  { %3383 = vmatprep.subr.bf16.mxu1 %v3684_v5  ;;  %v40_v5 = vld [vmem:[%s4733_s0 + $0xc8] sm:$0xff]  ;;  %v3784_v1 = vld [vmem:[%s4732_s1 + $0x6e0] sm:$0xff]  }
  0x70   :  { %3362 = vmatpush3.bf16.msra.mxu0 %v3685_v6  ;;  %v2953_v6 = vcombine.low %v24_v4, %v40_v5 }
  0x71   :  { %3384 = vmatpush3.bf16.msra.mxu1 %v3686_v7  ;;  %3363 = vmatprep.subr.bf16.mxu0 %v3687_v8  ;;  %v2954_v7 = vcombine.high %v24_v4, %v40_v5  ;;  %v3735_v8 = vld [vmem:[%s4732_s1 + $0x540] sm:$0xff]   ;;  %v3787_v4 = vld [vmem:[%s4732_s1 + $0x668] sm:$0xff]  }
  0x72   :  { %3385 = vmatprep.subr.bf16.mxu1 %v3688_v9  ;;  %v3736_v9 = vld [vmem:[%s4732_s1 + $0x5c0] sm:$0xff]   ;;  %v3788_v5 = vld [vmem:[%s4732_s1 + $0x6e8] sm:$0xff]  }
  0x74   :  { %3364 = vmatpush3.bf16.msra.mxu0 %v3689_v10  ;;  %v3737_v10 = vld [vmem:[%s4732_s1 + $0x500] sm:$0xff]  }
  0x75   :  { %3386 = vmatpush3.bf16.msra.mxu1 %v3690_v11  ;;  %3365 = vmatprep.subr.bf16.mxu0 %v3691_v12  ;;  %v3738_v11 = vld [vmem:[%s4732_s1 + $0x580] sm:$0xff]   ;;  %v3739_v12 = vld [vmem:[%s4732_s1 + $0x548] sm:$0xff]  }
  0x76   :  { %3387 = vmatprep.subr.bf16.mxu1 %v3692_v13  ;;  %v3740_v13 = vld [vmem:[%s4732_s1 + $0x5c8] sm:$0xff]  }
  0x78   :  { %3366 = vmatpush3.bf16.msra.mxu0 %v3693_v14  ;;  %v3741_v14 = vld [vmem:[%s4732_s1 + $0x508] sm:$0xff]  }
  0x79   :  { %3388 = vmatpush3.bf16.msra.mxu1 %v3694_v15  ;;  %3367 = vmatprep.subr.bf16.mxu0 %v3695_v16  ;;  %v3742_v15 = vld [vmem:[%s4732_s1 + $0x588] sm:$0xff]   ;;  %v3743_v16 = vld [vmem:[%s4732_s1 + $0x550] sm:$0xff]  }
  0x7a   :  { %3389 = vmatprep.subr.bf16.mxu1 %v3696_v17  ;;  %v3744_v17 = vld [vmem:[%s4732_s1 + $0x5d0] sm:$0xff]  }
  0x7c   :  { %3368 = vmatpush3.bf16.msra.mxu0 %v3697_v18  ;;  %v3745_v18 = vld [vmem:[%s4732_s1 + $0x510] sm:$0xff]  }
  0x7d   :  { %3390 = vmatpush3.bf16.msra.mxu1 %v3698_v19  ;;  %3369 = vmatprep.subr.bf16.mxu0 %v3699_v20  ;;  %v3746_v19 = vld [vmem:[%s4732_s1 + $0x590] sm:$0xff]   ;;  %v3747_v20 = vld [vmem:[%s4732_s1 + $0x558] sm:$0xff]  }
  0x7e   :  { %3391 = vmatprep.subr.bf16.mxu1 %v3700_v21  ;;  %v3748_v21 = vld [vmem:[%s4732_s1 + $0x5d8] sm:$0xff]  }
  0x80   :  { %3370 = vmatpush3.bf16.msra.mxu0 %v3701_v22  ;;  %v3749_v22 = vld [vmem:[%s4732_s1 + $0x518] sm:$0xff]  }
  0x81   :  { %3392 = vmatpush3.bf16.msra.mxu1 %v3702_v23  ;;  %3399 = vmatprep.subr.bf16.mxu0 %v3703_v32  ;;  %v3750_v23 = vld [vmem:[%s4732_s1 + $0x598] sm:$0xff]   ;;  %v3759_v32 = vld [vmem:[%s4732_s1 + $0x570] sm:$0xff]  }
  0x82   :  { %3421 = vmatprep.subr.bf16.mxu1 %v3704_v33  ;;  %v3760_v33 = vld [vmem:[%s4732_s1 + $0x5f0] sm:$0xff]  }
  0x83   :  { %2541 = vmatmul.mubr.bf16.vlgmr.msra.gmra.mrb[12].mxu0 %v2947_v27  ;;  %v3754_v27 = vld [vmem:[%s4732_s1 + $0x5a0] sm:$0xff]  }
  0x84   :  { %2582 = vmatmul.mubr.bf16.vlgmr.msra.gmra.mrb[12].mxu1 %v2949_v30  ;;  %3400 = vmatpush3.bf16.msra.mxu0 %v3705_v34  ;;  %v3757_v30 = vld [vmem:[%s4732_s1 + $0x528] sm:$0xff]   ;;  %v3761_v34 = vld [vmem:[%s4732_s1 + $0x530] sm:$0xff]  }
  0x85   :  { %3422 = vmatpush3.bf16.msra.mxu1 %v3706_v35  ;;  %3401 = vmatprep.subr.bf16.mxu0 %v3707_v36  ;;  %v3762_v35 = vld [vmem:[%s4732_s1 + $0x5b0] sm:$0xff]   ;;  %v3763_v36 = vld [vmem:[%s4732_s1 + $0x578] sm:$0xff]  }
  0x86   :  { %3423 = vmatprep.subr.bf16.mxu1 %v3708_v37  ;;  %2622 = vmatprep.mubr.bf16.mxu0 %v2952_v3  ;;  %v3764_v37 = vld [vmem:[%s4732_s1 + $0x5f8] sm:$0xff]   ;;  %v3786_v3 = vld [vmem:[%s4732_s1 + $0x6a0] sm:$0xff]  }
  0x87   :  { %2663 = vmatprep.mubr.bf16.mxu1 %v2954_v7  ;;  %v3790_v7 = vld [vmem:[%s4732_s1 + $0x6a8] sm:$0xff]  }
  0x88   :  { %3402 = vmatpush3.bf16.msra.mxu0 %v3709_v38  ;;  %v3765_v38 = vld [vmem:[%s4732_s1 + $0x538] sm:$0xff]  }
  0x89   :  { %3424 = vmatpush3.bf16.msra.mxu1 %v3710_v39  ;;  %3403 = vmatprep.subr.bf16.mxu0 %v3711_v40  ;;  %v3766_v39 = vld [vmem:[%s4732_s1 + $0x5b8] sm:$0xff]   ;;  %v25_v40 = vld [vmem:[%s4733_s0 + $0x50] sm:$0xff] }
  0x8a   :  { %3425 = vmatprep.subr.bf16.mxu1 %v3712_v41  ;;  %v41_v41 = vld [vmem:[%s4733_s0 + $0xd0] sm:$0xff] }
  0x8c   :  { %3404 = vmatpush3.bf16.msra.mxu0 %v3713_v42  ;;  %v26_v42 = vld [vmem:[%s4733_s0 + $0x58] sm:$0xff] }
  0x8d   :  { %3426 = vmatpush3.bf16.msra.mxu1 %v3714_v43  ;;  %3405 = vmatprep.subr.bf16.mxu0 %v3715_v44  ;;  %v42_v43 = vld [vmem:[%s4733_s0 + $0xd8] sm:$0xff]  ;;  %v2955_v44 = vcombine.low %v25_v40, %v41_v41 }
  0x8e   :  { %3427 = vmatprep.subr.bf16.mxu1 %v3716_v45  ;;  %v2956_v45 = vcombine.high %v25_v40, %v41_v41  ;;  %v3814_v41 = vld [vmem:[%s4732_s1 + $0x798] sm:$0xff]  }
  0x90   :  { %3406 = vmatpush3.bf16.msra.mxu0 %v3717_v46  ;;  %v2957_v46 = vcombine.low %v26_v42, %v42_v43 }
  0x91   :  { %3428 = vmatpush3.bf16.msra.mxu1 %v3718_v47  ;;  %3407 = vmatprep.subr.bf16.mxu0 %v3719_v48  ;;  %v2958_v47 = vcombine.high %v26_v42, %v42_v43  ;;  %v3767_v48 = vld [vmem:[%s4732_s1 + $0x640] sm:$0xff]  }
  0x92   :  { %3429 = vmatprep.subr.bf16.mxu1 %v3720_v49  ;;  %v3768_v49 = vld [vmem:[%s4732_s1 + $0x6c0] sm:$0xff]  }
  0x93   :  { %v3815_v43 = vld [vmem:[%s4732_s1 + $0x760] sm:$0xff]  }
  0x94   :  { %3408 = vmatpush3.bf16.msra.mxu0 %v3721_v50  ;;  %v3769_v50 = vld [vmem:[%s4732_s1 + $0x600] sm:$0xff]  }
  0x95   :  { %3430 = vmatpush3.bf16.msra.mxu1 %v3722_v51  ;;  %3409 = vmatprep.subr.bf16.mxu0 %v3723_v52  ;;  %v3770_v51 = vld [vmem:[%s4732_s1 + $0x680] sm:$0xff]   ;;  %v3771_v52 = vld [vmem:[%s4732_s1 + $0x648] sm:$0xff]  }
  0x96   :  { %3431 = vmatprep.subr.bf16.mxu1 %v3724_v53  ;;  %v3772_v53 = vld [vmem:[%s4732_s1 + $0x6c8] sm:$0xff]  }
  0x98   :  { %3410 = vmatpush3.bf16.msra.mxu0 %v3725_v54  ;;  %v3773_v54 = vld [vmem:[%s4732_s1 + $0x608] sm:$0xff]  }
  0x99   :  { %3432 = vmatpush3.bf16.msra.mxu1 %v3726_v55  ;;  %3411 = vmatprep.subr.bf16.mxu0 %v3727_v56  ;;  %v3774_v55 = vld [vmem:[%s4732_s1 + $0x688] sm:$0xff]   ;;  %v3775_v56 = vld [vmem:[%s4732_s1 + $0x650] sm:$0xff]  }
  0x9a   :  { %3433 = vmatprep.subr.bf16.mxu1 %v3728_v57  ;;  %v3776_v57 = vld [vmem:[%s4732_s1 + $0x6d0] sm:$0xff]  }
  0x9c   :  { %3412 = vmatpush3.bf16.msra.mxu0 %v3729_v58  ;;  %v3777_v58 = vld [vmem:[%s4732_s1 + $0x610] sm:$0xff]  }
  0x9d   :  { %3434 = vmatpush3.bf16.msra.mxu1 %v3730_v59  ;;  %3413 = vmatprep.subr.bf16.mxu0 %v3731_v60  ;;  %v3778_v59 = vld [vmem:[%s4732_s1 + $0x690] sm:$0xff]   ;;  %v3779_v60 = vld [vmem:[%s4732_s1 + $0x658] sm:$0xff]  }
  0x9e   :  { %3435 = vmatprep.subr.bf16.mxu1 %v3732_v61  ;;  %v3780_v61 = vld [vmem:[%s4732_s1 + $0x6d8] sm:$0xff]  }
  0xa0   :  { %3414 = vmatpush3.bf16.msra.mxu0 %v3733_v62  ;;  %v3781_v62 = vld [vmem:[%s4732_s1 + $0x618] sm:$0xff]  }
  0xa1   :  { %3436 = vmatpush3.bf16.msra.mxu1 %v3734_v63  ;;  %3443 = vmatprep.subr.bf16.mxu0 %v3735_v8  ;;  %v3782_v63 = vld [vmem:[%s4732_s1 + $0x698] sm:$0xff]   ;;  %v3791_v8 = vld [vmem:[%s4732_s1 + $0x670] sm:$0xff]  }
  0xa2   :  { %3465 = vmatprep.subr.bf16.mxu1 %v3736_v9  ;;  %v3792_v9 = vld [vmem:[%s4732_s1 + $0x6f0] sm:$0xff]  }
  0xa3   :  { %2623 = vmatmul.mubr.bf16.vlgmr.msra.gmra.mrb[16].mxu0 %v2951_v2  ;;  %v3785_v2 = vld [vmem:[%s4732_s1 + $0x620] sm:$0xff]  }
  0xa4   :  { %2664 = vmatmul.mubr.bf16.vlgmr.msra.gmra.mrb[16].mxu1 %v2953_v6  ;;  %3444 = vmatpush3.bf16.msra.mxu0 %v3737_v10  ;;  %v3789_v6 = vld [vmem:[%s4732_s1 + $0x628] sm:$0xff]   ;;  %v3793_v10 = vld [vmem:[%s4732_s1 + $0x630] sm:$0xff]  }
  0xa5   :  { %3466 = vmatpush3.bf16.msra.mxu1 %v3738_v11  ;;  %3445 = vmatprep.subr.bf16.mxu0 %v3739_v12  ;;  %v3794_v11 = vld [vmem:[%s4732_s1 + $0x6b0] sm:$0xff]   ;;  %v3795_v12 = vld [vmem:[%s4732_s1 + $0x678] sm:$0xff]  }
  0xa6   :  { %3467 = vmatprep.subr.bf16.mxu1 %v3740_v13  ;;  %2704 = vmatprep.mubr.bf16.mxu0 %v2956_v45  ;;  %v3796_v13 = vld [vmem:[%s4732_s1 + $0x6f8] sm:$0xff]  }
  0xa7   :  { %2745 = vmatprep.mubr.bf16.mxu1 %v2958_v47 }
  0xa8   :  { %3446 = vmatpush3.bf16.msra.mxu0 %v3741_v14  ;;  %v3797_v14 = vld [vmem:[%s4732_s1 + $0x638] sm:$0xff]  }
  0xa9   :  { %3468 = vmatpush3.bf16.msra.mxu1 %v3742_v15  ;;  %3447 = vmatprep.subr.bf16.mxu0 %v3743_v16  ;;  %v3798_v15 = vld [vmem:[%s4732_s1 + $0x6b8] sm:$0xff]   ;;  %v27_v16 = vld [vmem:[%s4733_s0 + $0x60] sm:$0xff] }
  0xaa   :  { %3469 = vmatprep.subr.bf16.mxu1 %v3744_v17  ;;  %v43_v17 = vld [vmem:[%s4733_s0 + $0xe0] sm:$0xff] }
  0xac   :  { %3448 = vmatpush3.bf16.msra.mxu0 %v3745_v18  ;;  %v28_v18 = vld [vmem:[%s4733_s0 + $0x68] sm:$0xff] }
  0xad   :  { %3470 = vmatpush3.bf16.msra.mxu1 %v3746_v19  ;;  %3449 = vmatprep.subr.bf16.mxu0 %v3747_v20  ;;  %v2959_v19 = vcombine.low %v27_v16, %v43_v17  ;;  %v2960_v20 = vcombine.high %v27_v16, %v43_v17 }
  0xae   :  { %3471 = vmatprep.subr.bf16.mxu1 %v3748_v21  ;;  %v44_v21 = vld [vmem:[%s4733_s0 + $0xe8] sm:$0xff] }
  0xb0   :  { %3450 = vmatpush3.bf16.msra.mxu0 %v3749_v22  ;;  %v2961_v22 = vcombine.low %v28_v18, %v44_v21 }
  0xb1   :  { %3472 = vmatpush3.bf16.msra.mxu1 %v3750_v23  ;;  %3451 = vmatprep.subr.bf16.mxu0 %v3751_v24  ;;  %v2962_v23 = vcombine.high %v28_v18, %v44_v21  ;;  %v3799_v24 = vld [vmem:[%s4732_s1 + $0x740] sm:$0xff]  }
  0xb2   :  { %3473 = vmatprep.subr.bf16.mxu1 %v3752_v25  ;;  %v3800_v25 = vld [vmem:[%s4732_s1 + $0x7c0] sm:$0xff]  }
  0xb4   :  { %3452 = vmatpush3.bf16.msra.mxu0 %v3753_v26  ;;  %v3801_v26 = vld [vmem:[%s4732_s1 + $0x700] sm:$0xff]  }
  0xb5   :  { %3474 = vmatpush3.bf16.msra.mxu1 %v3754_v27  ;;  %3453 = vmatprep.subr.bf16.mxu0 %v3755_v28  ;;  %v3802_v27 = vld [vmem:[%s4732_s1 + $0x780] sm:$0xff]   ;;  %v3803_v28 = vld [vmem:[%s4732_s1 + $0x748] sm:$0xff]  }
  0xb6   :  { %3475 = vmatprep.subr.bf16.mxu1 %v3756_v29  ;;  %v3804_v29 = vld [vmem:[%s4732_s1 + $0x7c8] sm:$0xff]  }
  0xb8   :  { %3454 = vmatpush3.bf16.msra.mxu0 %v3757_v30  ;;  %v3805_v30 = vld [vmem:[%s4732_s1 + $0x708] sm:$0xff]  }
  0xb9   :  { %3476 = vmatpush3.bf16.msra.mxu1 %v3758_v31  ;;  %3455 = vmatprep.subr.bf16.mxu0 %v3759_v32  ;;  %v3806_v31 = vld [vmem:[%s4732_s1 + $0x788] sm:$0xff]   ;;  %v3807_v32 = vld [vmem:[%s4732_s1 + $0x750] sm:$0xff]  }
  0xba   :  { %3477 = vmatprep.subr.bf16.mxu1 %v3760_v33  ;;  %v3808_v33 = vld [vmem:[%s4732_s1 + $0x7d0] sm:$0xff]  }
  0xbc   :  { %3456 = vmatpush3.bf16.msra.mxu0 %v3761_v34  ;;  %v3809_v34 = vld [vmem:[%s4732_s1 + $0x710] sm:$0xff]  }
  0xbd   :  { %3478 = vmatpush3.bf16.msra.mxu1 %v3762_v35  ;;  %3457 = vmatprep.subr.bf16.mxu0 %v3763_v36  ;;  %v3810_v35 = vld [vmem:[%s4732_s1 + $0x790] sm:$0xff]   ;;  %v3811_v36 = vld [vmem:[%s4732_s1 + $0x758] sm:$0xff]  }
  0xbe   :  { %3479 = vmatprep.subr.bf16.mxu1 %v3764_v37  ;;  %v3812_v37 = vld [vmem:[%s4732_s1 + $0x7d8] sm:$0xff]  }
  0xc0   :  { %3458 = vmatpush3.bf16.msra.mxu0 %v3765_v38 }
  0xc1   :  { %3480 = vmatpush3.bf16.msra.mxu1 %v3766_v39  ;;  %3487 = vmatprep.subr.bf16.mxu0 %v3767_v48  ;;  %v3813_v39 = vld [vmem:[%s4732_s1 + $0x718] sm:$0xff]  }
  0xc2   :  { %3509 = vmatprep.subr.bf16.mxu1 %v3768_v49  ;;  %v3817_v49 = vld [vmem:[%s4732_s1 + $0x720] sm:$0xff]  }
  0xc3   :  { %2705 = vmatmul.mubr.bf16.vlgmr.msra.gmra.mrb[20].mxu0 %v2955_v44 }
  0xc4   :  { %2746 = vmatmul.mubr.bf16.vlgmr.msra.gmra.mrb[20].mxu1 %v2957_v46  ;;  %3488 = vmatpush3.bf16.msra.mxu0 %v3769_v50  ;;  %v3816_v46 = vld [vmem:[%s4732_s1 + $0x7e0] sm:$0xff]  }
  0xc5   :  { %3510 = vmatpush3.bf16.msra.mxu1 %v3770_v51  ;;  %3489 = vmatprep.subr.bf16.mxu0 %v3771_v52  ;;  %v3818_v51 = vld [vmem:[%s4732_s1 + $0x7a0] sm:$0xff]  }
  0xc6   :  { %3511 = vmatprep.subr.bf16.mxu1 %v3772_v53  ;;  %2786 = vmatprep.mubr.bf16.mxu0 %v2960_v20  ;;  %v2934_v52 = vld [vmem:[%s4734_s2] ss:$0 sm:$0xff] }
  0xc7   :  { %2827 = vmatprep.mubr.bf16.mxu1 %v2962_v23 }
  0xc8   :  { %3490 = vmatpush3.bf16.msra.mxu0 %v3773_v54 }
  0xc9   :  { %3512 = vmatpush3.bf16.msra.mxu1 %v3774_v55  ;;  %3491 = vmatprep.subr.bf16.mxu0 %v3775_v56  ;;  %v3819_v55 = vld [vmem:[%s4732_s1 + $0x768] sm:$0xff]  }
  0xca   :  { %3513 = vmatprep.subr.bf16.mxu1 %v3776_v57 }
  0xcc   :  { %3492 = vmatpush3.bf16.msra.mxu0 %v3777_v58  ;;  %v3820_v58 = vld [vmem:[%s4732_s1 + $0x7e8] sm:$0xff]  }
  0xcd   :  { %3514 = vmatpush3.bf16.msra.mxu1 %v3778_v59  ;;  %3493 = vmatprep.subr.bf16.mxu0 %v3779_v60 }
  0xce   :  { %3515 = vmatprep.subr.bf16.mxu1 %v3780_v61  ;;  %v3821_v61 = vld [vmem:[%s4732_s1 + $0x728] sm:$0xff]  }
  0xd0   :  { %3494 = vmatpush3.bf16.msra.mxu0 %v3781_v62 }
  0xd1   :  { %3516 = vmatpush3.bf16.msra.mxu1 %v3782_v63  ;;  %3495 = vmatprep.subr.bf16.mxu0 %v3783_v0  ;;  %v3822_v63 = vld [vmem:[%s4732_s1 + $0x7a8] sm:$0xff]  }
  0xd2   :  { %3517 = vmatprep.subr.bf16.mxu1 %v3784_v1  ;;  %v3823_v1 = vld [vmem:[%s4732_s1 + $0x770] sm:$0xff]  }
  0xd4   :  { %3496 = vmatpush3.bf16.msra.mxu0 %v3785_v2  ;;  %v3824_v2 = vld [vmem:[%s4732_s1 + $0x7f0] sm:$0xff]  }
  0xd5   :  { %3518 = vmatpush3.bf16.msra.mxu1 %v3786_v3  ;;  %3497 = vmatprep.subr.bf16.mxu0 %v3787_v4  ;;  %v3825_v3 = vld [vmem:[%s4732_s1 + $0x730] sm:$0xff]  }
  0xd6   :  { %3519 = vmatprep.subr.bf16.mxu1 %v3788_v5  ;;  %v3826_v4 = vld [vmem:[%s4732_s1 + $0x7b0] sm:$0xff]   ;;  %v3827_v5 = vld [vmem:[%s4732_s1 + $0x778] sm:$0xff]  }
  0xd8   :  { %3498 = vmatpush3.bf16.msra.mxu0 %v3789_v6  ;;  %v3828_v6 = vld [vmem:[%s4732_s1 + $0x7f8] sm:$0xff]  }
  0xd9   :  { %3520 = vmatpush3.bf16.msra.mxu1 %v3790_v7  ;;  %3499 = vmatprep.subr.bf16.mxu0 %v3791_v8  ;;  %v3829_v7 = vld [vmem:[%s4732_s1 + $0x738] sm:$0xff]  }
  0xda   :  { %3521 = vmatprep.subr.bf16.mxu1 %v3792_v9  ;;  %v3830_v8 = vld [vmem:[%s4732_s1 + $0x7b8] sm:$0xff]   ;;  %v29_v9 = vld [vmem:[%s4733_s0 + $0x70] sm:$0xff] }
  0xdc   :  { %3500 = vmatpush3.bf16.msra.mxu0 %v3793_v10  ;;  %v45_v10 = vld [vmem:[%s4733_s0 + $0xf0] sm:$0xff] }
  0xdd   :  { %3522 = vmatpush3.bf16.msra.mxu1 %v3794_v11  ;;  %3501 = vmatprep.subr.bf16.mxu0 %v3795_v12  ;;  %v30_v11 = vld [vmem:[%s4733_s0 + $0x78] sm:$0xff] }
  0xde   :  { %3523 = vmatprep.subr.bf16.mxu1 %v3796_v13  ;;  %v46_v12 = vld [vmem:[%s4733_s0 + $0xf8] sm:$0xff]  ;;  %v2963_v13 = vcombine.low %v29_v9, %v45_v10 }
  0xdf   :  { %v2966_v16 = vcombine.high %v30_v11, %v46_v12 }
  0xe0   :  { %3502 = vmatpush3.bf16.msra.mxu0 %v3797_v14  ;;  %v2964_v14 = vcombine.high %v29_v9, %v45_v10 }
  0xe1   :  { %3524 = vmatpush3.bf16.msra.mxu1 %v3798_v15  ;;  %3531 = vmatprep.subr.bf16.mxu0 %v3799_v24  ;;  %v2965_v15 = vcombine.low %v30_v11, %v46_v12 }
  0xe2   :  { %3553 = vmatprep.subr.bf16.mxu1 %v3800_v25 }
  0xe3   :  { %2787 = vmatmul.mubr.bf16.vlgmr.msra.gmra.mrb[24].mxu0 %v2959_v19 }
  0xe4   :  { %2828 = vmatmul.mubr.bf16.vlgmr.msra.gmra.mrb[24].mxu1 %v2961_v22  ;;  %3532 = vmatpush3.bf16.msra.mxu0 %v3801_v26 }
  0xe5   :  { %3554 = vmatpush3.bf16.msra.mxu1 %v3802_v27  ;;  %3533 = vmatprep.subr.bf16.mxu0 %v3803_v28 }
  0xe6   :  { %3555 = vmatprep.subr.bf16.mxu1 %v3804_v29  ;;  %2868 = vmatprep.mubr.bf16.mxu0 %v2964_v14 }
  0xe7   :  { %2909 = vmatprep.mubr.bf16.mxu1 %v2966_v16 }
  0xe8   :  { %3534 = vmatpush3.bf16.msra.mxu0 %v3805_v30 }
  0xe9   :  { %3556 = vmatpush3.bf16.msra.mxu1 %v3806_v31  ;;  %3535 = vmatprep.subr.bf16.mxu0 %v3807_v32 }
  0xea   :  { %3557 = vmatprep.subr.bf16.mxu1 %v3808_v33 }
  0xec   :  { %3536 = vmatpush3.bf16.msra.mxu0 %v3809_v34 }
  0xed   :  { %3558 = vmatpush3.bf16.msra.mxu1 %v3810_v35  ;;  %3537 = vmatprep.subr.bf16.mxu0 %v3811_v36 }
  0xee   :  { %3559 = vmatprep.subr.bf16.mxu1 %v3812_v37 }
  0xf0   :  { %3538 = vmatpush3.bf16.msra.mxu0 %v3813_v39 }
  0xf1   :  { %3560 = vmatpush3.bf16.msra.mxu1 %v3814_v41  ;;  %3539 = vmatprep.subr.bf16.mxu0 %v3815_v43 }
  0xf2   :  { %3561 = vmatprep.subr.bf16.mxu1 %v3816_v46 }
  0xf4   :  { %3540 = vmatpush3.bf16.msra.mxu0 %v3817_v49 }
  0xf5   :  { %3562 = vmatpush3.bf16.msra.mxu1 %v3818_v51  ;;  %3541 = vmatprep.subr.bf16.mxu0 %v3819_v55 }
  0xf6   :  { %v3239_v38 = vpop.f32.mrb[0].mxu0  ;;  %3563 = vmatprep.subr.bf16.mxu1 %v3820_v58 }
  0xf7   :  { %v3261_v40 = vpop.f32.mrb[0].mxu1  ;;  %v3240_v42 = vpop.f32.mrb[1].mxu0 }
  0xf8   :  { %v3241_v44 = vadd.f32 %v3240_v42, %v3239_v38  ;;  %v3262_v45 = vpop.f32.mrb[1].mxu1  ;;  %v3242_v48 = vpop.f32.mrb[2].mxu0  ;;  %3542 = vmatpush3.bf16.msra.mxu0 %v3821_v61 }
  0xf9   :  { %v3263_v47 = vadd.f32 %v3262_v45, %v3261_v40  ;;  %v3264_v50 = vpop.f32.mrb[2].mxu1  ;;  %v3243_v53 = vpop.f32.mrb[3].mxu0  ;;  %3564 = vmatpush3.bf16.msra.mxu1 %v3822_v63  ;;  %3543 = vmatprep.subr.bf16.mxu0 %v3823_v1 }
  0xfa   :  { %v2297_v54 = vadd.f32 %v3241_v44, %v2934_v52  ;;  %v3244_v56 = vadd.f32 %v3243_v53, %v3242_v48  ;;  %v3265_v57 = vpop.f32.mrb[3].mxu1  ;;  %3565 = vmatprep.subr.bf16.mxu1 %v3824_v2 }
  0xfb   :  { %v3266_v59 = vadd.f32 %v3265_v57, %v3264_v50 }
  0xfc   :  { %v2338_v60 = vadd.f32 %v3263_v47, %v2297_v54  ;;  %v2300_v62 = vadd.f32 %v3244_v56, %v2934_v52  ;;  %3544 = vmatpush3.bf16.msra.mxu0 %v3825_v3 }
  0xfd   :  { %3566 = vmatpush3.bf16.msra.mxu1 %v3826_v4  ;;  %3545 = vmatprep.subr.bf16.mxu0 %v3827_v5 }
  0xfe   :  { %v2341_v0 = vadd.f32 %v3266_v59, %v2300_v62  ;;  %3567 = vmatprep.subr.bf16.mxu1 %v3828_v6 }
 0x100   :  { %3546 = vmatpush3.bf16.msra.mxu0 %v3829_v7 }
 0x101   :  { %3568 = vmatpush3.bf16.msra.mxu1 %v3830_v8 }
 0x103   :  { %2869 = vmatmul.mubr.bf16.vlgmr.msra.gmra.mrb[28].mxu0 %v2963_v13 }
 0x104   :  { %2910 = vmatmul.mubr.bf16.vlgmr.msra.gmra.mrb[28].mxu1 %v2965_v15 }
 0x116   :  { %v3283_v17 = vpop.f32.mrb[4].mxu0 }
 0x117   :  { %v3305_v18 = vpop.f32.mrb[4].mxu1  ;;  %v3284_v19 = vpop.f32.mrb[5].mxu0 }
 0x118   :  { %v3285_v20 = vadd.f32 %v3284_v19, %v3283_v17  ;;  %v3306_v21 = vpop.f32.mrb[5].mxu1  ;;  %v3286_v22 = vpop.f32.mrb[6].mxu0 }
 0x119   :  { %v3307_v23 = vadd.f32 %v3306_v21, %v3305_v18  ;;  %v3308_v24 = vpop.f32.mrb[6].mxu1  ;;  %v3287_v25 = vpop.f32.mrb[7].mxu0 }
 0x11a   :  { %v2379_v26 = vadd.f32 %v3285_v20, %v2338_v60  ;;  %v3288_v27 = vadd.f32 %v3287_v25, %v3286_v22  ;;  %v3309_v28 = vpop.f32.mrb[7].mxu1 }
 0x11b   :  { %v3310_v29 = vadd.f32 %v3309_v28, %v3308_v24 }
 0x11c   :  { %v2420_v30 = vadd.f32 %v3307_v23, %v2379_v26  ;;  %v2382_v31 = vadd.f32 %v3288_v27, %v2341_v0 }
 0x11e   :  { %v2423_v32 = vadd.f32 %v3310_v29, %v2382_v31 }
 0x136   :  { %v3327_v33 = vpop.f32.mrb[8].mxu0 }
 0x137   :  { %v3349_v34 = vpop.f32.mrb[8].mxu1  ;;  %v3328_v35 = vpop.f32.mrb[9].mxu0 }
 0x138   :  { %v3350_v36 = vpop.f32.mrb[9].mxu1  ;;  %v3329_v37 = vadd.f32 %v3328_v35, %v3327_v33  ;;  %v3330_v39 = vpop.f32.mrb[10].mxu0 }
 0x139   :  { %v3351_v38 = vadd.f32 %v3350_v36, %v3349_v34  ;;  %v3352_v40 = vpop.f32.mrb[10].mxu1  ;;  %v3331_v41 = vpop.f32.mrb[11].mxu0 }
 0x13a   :  { %v3353_v42 = vpop.f32.mrb[11].mxu1  ;;  %v2461_v43 = vadd.f32 %v3329_v37, %v2420_v30  ;;  %v3332_v44 = vadd.f32 %v3331_v41, %v3330_v39 }
 0x13b   :  { %v3354_v45 = vadd.f32 %v3353_v42, %v3352_v40 }
 0x13c   :  { %v2502_v46 = vadd.f32 %v3351_v38, %v2461_v43  ;;  %v2464_v47 = vadd.f32 %v3332_v44, %v2423_v32 }
 0x13e   :  { %v2505_v48 = vadd.f32 %v3354_v45, %v2464_v47 }
 0x156   :  { %v3371_v49 = vpop.f32.mrb[12].mxu0 }
 0x157   :  { %v3393_v50 = vpop.f32.mrb[12].mxu1  ;;  %v3372_v51 = vpop.f32.mrb[13].mxu0 }
 0x158   :  { %v3373_v52 = vadd.f32 %v3372_v51, %v3371_v49  ;;  %v3394_v53 = vpop.f32.mrb[13].mxu1  ;;  %v3374_v54 = vpop.f32.mrb[14].mxu0 }
 0x159   :  { %v3395_v55 = vadd.f32 %v3394_v53, %v3393_v50  ;;  %v3396_v56 = vpop.f32.mrb[14].mxu1  ;;  %v3375_v57 = vpop.f32.mrb[15].mxu0 }
 0x15a   :  { %v2543_v58 = vadd.f32 %v3373_v52, %v2502_v46  ;;  %v3376_v59 = vadd.f32 %v3375_v57, %v3374_v54  ;;  %v3397_v60 = vpop.f32.mrb[15].mxu1 }
 0x15b   :  { %v3398_v61 = vadd.f32 %v3397_v60, %v3396_v56 }
 0x15c   :  { %v2584_v62 = vadd.f32 %v3395_v55, %v2543_v58  ;;  %v2546_v63 = vadd.f32 %v3376_v59, %v2505_v48 }
 0x15e   :  { %v2587_v0 = vadd.f32 %v3398_v61, %v2546_v63 }
 0x176   :  { %v3415_v1 = vpop.f32.mrb[16].mxu0 }
 0x177   :  { %v3437_v2 = vpop.f32.mrb[16].mxu1  ;;  %v3416_v3 = vpop.f32.mrb[17].mxu0 }
 0x178   :  { %v3417_v4 = vadd.f32 %v3416_v3, %v3415_v1  ;;  %v3438_v5 = vpop.f32.mrb[17].mxu1  ;;  %v3418_v6 = vpop.f32.mrb[18].mxu0 }
 0x179   :  { %v3439_v7 = vadd.f32 %v3438_v5, %v3437_v2  ;;  %v3440_v8 = vpop.f32.mrb[18].mxu1  ;;  %v3419_v9 = vpop.f32.mrb[19].mxu0 }
 0x17a   :  { %v2625_v10 = vadd.f32 %v3417_v4, %v2584_v62  ;;  %v3420_v11 = vadd.f32 %v3419_v9, %v3418_v6  ;;  %v3441_v12 = vpop.f32.mrb[19].mxu1 }
 0x17b   :  { %v3442_v13 = vadd.f32 %v3441_v12, %v3440_v8 }
 0x17c   :  { %v2666_v14 = vadd.f32 %v3439_v7, %v2625_v10  ;;  %v2628_v15 = vadd.f32 %v3420_v11, %v2587_v0 }
 0x17e   :  { %v2669_v16 = vadd.f32 %v3442_v13, %v2628_v15 }
 0x196   :  { %v3459_v17 = vpop.f32.mrb[20].mxu0 }
 0x197   :  { %v3481_v18 = vpop.f32.mrb[20].mxu1  ;;  %v3460_v19 = vpop.f32.mrb[21].mxu0 }
 0x198   :  { %v3482_v20 = vpop.f32.mrb[21].mxu1  ;;  %v3461_v21 = vadd.f32 %v3460_v19, %v3459_v17  ;;  %v3462_v23 = vpop.f32.mrb[22].mxu0 }
 0x199   :  { %v3483_v22 = vadd.f32 %v3482_v20, %v3481_v18  ;;  %v3484_v24 = vpop.f32.mrb[22].mxu1  ;;  %v3463_v25 = vpop.f32.mrb[23].mxu0 }
 0x19a   :  { %v3485_v26 = vpop.f32.mrb[23].mxu1  ;;  %v2707_v27 = vadd.f32 %v3461_v21, %v2666_v14  ;;  %v3464_v28 = vadd.f32 %v3463_v25, %v3462_v23 }
 0x19b   :  { %v3486_v29 = vadd.f32 %v3485_v26, %v3484_v24 }
 0x19c   :  { %v2748_v30 = vadd.f32 %v3483_v22, %v2707_v27  ;;  %v2710_v31 = vadd.f32 %v3464_v28, %v2669_v16 }
 0x19e   :  { %v2751_v32 = vadd.f32 %v3486_v29, %v2710_v31 }
 0x1b6   :  { %v3503_v33 = vpop.f32.mrb[24].mxu0 }
 0x1b7   :  { %v3525_v34 = vpop.f32.mrb[24].mxu1  ;;  %v3504_v35 = vpop.f32.mrb[25].mxu0 }
 0x1b8   :  { %v3505_v36 = vadd.f32 %v3504_v35, %v3503_v33  ;;  %v3526_v37 = vpop.f32.mrb[25].mxu1  ;;  %v3506_v38 = vpop.f32.mrb[26].mxu0 }
 0x1b9   :  { %v3527_v39 = vadd.f32 %v3526_v37, %v3525_v34  ;;  %v3528_v40 = vpop.f32.mrb[26].mxu1  ;;  %v3507_v41 = vpop.f32.mrb[27].mxu0 }
 0x1ba   :  { %v2789_v42 = vadd.f32 %v3505_v36, %v2748_v30  ;;  %v3508_v43 = vadd.f32 %v3507_v41, %v3506_v38  ;;  %v3529_v44 = vpop.f32.mrb[27].mxu1 }
 0x1bb   :  { %v3530_v45 = vadd.f32 %v3529_v44, %v3528_v40 }
 0x1bc   :  { %v2830_v46 = vadd.f32 %v3527_v39, %v2789_v42  ;;  %v2792_v47 = vadd.f32 %v3508_v43, %v2751_v32 }
 0x1be   :  { %v2833_v48 = vadd.f32 %v3530_v45, %v2792_v47 }
 0x1d6   :  { %v3547_v49 = vpop.f32.mrb[28].mxu0 }
 0x1d7   :  { %v3569_v50 = vpop.f32.mrb[28].mxu1  ;;  %v3548_v51 = vpop.f32.mrb[29].mxu0 }
 0x1d8   :  { %v3570_v52 = vpop.f32.mrb[29].mxu1  ;;  %v3549_v53 = vadd.f32 %v3548_v51, %v3547_v49  ;;  %v3550_v55 = vpop.f32.mrb[30].mxu0 }
 0x1d9   :  { %v3571_v54 = vadd.f32 %v3570_v52, %v3569_v50  ;;  %v3572_v56 = vpop.f32.mrb[30].mxu1  ;;  %v3551_v57 = vpop.f32.mrb[31].mxu0 }
 0x1da   :  { %v3573_v58 = vpop.f32.mrb[31].mxu1  ;;  %v2871_v59 = vadd.f32 %v3549_v53, %v2830_v46  ;;  %v3552_v60 = vadd.f32 %v3551_v57, %v3550_v55 }
 0x1db   :  { %v3574_v61 = vadd.f32 %v3573_v58, %v3572_v56 }
 0x1dc   :  { %v2912_v62 = vadd.f32 %v3571_v54, %v2871_v59  ;;  %v2874_v63 = vadd.f32 %v3552_v60, %v2833_v48 }
 0x1de   :  { %v2918_v0 = vsub.f32 0.0, %v2912_v62  ;;  %v2915_v1 = vadd.f32 %v3574_v61, %v2874_v63 }
 0x1e0   :  { %v2920_v2 = vmul.f32 1.442695, %v2918_v0  ;;  %v2919_v3 = vsub.f32 0.0, %v2915_v1 }
 0x1e2   :  { %3831 = vpow2.f32 %v2920_v2  ;;  %v2922_v4 = vmul.f32 1.442695, %v2919_v3 }
 0x1e4   :  { %3833 = vpow2.f32 %v2922_v4 }
 0x1ec   :  { %v3832_v5 = vpop.eup %3831 }
 0x1ed   :  { %v2924_v6 = vadd.f32 1.0, %v3832_v5 }
 0x1ee   :  { %v3834_v7 = vpop.eup %3833 }
 0x1ef   :  { %3835 = vrcp.f32 %v2924_v6  ;;  %v2925_v8 = vadd.f32 1.0, %v3834_v7 }
 0x1f1   :  { %3837 = vrcp.f32 %v2925_v8 }
 0x1f9   :  { %v3836_v9 = vpop.eup %3835 }
 0x1fa   :  { %2928 = vst [vmem:[%s4735_s3] sm:$0xff] %v3836_v9 }
 0x1fb   :  { %v3838_v10 = vpop.eup %3837 }
 0x1fc   :  { %2929 = vst [vmem:[%s4735_s3 + $0x8] sm:$0xff] %v3838_v10 }

</bundles_post_ra>
